<compile_context>
chip_gen: v7x
topology: tpu7x:2x2x1
jax: 0.10.0
libtpu: 0.0.40
codegen_flags: <defaults>
</compile_context>

<pallas_src>
import functools
import math

import jax
import jax.numpy as jnp
from jax.experimental import pallas as pl
from jax.experimental.pallas import tpu as pltpu

LN_EPS = 1e-5
C_PAD = 128  # lane-dense output width


def _layer_norm(x, w, b):
    mu = jnp.mean(x, axis=-1, keepdims=True)
    var = jnp.mean((x - mu) ** 2, axis=-1, keepdims=True)
    return (x - mu) * jax.lax.rsqrt(var + LN_EPS) * w + b


# ----------------------------- kernel --------------------------------------- #

def fused_model_kernel(x_ref,
                       wq_ref, wk_ref, wv_ref, bq_ref, bk_ref, bv_ref,
                       wo_ref, bo_ref, w1_ref, b1_ref, w2_ref, b2_ref,
                       ln1w_ref, ln1b_ref, ln2w_ref, ln2b_ref,
                       wconv_ref, bconv_ref, whead_ref, bhead_ref,
                       o_ref, *, nhead):
    S, E = x_ref.shape[1], x_ref.shape[2]
    L = wq_ref.shape[0]
    dh = E // nhead
    scale = 1.0 / math.sqrt(dh)
    bf16 = jnp.bfloat16
    f32 = jnp.float32

    # Per-batch activation (S, E) stays resident (VMEM / vregs) the whole forward.
    x = x_ref[0]

    # ------------------ Transformer encoder layers (post-norm) -------------- #
    for l in range(L):
        xb = x.astype(bf16)
        attn = jnp.zeros((S, E), f32)
        for h in range(nhead):
            # Narrow per-head projections: leading-dim weight indexing, no lane
            # slicing of activations; MXU matmuls with f32 accumulation.
            qh = jnp.dot(xb, wq_ref[l, h], preferred_element_type=f32) + bq_ref[l, h]
            kh = jnp.dot(xb, wk_ref[l, h], preferred_element_type=f32) + bk_ref[l, h]
            vh = jnp.dot(xb, wv_ref[l, h], preferred_element_type=f32) + bv_ref[l, h]

            # scores = (q*scale) @ k^T, per batch element -> (S, S), no mask needed
            s = jax.lax.dot_general(
                (qh * scale).astype(bf16), kh.astype(bf16),
                dimension_numbers=(((1,), (1,)), ((), ())),
                preferred_element_type=f32)
            s = s - jnp.max(s, axis=-1, keepdims=True)
            p = jnp.exp(s)
            p = p / jnp.sum(p, axis=-1, keepdims=True)   # exact reciprocal

            oh = jnp.dot(p.astype(bf16), vh.astype(bf16), preferred_element_type=f32)
            # Accumulating narrow out-projection (no head lane-concat).
            attn = attn + jnp.dot(oh.astype(bf16), wo_ref[l, h],
                                  preferred_element_type=f32)
        attn = attn + bo_ref[l]

        h1 = _layer_norm(x + attn, ln1w_ref[l], ln1b_ref[l])

        f = jnp.dot(h1.astype(bf16), w1_ref[l], preferred_element_type=f32) + b1_ref[l]
        f = jnp.maximum(f, 0.0)
        f = jnp.dot(f.astype(bf16), w2_ref[l], preferred_element_type=f32) + b2_ref[l]

        x = _layer_norm(h1 + f, ln2w_ref[l], ln2b_ref[l])

    # ------------- Conv1d(E,E,k=3,pad=1) x2, channels-last over S ----------- #
    row = jax.lax.broadcasted_iota(jnp.int32, (S, E), 0)
    left_ok = row != 0            # rows with a valid x[s-1]
    right_ok = row != (S - 1)     # rows with a valid x[s+1]
    for c in range(wconv_ref.shape[0]):
        x_prev = jnp.where(left_ok, pltpu.roll(x, shift=1, axis=0), 0.0)       # x[s-1]
        x_next = jnp.where(right_ok, pltpu.roll(x, shift=S - 1, axis=0), 0.0)  # x[s+1]
        x = (jnp.dot(x_prev.astype(bf16), wconv_ref[c, 0], preferred_element_type=f32)
             + jnp.dot(x.astype(bf16), wconv_ref[c, 1], preferred_element_type=f32)
             + jnp.dot(x_next.astype(bf16), wconv_ref[c, 2], preferred_element_type=f32)
             + bconv_ref[c])

    # --------------------- mean over sequence + Linear head ----------------- #
    m = jnp.mean(x, axis=0, keepdims=True)                                     # (1, E)
    logits = jnp.dot(m.astype(bf16), whead_ref[...],
                     preferred_element_type=f32) + bhead_ref[...]              # (1, 128)
    o_ref[...] = logits.reshape(o_ref.shape)


# ----------------------------- wrapper --------------------------------------- #

PARAM_ORDER = ("wq", "wk", "wv", "bq", "bk", "bv", "wo", "bo",
               "w1", "b1", "w2", "b2", "ln1w", "ln1b", "ln2w", "ln2b",
               "wconv", "bconv")


def transformer_classifier_forward(x, params, *, nhead, num_classes):
    B, S, E = x.shape
    L = params["wq"].shape[0]
    F = params["w1"].shape[-1]
    dh = E // nhead

    # Wrapper-side layout plumbing: lane-pad the head to 128 output lanes.
    whead = params["whead"]
    bhead = params["bhead"]
    whead_p = jnp.zeros((E, C_PAD), whead.dtype).at[:, :whead.shape[1]].set(whead)
    bhead_p = jnp.zeros((1, C_PAD), bhead.dtype).at[:, :bhead.shape[1]].set(bhead)

    args = (x,) + tuple(params[k] for k in PARAM_ORDER) + (whead_p, bhead_p)

    # Advisory cost estimate for XLA's scheduler.
    flops_attn = 2 * S * E * E * 4 + 2 * nhead * S * S * dh * 2
    flops_ffn = 2 * S * E * F * 2
    flops_layer = flops_attn + flops_ffn
    flops_conv = 2 * (3 * 2 * S * E * E)
    flops_head = 2 * E * C_PAD
    flops = B * (L * flops_layer + flops_conv + flops_head)
    transcendentals = B * L * nhead * S * S
    bytes_accessed = sum(int(a.size) * a.dtype.itemsize for a in args) + B * C_PAD * 4
    cost = pl.CostEstimate(flops=int(flops), transcendentals=int(transcendentals),
                           bytes_accessed=int(bytes_accessed))

    vmem = pltpu.MemorySpace.VMEM
    out = pl.pallas_call(
        functools.partial(fused_model_kernel, nhead=nhead),
        grid=(B,),
        in_specs=[pl.BlockSpec((1, S, E), lambda b: (b, 0, 0))]
                 + [pl.BlockSpec(memory_space=vmem)] * (len(args) - 1),
        out_specs=pl.BlockSpec((1, 1, C_PAD), lambda b: (b, 0, 0)),
        out_shape=jax.ShapeDtypeStruct((B, 1, C_PAD), jnp.float32),
        compiler_params=pltpu.CompilerParams(
            dimension_semantics=("parallel",)),
        cost_estimate=cost,
    )(*args)
    return out[:, 0, :num_classes]


# ----------------------------- reference (pure JAX, f32) --------------------- #

def reference_forward(x, params, *, nhead):
    B, S, E = x.shape
    L = params["wq"].shape[0]
    dh = E // nhead
    scale = 1.0 / math.sqrt(dh)
    cf = lambda a: a.astype(jnp.float32)

    h = x.astype(jnp.float32)
    for l in range(L):
        q = jnp.einsum("bse,hed->bhsd", h, cf(params["wq"][l])) + params["bq"][l]
        k = jnp.einsum("bse,hed->bhsd", h, cf(params["wk"][l])) + params["bk"][l]
        v = jnp.einsum("bse,hed->bhsd", h, cf(params["wv"][l])) + params["bv"][l]
        s = jnp.einsum("bhsd,bhtd->bhst", q * scale, k)
        p = jax.nn.softmax(s, axis=-1)
        o = jnp.einsum("bhst,bhtd->bhsd", p, v)
        attn = jnp.einsum("bhsd,hde->bse", o, cf(params["wo"][l])) + params["bo"][l]
        h1 = _layer_norm(h + attn, params["ln1w"][l], params["ln1b"][l])
        f = jnp.maximum(jnp.einsum("bse,ef->bsf", h1, cf(params["w1"][l])) + params["b1"][l], 0.0)
        f = jnp.einsum("bsf,fe->bse", f, cf(params["w2"][l])) + params["b2"][l]
        h = _layer_norm(h1 + f, params["ln2w"][l], params["ln2b"][l])

    for c in range(params["wconv"].shape[0]):
        zrow = jnp.zeros_like(h[:, :1])
        xl = jnp.concatenate([zrow, h[:, :-1]], axis=1)   # x[s-1], zero at s=0
        xr = jnp.concatenate([h[:, 1:], zrow], axis=1)    # x[s+1], zero at s=S-1
        h = (jnp.einsum("bse,eo->bso", xl, cf(params["wconv"][c, 0]))
             + jnp.einsum("bse,eo->bso", h, cf(params["wconv"][c, 1]))
             + jnp.einsum("bse,eo->bso", xr, cf(params["wconv"][c, 2]))
             + params["bconv"][c])

    m = h.mean(axis=1)
    return m @ cf(params["whead"]) + params["bhead"]


# ----------------------------- param init ------------------------------------ #

def init_params(key, E, F, L, C, nhead):
    dh = E // nhead
    s = 0.1
    ks = jax.random.split(key, 16)

    def w(k, shape):  # matmul weights stored bf16 (MXU operands)
        return (jax.random.normal(k, shape, jnp.float32) * s).astype(jnp.bfloat16)

    def b(k, shape):  # biases stay f32 (VPU path)
        return jax.random.normal(k, shape, jnp.float32) * s

    return dict(
        wq=w(ks[0], (L, nhead, E, dh)), wk=w(ks[1], (L, nhead, E, dh)),
        wv=w(ks[2], (L, nhead, E, dh)),
        bq=b(ks[3], (L, nhead, 1, dh)), bk=b(ks[4], (L, nhead, 1, dh)),
        bv=b(ks[5], (L, nhead, 1, dh)),
        wo=w(ks[6], (L, nhead, dh, E)), bo=b(ks[7], (L, 1, E)),
        w1=w(ks[8], (L, E, F)), b1=b(ks[9], (L, 1, F)),
        w2=w(ks[10], (L, F, E)), b2=b(ks[11], (L, 1, E)),
        ln1w=jnp.ones((L, 1, E), jnp.float32), ln1b=jnp.zeros((L, 1, E), jnp.float32),
        ln2w=jnp.ones((L, 1, E), jnp.float32), ln2b=jnp.zeros((L, 1, E), jnp.float32),
        wconv=w(ks[12], (2, 3, E, E)), bconv=b(ks[13], (2, 1, E)),
        whead=w(ks[14], (E, C)), bhead=b(ks[15], (1, C)),
    )


# ----------------------------- main ------------------------------------------ #

if __name__ == "__main__":
    # Small, module-consistent config (nhead | embedding_dim).
    B, S, E = 2, 8, 32
    NHEAD = 4
    NUM_LAYERS = 2
    DIM_FF = 64
    NUM_CLASSES = 4

    key = jax.random.PRNGKey(0)
    kx, kp = jax.random.split(key)
    x = jax.random.normal(kx, (B, S, E), jnp.float32)
    params = init_params(kp, E, DIM_FF, NUM_LAYERS, NUM_CLASSES, NHEAD)

    fwd = jax.jit(functools.partial(transformer_classifier_forward,
                                    nhead=NHEAD, num_classes=NUM_CLASSES))
    logits = fwd(x, params)
    jax.block_until_ready(logits)
    assert logits.shape == (B, NUM_CLASSES)

    ref = reference_forward(x, params, nhead=NHEAD)
    assert jnp.allclose(logits, ref, rtol=2e-2, atol=2e-2), (logits, ref)
    print("KERNEL_OK")
</pallas_src>

<mosaic_0001>
module attributes {stable_mosaic.version = 11 : i64} {
  func.func @fused_model_kernel(%arg0: i32, %arg1: memref<1x8x32xf32, #tpu.memory_space<vmem>>, %arg2: memref<2x4x32x8xbf16, #tpu.memory_space<vmem>>, %arg3: memref<2x4x32x8xbf16, #tpu.memory_space<vmem>>, %arg4: memref<2x4x32x8xbf16, #tpu.memory_space<vmem>>, %arg5: memref<2x4x1x8xf32, #tpu.memory_space<vmem>>, %arg6: memref<2x4x1x8xf32, #tpu.memory_space<vmem>>, %arg7: memref<2x4x1x8xf32, #tpu.memory_space<vmem>>, %arg8: memref<2x4x8x32xbf16, #tpu.memory_space<vmem>>, %arg9: memref<2x1x32xf32, #tpu.memory_space<vmem>>, %arg10: memref<2x32x64xbf16, #tpu.memory_space<vmem>>, %arg11: memref<2x1x64xf32, #tpu.memory_space<vmem>>, %arg12: memref<2x64x32xbf16, #tpu.memory_space<vmem>>, %arg13: memref<2x1x32xf32, #tpu.memory_space<vmem>>, %arg14: memref<2x1x32xf32, #tpu.memory_space<vmem>>, %arg15: memref<2x1x32xf32, #tpu.memory_space<vmem>>, %arg16: memref<2x1x32xf32, #tpu.memory_space<vmem>>, %arg17: memref<2x1x32xf32, #tpu.memory_space<vmem>>, %arg18: memref<2x3x32x32xbf16, #tpu.memory_space<vmem>>, %arg19: memref<2x1x32xf32, #tpu.memory_space<vmem>>, %arg20: memref<32x128xbf16, #tpu.memory_space<vmem>>, %arg21: memref<1x128xf32, #tpu.memory_space<vmem>>, %arg22: memref<1x1x128xf32, #tpu.memory_space<vmem>>) attributes {dimension_semantics = [#tpu.dimension_semantics<parallel>], iteration_bounds = array<i64: 2>, scalar_prefetch = 0 : i64, scratch_operands = 0 : i64, tpu.core_type = #tpu.core_type<tc>, window_params = [{transform_indices = @transform_0, window_bounds = array<i64: 1, 8, 32>}, {pipeline_mode = #tpu.pipeline_mode<synchronous>, transform_indices = @transform_1, window_bounds = array<i64: 2, 4, 32, 8>}, {pipeline_mode = #tpu.pipeline_mode<synchronous>, transform_indices = @transform_2, window_bounds = array<i64: 2, 4, 32, 8>}, {pipeline_mode = #tpu.pipeline_mode<synchronous>, transform_indices = @transform_3, window_bounds = array<i64: 2, 4, 32, 8>}, {pipeline_mode = #tpu.pipeline_mode<synchronous>, transform_indices = @transform_4, window_bounds = array<i64: 2, 4, 1, 8>}, {pipeline_mode = #tpu.pipeline_mode<synchronous>, transform_indices = @transform_5, window_bounds = array<i64: 2, 4, 1, 8>}, {pipeline_mode = #tpu.pipeline_mode<synchronous>, transform_indices = @transform_6, window_bounds = array<i64: 2, 4, 1, 8>}, {pipeline_mode = #tpu.pipeline_mode<synchronous>, transform_indices = @transform_7, window_bounds = array<i64: 2, 4, 8, 32>}, {pipeline_mode = #tpu.pipeline_mode<synchronous>, transform_indices = @transform_8, window_bounds = array<i64: 2, 1, 32>}, {pipeline_mode = #tpu.pipeline_mode<synchronous>, transform_indices = @transform_9, window_bounds = array<i64: 2, 32, 64>}, {pipeline_mode = #tpu.pipeline_mode<synchronous>, transform_indices = @transform_10, window_bounds = array<i64: 2, 1, 64>}, {pipeline_mode = #tpu.pipeline_mode<synchronous>, transform_indices = @transform_11, window_bounds = array<i64: 2, 64, 32>}, {pipeline_mode = #tpu.pipeline_mode<synchronous>, transform_indices = @transform_12, window_bounds = array<i64: 2, 1, 32>}, {pipeline_mode = #tpu.pipeline_mode<synchronous>, transform_indices = @transform_13, window_bounds = array<i64: 2, 1, 32>}, {pipeline_mode = #tpu.pipeline_mode<synchronous>, transform_indices = @transform_14, window_bounds = array<i64: 2, 1, 32>}, {pipeline_mode = #tpu.pipeline_mode<synchronous>, transform_indices = @transform_15, window_bounds = array<i64: 2, 1, 32>}, {pipeline_mode = #tpu.pipeline_mode<synchronous>, transform_indices = @transform_16, window_bounds = array<i64: 2, 1, 32>}, {pipeline_mode = #tpu.pipeline_mode<synchronous>, transform_indices = @transform_17, window_bounds = array<i64: 2, 3, 32, 32>}, {pipeline_mode = #tpu.pipeline_mode<synchronous>, transform_indices = @transform_18, window_bounds = array<i64: 2, 1, 32>}, {pipeline_mode = #tpu.pipeline_mode<synchronous>, transform_indices = @transform_19, window_bounds = array<i64: 32, 128>}, {pipeline_mode = #tpu.pipeline_mode<synchronous>, transform_indices = @transform_20, window_bounds = array<i64: 1, 128>}, {transform_indices = @transform_21, window_bounds = array<i64: 1, 1, 128>}]} {
    %c0 = arith.constant 0 : index
    %c0_0 = arith.constant 0 : index
    %c0_1 = arith.constant 0 : index
    %0 = vector.load %arg1[%c0, %c0_0, %c0_1] : memref<1x8x32xf32, #tpu.memory_space<vmem>>, vector<1x8x32xf32>
    %1 = vector.shape_cast %0 : vector<1x8x32xf32> to vector<8x32xf32>
    %2 = arith.truncf %1 : vector<8x32xf32> to vector<8x32xbf16>
    %cst = arith.constant 0.000000e+00 : f32
    %3 = vector.broadcast %cst : f32 to vector<8x32xf32>
    %c0_2 = arith.constant 0 : index
    %c0_3 = arith.constant 0 : index
    %c0_4 = arith.constant 0 : index
    %c0_5 = arith.constant 0 : index
    %4 = vector.load %arg2[%c0_2, %c0_3, %c0_4, %c0_5] : memref<2x4x32x8xbf16, #tpu.memory_space<vmem>>, vector<1x1x32x8xbf16>
    %5 = vector.shape_cast %4 : vector<1x1x32x8xbf16> to vector<32x8xbf16>
    %cst_6 = arith.constant dense<0.000000e+00> : vector<8x8xf32>
    %6 = tpu.matmul %2, %5, %cst_6 {dimension_numbers = #tpu.dot_dimension_numbers<[1], [0], [0], [1], [0, 0, 1, 1], [], []>} : vector<8x32xbf16>, vector<32x8xbf16>, vector<8x8xf32> -> vector<8x8xf32>
    %c0_7 = arith.constant 0 : index
    %c0_8 = arith.constant 0 : index
    %c0_9 = arith.constant 0 : index
    %c0_10 = arith.constant 0 : index
    %7 = vector.load %arg5[%c0_7, %c0_8, %c0_9, %c0_10] : memref<2x4x1x8xf32, #tpu.memory_space<vmem>>, vector<1x1x1x8xf32>
    %8 = vector.shape_cast %7 : vector<1x1x1x8xf32> to vector<1x8xf32>
    %9 = vector.broadcast %8 : vector<1x8xf32> to vector<8x8xf32>
    %10 = arith.addf %6, %9 : vector<8x8xf32>
    %c0_11 = arith.constant 0 : index
    %c0_12 = arith.constant 0 : index
    %c0_13 = arith.constant 0 : index
    %c0_14 = arith.constant 0 : index
    %11 = vector.load %arg3[%c0_11, %c0_12, %c0_13, %c0_14] : memref<2x4x32x8xbf16, #tpu.memory_space<vmem>>, vector<1x1x32x8xbf16>
    %12 = vector.shape_cast %11 : vector<1x1x32x8xbf16> to vector<32x8xbf16>
    %cst_15 = arith.constant dense<0.000000e+00> : vector<8x8xf32>
    %13 = tpu.matmul %2, %12, %cst_15 {dimension_numbers = #tpu.dot_dimension_numbers<[1], [0], [0], [1], [0, 0, 1, 1], [], []>} : vector<8x32xbf16>, vector<32x8xbf16>, vector<8x8xf32> -> vector<8x8xf32>
    %c0_16 = arith.constant 0 : index
    %c0_17 = arith.constant 0 : index
    %c0_18 = arith.constant 0 : index
    %c0_19 = arith.constant 0 : index
    %14 = vector.load %arg6[%c0_16, %c0_17, %c0_18, %c0_19] : memref<2x4x1x8xf32, #tpu.memory_space<vmem>>, vector<1x1x1x8xf32>
    %15 = vector.shape_cast %14 : vector<1x1x1x8xf32> to vector<1x8xf32>
    %16 = vector.broadcast %15 : vector<1x8xf32> to vector<8x8xf32>
    %17 = arith.addf %13, %16 : vector<8x8xf32>
    %c0_20 = arith.constant 0 : index
    %c0_21 = arith.constant 0 : index
    %c0_22 = arith.constant 0 : index
    %c0_23 = arith.constant 0 : index
    %18 = vector.load %arg4[%c0_20, %c0_21, %c0_22, %c0_23] : memref<2x4x32x8xbf16, #tpu.memory_space<vmem>>, vector<1x1x32x8xbf16>
    %19 = vector.shape_cast %18 : vector<1x1x32x8xbf16> to vector<32x8xbf16>
    %cst_24 = arith.constant dense<0.000000e+00> : vector<8x8xf32>
    %20 = tpu.matmul %2, %19, %cst_24 {dimension_numbers = #tpu.dot_dimension_numbers<[1], [0], [0], [1], [0, 0, 1, 1], [], []>} : vector<8x32xbf16>, vector<32x8xbf16>, vector<8x8xf32> -> vector<8x8xf32>
    %c0_25 = arith.constant 0 : index
    %c0_26 = arith.constant 0 : index
    %c0_27 = arith.constant 0 : index
    %c0_28 = arith.constant 0 : index
    %21 = vector.load %arg7[%c0_25, %c0_26, %c0_27, %c0_28] : memref<2x4x1x8xf32, #tpu.memory_space<vmem>>, vector<1x1x1x8xf32>
    %22 = vector.shape_cast %21 : vector<1x1x1x8xf32> to vector<1x8xf32>
    %23 = vector.broadcast %22 : vector<1x8xf32> to vector<8x8xf32>
    %24 = arith.addf %20, %23 : vector<8x8xf32>
    %cst_29 = arith.constant 0.353553385 : f32
    %25 = vector.broadcast %cst_29 : f32 to vector<8x8xf32>
    %26 = arith.mulf %10, %25 : vector<8x8xf32>
    %27 = arith.truncf %26 : vector<8x8xf32> to vector<8x8xbf16>
    %28 = arith.truncf %17 : vector<8x8xf32> to vector<8x8xbf16>
    %cst_30 = arith.constant dense<0.000000e+00> : vector<8x8xf32>
    %29 = tpu.matmul %27, %28, %cst_30 {dimension_numbers = #tpu.dot_dimension_numbers<[1], [1], [0], [0], [0, 0, 1, 0], [], []>} : vector<8x8xbf16>, vector<8x8xbf16>, vector<8x8xf32> -> vector<8x8xf32>
    %cst_31 = arith.constant dense<0xFF800000> : vector<8xf32>
    %30 = vector.multi_reduction <maximumf>, %29, %cst_31 [1] : vector<8x8xf32> to vector<8xf32>
    %31 = vector.shape_cast %30 : vector<8xf32> to vector<8x1xf32>
    %32 = vector.broadcast %31 : vector<8x1xf32> to vector<8x8xf32>
    %33 = arith.subf %29, %32 : vector<8x8xf32>
    %34 = math.exp %33 : vector<8x8xf32>
    %cst_32 = arith.constant dense<0.000000e+00> : vector<8xf32>
    %35 = vector.multi_reduction <add>, %34, %cst_32 [1] : vector<8x8xf32> to vector<8xf32>
    %36 = vector.shape_cast %35 : vector<8xf32> to vector<8x1xf32>
    %37 = vector.broadcast %36 : vector<8x1xf32> to vector<8x8xf32>
    %38 = arith.divf %34, %37 : vector<8x8xf32>
    %39 = arith.truncf %38 : vector<8x8xf32> to vector<8x8xbf16>
    %40 = arith.truncf %24 : vector<8x8xf32> to vector<8x8xbf16>
    %cst_33 = arith.constant dense<0.000000e+00> : vector<8x8xf32>
    %41 = tpu.matmul %39, %40, %cst_33 {dimension_numbers = #tpu.dot_dimension_numbers<[1], [0], [0], [1], [0, 0, 1, 1], [], []>} : vector<8x8xbf16>, vector<8x8xbf16>, vector<8x8xf32> -> vector<8x8xf32>
    %42 = arith.truncf %41 : vector<8x8xf32> to vector<8x8xbf16>
    %c0_34 = arith.constant 0 : index
    %c0_35 = arith.constant 0 : index
    %c0_36 = arith.constant 0 : index
    %c0_37 = arith.constant 0 : index
    %43 = vector.load %arg8[%c0_34, %c0_35, %c0_36, %c0_37] : memref<2x4x8x32xbf16, #tpu.memory_space<vmem>>, vector<1x1x8x32xbf16>
    %44 = vector.shape_cast %43 : vector<1x1x8x32xbf16> to vector<8x32xbf16>
    %cst_38 = arith.constant dense<0.000000e+00> : vector<8x32xf32>
    %45 = tpu.matmul %42, %44, %cst_38 {dimension_numbers = #tpu.dot_dimension_numbers<[1], [0], [0], [1], [0, 0, 1, 1], [], []>} : vector<8x8xbf16>, vector<8x32xbf16>, vector<8x32xf32> -> vector<8x32xf32>
    %46 = arith.addf %3, %45 : vector<8x32xf32>
    %c0_39 = arith.constant 0 : index
    %c1 = arith.constant 1 : index
    %c0_40 = arith.constant 0 : index
    %c0_41 = arith.constant 0 : index
    %47 = vector.load %arg2[%c0_39, %c1, %c0_40, %c0_41] : memref<2x4x32x8xbf16, #tpu.memory_space<vmem>>, vector<1x1x32x8xbf16>
    %48 = vector.shape_cast %47 : vector<1x1x32x8xbf16> to vector<32x8xbf16>
    %cst_42 = arith.constant dense<0.000000e+00> : vector<8x8xf32>
    %49 = tpu.matmul %2, %48, %cst_42 {dimension_numbers = #tpu.dot_dimension_numbers<[1], [0], [0], [1], [0, 0, 1, 1], [], []>} : vector<8x32xbf16>, vector<32x8xbf16>, vector<8x8xf32> -> vector<8x8xf32>
    %c0_43 = arith.constant 0 : index
    %c1_44 = arith.constant 1 : index
    %c0_45 = arith.constant 0 : index
    %c0_46 = arith.constant 0 : index
    %50 = vector.load %arg5[%c0_43, %c1_44, %c0_45, %c0_46] : memref<2x4x1x8xf32, #tpu.memory_space<vmem>>, vector<1x1x1x8xf32>
    %51 = vector.shape_cast %50 : vector<1x1x1x8xf32> to vector<1x8xf32>
    %52 = vector.broadcast %51 : vector<1x8xf32> to vector<8x8xf32>
    %53 = arith.addf %49, %52 : vector<8x8xf32>
    %c0_47 = arith.constant 0 : index
    %c1_48 = arith.constant 1 : index
    %c0_49 = arith.constant 0 : index
    %c0_50 = arith.constant 0 : index
    %54 = vector.load %arg3[%c0_47, %c1_48, %c0_49, %c0_50] : memref<2x4x32x8xbf16, #tpu.memory_space<vmem>>, vector<1x1x32x8xbf16>
    %55 = vector.shape_cast %54 : vector<1x1x32x8xbf16> to vector<32x8xbf16>
    %cst_51 = arith.constant dense<0.000000e+00> : vector<8x8xf32>
    %56 = tpu.matmul %2, %55, %cst_51 {dimension_numbers = #tpu.dot_dimension_numbers<[1], [0], [0], [1], [0, 0, 1, 1], [], []>} : vector<8x32xbf16>, vector<32x8xbf16>, vector<8x8xf32> -> vector<8x8xf32>
    %c0_52 = arith.constant 0 : index
    %c1_53 = arith.constant 1 : index
    %c0_54 = arith.constant 0 : index
    %c0_55 = arith.constant 0 : index
    %57 = vector.load %arg6[%c0_52, %c1_53, %c0_54, %c0_55] : memref<2x4x1x8xf32, #tpu.memory_space<vmem>>, vector<1x1x1x8xf32>
    %58 = vector.shape_cast %57 : vector<1x1x1x8xf32> to vector<1x8xf32>
    %59 = vector.broadcast %58 : vector<1x8xf32> to vector<8x8xf32>
    %60 = arith.addf %56, %59 : vector<8x8xf32>
    %c0_56 = arith.constant 0 : index
    %c1_57 = arith.constant 1 : index
    %c0_58 = arith.constant 0 : index
    %c0_59 = arith.constant 0 : index
    %61 = vector.load %arg4[%c0_56, %c1_57, %c0_58, %c0_59] : memref<2x4x32x8xbf16, #tpu.memory_space<vmem>>, vector<1x1x32x8xbf16>
    %62 = vector.shape_cast %61 : vector<1x1x32x8xbf16> to vector<32x8xbf16>
    %cst_60 = arith.constant dense<0.000000e+00> : vector<8x8xf32>
    %63 = tpu.matmul %2, %62, %cst_60 {dimension_numbers = #tpu.dot_dimension_numbers<[1], [0], [0], [1], [0, 0, 1, 1], [], []>} : vector<8x32xbf16>, vector<32x8xbf16>, vector<8x8xf32> -> vector<8x8xf32>
    %c0_61 = arith.constant 0 : index
    %c1_62 = arith.constant 1 : index
    %c0_63 = arith.constant 0 : index
    %c0_64 = arith.constant 0 : index
    %64 = vector.load %arg7[%c0_61, %c1_62, %c0_63, %c0_64] : memref<2x4x1x8xf32, #tpu.memory_space<vmem>>, vector<1x1x1x8xf32>
    %65 = vector.shape_cast %64 : vector<1x1x1x8xf32> to vector<1x8xf32>
    %66 = vector.broadcast %65 : vector<1x8xf32> to vector<8x8xf32>
    %67 = arith.addf %63, %66 : vector<8x8xf32>
    %cst_65 = arith.constant 0.353553385 : f32
    %68 = vector.broadcast %cst_65 : f32 to vector<8x8xf32>
    %69 = arith.mulf %53, %68 : vector<8x8xf32>
    %70 = arith.truncf %69 : vector<8x8xf32> to vector<8x8xbf16>
    %71 = arith.truncf %60 : vector<8x8xf32> to vector<8x8xbf16>
    %cst_66 = arith.constant dense<0.000000e+00> : vector<8x8xf32>
    %72 = tpu.matmul %70, %71, %cst_66 {dimension_numbers = #tpu.dot_dimension_numbers<[1], [1], [0], [0], [0, 0, 1, 0], [], []>} : vector<8x8xbf16>, vector<8x8xbf16>, vector<8x8xf32> -> vector<8x8xf32>
    %cst_67 = arith.constant dense<0xFF800000> : vector<8xf32>
    %73 = vector.multi_reduction <maximumf>, %72, %cst_67 [1] : vector<8x8xf32> to vector<8xf32>
    %74 = vector.shape_cast %73 : vector<8xf32> to vector<8x1xf32>
    %75 = vector.broadcast %74 : vector<8x1xf32> to vector<8x8xf32>
    %76 = arith.subf %72, %75 : vector<8x8xf32>
    %77 = math.exp %76 : vector<8x8xf32>
    %cst_68 = arith.constant dense<0.000000e+00> : vector<8xf32>
    %78 = vector.multi_reduction <add>, %77, %cst_68 [1] : vector<8x8xf32> to vector<8xf32>
    %79 = vector.shape_cast %78 : vector<8xf32> to vector<8x1xf32>
    %80 = vector.broadcast %79 : vector<8x1xf32> to vector<8x8xf32>
    %81 = arith.divf %77, %80 : vector<8x8xf32>
    %82 = arith.truncf %81 : vector<8x8xf32> to vector<8x8xbf16>
    %83 = arith.truncf %67 : vector<8x8xf32> to vector<8x8xbf16>
    %cst_69 = arith.constant dense<0.000000e+00> : vector<8x8xf32>
    %84 = tpu.matmul %82, %83, %cst_69 {dimension_numbers = #tpu.dot_dimension_numbers<[1], [0], [0], [1], [0, 0, 1, 1], [], []>} : vector<8x8xbf16>, vector<8x8xbf16>, vector<8x8xf32> -> vector<8x8xf32>
    %85 = arith.truncf %84 : vector<8x8xf32> to vector<8x8xbf16>
    %c0_70 = arith.constant 0 : index
    %c1_71 = arith.constant 1 : index
    %c0_72 = arith.constant 0 : index
    %c0_73 = arith.constant 0 : index
    %86 = vector.load %arg8[%c0_70, %c1_71, %c0_72, %c0_73] : memref<2x4x8x32xbf16, #tpu.memory_space<vmem>>, vector<1x1x8x32xbf16>
    %87 = vector.shape_cast %86 : vector<1x1x8x32xbf16> to vector<8x32xbf16>
    %cst_74 = arith.constant dense<0.000000e+00> : vector<8x32xf32>
    %88 = tpu.matmul %85, %87, %cst_74 {dimension_numbers = #tpu.dot_dimension_numbers<[1], [0], [0], [1], [0, 0, 1, 1], [], []>} : vector<8x8xbf16>, vector<8x32xbf16>, vector<8x32xf32> -> vector<8x32xf32>
    %89 = arith.addf %46, %88 : vector<8x32xf32>
    %c0_75 = arith.constant 0 : index
    %c2 = arith.constant 2 : index
    %c0_76 = arith.constant 0 : index
    %c0_77 = arith.constant 0 : index
    %90 = vector.load %arg2[%c0_75, %c2, %c0_76, %c0_77] : memref<2x4x32x8xbf16, #tpu.memory_space<vmem>>, vector<1x1x32x8xbf16>
    %91 = vector.shape_cast %90 : vector<1x1x32x8xbf16> to vector<32x8xbf16>
    %cst_78 = arith.constant dense<0.000000e+00> : vector<8x8xf32>
    %92 = tpu.matmul %2, %91, %cst_78 {dimension_numbers = #tpu.dot_dimension_numbers<[1], [0], [0], [1], [0, 0, 1, 1], [], []>} : vector<8x32xbf16>, vector<32x8xbf16>, vector<8x8xf32> -> vector<8x8xf32>
    %c0_79 = arith.constant 0 : index
    %c2_80 = arith.constant 2 : index
    %c0_81 = arith.constant 0 : index
    %c0_82 = arith.constant 0 : index
    %93 = vector.load %arg5[%c0_79, %c2_80, %c0_81, %c0_82] : memref<2x4x1x8xf32, #tpu.memory_space<vmem>>, vector<1x1x1x8xf32>
    %94 = vector.shape_cast %93 : vector<1x1x1x8xf32> to vector<1x8xf32>
    %95 = vector.broadcast %94 : vector<1x8xf32> to vector<8x8xf32>
    %96 = arith.addf %92, %95 : vector<8x8xf32>
    %c0_83 = arith.constant 0 : index
    %c2_84 = arith.constant 2 : index
    %c0_85 = arith.constant 0 : index
    %c0_86 = arith.constant 0 : index
    %97 = vector.load %arg3[%c0_83, %c2_84, %c0_85, %c0_86] : memref<2x4x32x8xbf16, #tpu.memory_space<vmem>>, vector<1x1x32x8xbf16>
    %98 = vector.shape_cast %97 : vector<1x1x32x8xbf16> to vector<32x8xbf16>
    %cst_87 = arith.constant dense<0.000000e+00> : vector<8x8xf32>
    %99 = tpu.matmul %2, %98, %cst_87 {dimension_numbers = #tpu.dot_dimension_numbers<[1], [0], [0], [1], [0, 0, 1, 1], [], []>} : vector<8x32xbf16>, vector<32x8xbf16>, vector<8x8xf32> -> vector<8x8xf32>
    %c0_88 = arith.constant 0 : index
    %c2_89 = arith.constant 2 : index
    %c0_90 = arith.constant 0 : index
    %c0_91 = arith.constant 0 : index
    %100 = vector.load %arg6[%c0_88, %c2_89, %c0_90, %c0_91] : memref<2x4x1x8xf32, #tpu.memory_space<vmem>>, vector<1x1x1x8xf32>
    %101 = vector.shape_cast %100 : vector<1x1x1x8xf32> to vector<1x8xf32>
    %102 = vector.broadcast %101 : vector<1x8xf32> to vector<8x8xf32>
    %103 = arith.addf %99, %102 : vector<8x8xf32>
    %c0_92 = arith.constant 0 : index
    %c2_93 = arith.constant 2 : index
    %c0_94 = arith.constant 0 : index
    %c0_95 = arith.constant 0 : index
    %104 = vector.load %arg4[%c0_92, %c2_93, %c0_94, %c0_95] : memref<2x4x32x8xbf16, #tpu.memory_space<vmem>>, vector<1x1x32x8xbf16>
    %105 = vector.shape_cast %104 : vector<1x1x32x8xbf16> to vector<32x8xbf16>
    %cst_96 = arith.constant dense<0.000000e+00> : vector<8x8xf32>
    %106 = tpu.matmul %2, %105, %cst_96 {dimension_numbers = #tpu.dot_dimension_numbers<[1], [0], [0], [1], [0, 0, 1, 1], [], []>} : vector<8x32xbf16>, vector<32x8xbf16>, vector<8x8xf32> -> vector<8x8xf32>
    %c0_97 = arith.constant 0 : index
    %c2_98 = arith.constant 2 : index
    %c0_99 = arith.constant 0 : index
    %c0_100 = arith.constant 0 : index
    %107 = vector.load %arg7[%c0_97, %c2_98, %c0_99, %c0_100] : memref<2x4x1x8xf32, #tpu.memory_space<vmem>>, vector<1x1x1x8xf32>
    %108 = vector.shape_cast %107 : vector<1x1x1x8xf32> to vector<1x8xf32>
    %109 = vector.broadcast %108 : vector<1x8xf32> to vector<8x8xf32>
    %110 = arith.addf %106, %109 : vector<8x8xf32>
    %cst_101 = arith.constant 0.353553385 : f32
    %111 = vector.broadcast %cst_101 : f32 to vector<8x8xf32>
    %112 = arith.mulf %96, %111 : vector<8x8xf32>
    %113 = arith.truncf %112 : vector<8x8xf32> to vector<8x8xbf16>
    %114 = arith.truncf %103 : vector<8x8xf32> to vector<8x8xbf16>
    %cst_102 = arith.constant dense<0.000000e+00> : vector<8x8xf32>
    %115 = tpu.matmul %113, %114, %cst_102 {dimension_numbers = #tpu.dot_dimension_numbers<[1], [1], [0], [0], [0, 0, 1, 0], [], []>} : vector<8x8xbf16>, vector<8x8xbf16>, vector<8x8xf32> -> vector<8x8xf32>
    %cst_103 = arith.constant dense<0xFF800000> : vector<8xf32>
    %116 = vector.multi_reduction <maximumf>, %115, %cst_103 [1] : vector<8x8xf32> to vector<8xf32>
    %117 = vector.shape_cast %116 : vector<8xf32> to vector<8x1xf32>
    %118 = vector.broadcast %117 : vector<8x1xf32> to vector<8x8xf32>
    %119 = arith.subf %115, %118 : vector<8x8xf32>
    %120 = math.exp %119 : vector<8x8xf32>
    %cst_104 = arith.constant dense<0.000000e+00> : vector<8xf32>
    %121 = vector.multi_reduction <add>, %120, %cst_104 [1] : vector<8x8xf32> to vector<8xf32>
    %122 = vector.shape_cast %121 : vector<8xf32> to vector<8x1xf32>
    %123 = vector.broadcast %122 : vector<8x1xf32> to vector<8x8xf32>
    %124 = arith.divf %120, %123 : vector<8x8xf32>
    %125 = arith.truncf %124 : vector<8x8xf32> to vector<8x8xbf16>
    %126 = arith.truncf %110 : vector<8x8xf32> to vector<8x8xbf16>
    %cst_105 = arith.constant dense<0.000000e+00> : vector<8x8xf32>
    %127 = tpu.matmul %125, %126, %cst_105 {dimension_numbers = #tpu.dot_dimension_numbers<[1], [0], [0], [1], [0, 0, 1, 1], [], []>} : vector<8x8xbf16>, vector<8x8xbf16>, vector<8x8xf32> -> vector<8x8xf32>
    %128 = arith.truncf %127 : vector<8x8xf32> to vector<8x8xbf16>
    %c0_106 = arith.constant 0 : index
    %c2_107 = arith.constant 2 : index
    %c0_108 = arith.constant 0 : index
    %c0_109 = arith.constant 0 : index
    %129 = vector.load %arg8[%c0_106, %c2_107, %c0_108, %c0_109] : memref<2x4x8x32xbf16, #tpu.memory_space<vmem>>, vector<1x1x8x32xbf16>
    %130 = vector.shape_cast %129 : vector<1x1x8x32xbf16> to vector<8x32xbf16>
    %cst_110 = arith.constant dense<0.000000e+00> : vector<8x32xf32>
    %131 = tpu.matmul %128, %130, %cst_110 {dimension_numbers = #tpu.dot_dimension_numbers<[1], [0], [0], [1], [0, 0, 1, 1], [], []>} : vector<8x8xbf16>, vector<8x32xbf16>, vector<8x32xf32> -> vector<8x32xf32>
    %132 = arith.addf %89, %131 : vector<8x32xf32>
    %c0_111 = arith.constant 0 : index
    %c3 = arith.constant 3 : index
    %c0_112 = arith.constant 0 : index
    %c0_113 = arith.constant 0 : index
    %133 = vector.load %arg2[%c0_111, %c3, %c0_112, %c0_113] : memref<2x4x32x8xbf16, #tpu.memory_space<vmem>>, vector<1x1x32x8xbf16>
    %134 = vector.shape_cast %133 : vector<1x1x32x8xbf16> to vector<32x8xbf16>
    %cst_114 = arith.constant dense<0.000000e+00> : vector<8x8xf32>
    %135 = tpu.matmul %2, %134, %cst_114 {dimension_numbers = #tpu.dot_dimension_numbers<[1], [0], [0], [1], [0, 0, 1, 1], [], []>} : vector<8x32xbf16>, vector<32x8xbf16>, vector<8x8xf32> -> vector<8x8xf32>
    %c0_115 = arith.constant 0 : index
    %c3_116 = arith.constant 3 : index
    %c0_117 = arith.constant 0 : index
    %c0_118 = arith.constant 0 : index
    %136 = vector.load %arg5[%c0_115, %c3_116, %c0_117, %c0_118] : memref<2x4x1x8xf32, #tpu.memory_space<vmem>>, vector<1x1x1x8xf32>
    %137 = vector.shape_cast %136 : vector<1x1x1x8xf32> to vector<1x8xf32>
    %138 = vector.broadcast %137 : vector<1x8xf32> to vector<8x8xf32>
    %139 = arith.addf %135, %138 : vector<8x8xf32>
    %c0_119 = arith.constant 0 : index
    %c3_120 = arith.constant 3 : index
    %c0_121 = arith.constant 0 : index
    %c0_122 = arith.constant 0 : index
    %140 = vector.load %arg3[%c0_119, %c3_120, %c0_121, %c0_122] : memref<2x4x32x8xbf16, #tpu.memory_space<vmem>>, vector<1x1x32x8xbf16>
    %141 = vector.shape_cast %140 : vector<1x1x32x8xbf16> to vector<32x8xbf16>
    %cst_123 = arith.constant dense<0.000000e+00> : vector<8x8xf32>
    %142 = tpu.matmul %2, %141, %cst_123 {dimension_numbers = #tpu.dot_dimension_numbers<[1], [0], [0], [1], [0, 0, 1, 1], [], []>} : vector<8x32xbf16>, vector<32x8xbf16>, vector<8x8xf32> -> vector<8x8xf32>
    %c0_124 = arith.constant 0 : index
    %c3_125 = arith.constant 3 : index
    %c0_126 = arith.constant 0 : index
    %c0_127 = arith.constant 0 : index
    %143 = vector.load %arg6[%c0_124, %c3_125, %c0_126, %c0_127] : memref<2x4x1x8xf32, #tpu.memory_space<vmem>>, vector<1x1x1x8xf32>
    %144 = vector.shape_cast %143 : vector<1x1x1x8xf32> to vector<1x8xf32>
    %145 = vector.broadcast %144 : vector<1x8xf32> to vector<8x8xf32>
    %146 = arith.addf %142, %145 : vector<8x8xf32>
    %c0_128 = arith.constant 0 : index
    %c3_129 = arith.constant 3 : index
    %c0_130 = arith.constant 0 : index
    %c0_131 = arith.constant 0 : index
    %147 = vector.load %arg4[%c0_128, %c3_129, %c0_130, %c0_131] : memref<2x4x32x8xbf16, #tpu.memory_space<vmem>>, vector<1x1x32x8xbf16>
    %148 = vector.shape_cast %147 : vector<1x1x32x8xbf16> to vector<32x8xbf16>
    %cst_132 = arith.constant dense<0.000000e+00> : vector<8x8xf32>
    %149 = tpu.matmul %2, %148, %cst_132 {dimension_numbers = #tpu.dot_dimension_numbers<[1], [0], [0], [1], [0, 0, 1, 1], [], []>} : vector<8x32xbf16>, vector<32x8xbf16>, vector<8x8xf32> -> vector<8x8xf32>
    %c0_133 = arith.constant 0 : index
    %c3_134 = arith.constant 3 : index
    %c0_135 = arith.constant 0 : index
    %c0_136 = arith.constant 0 : index
    %150 = vector.load %arg7[%c0_133, %c3_134, %c0_135, %c0_136] : memref<2x4x1x8xf32, #tpu.memory_space<vmem>>, vector<1x1x1x8xf32>
    %151 = vector.shape_cast %150 : vector<1x1x1x8xf32> to vector<1x8xf32>
    %152 = vector.broadcast %151 : vector<1x8xf32> to vector<8x8xf32>
    %153 = arith.addf %149, %152 : vector<8x8xf32>
    %cst_137 = arith.constant 0.353553385 : f32
    %154 = vector.broadcast %cst_137 : f32 to vector<8x8xf32>
    %155 = arith.mulf %139, %154 : vector<8x8xf32>
    %156 = arith.truncf %155 : vector<8x8xf32> to vector<8x8xbf16>
    %157 = arith.truncf %146 : vector<8x8xf32> to vector<8x8xbf16>
    %cst_138 = arith.constant dense<0.000000e+00> : vector<8x8xf32>
    %158 = tpu.matmul %156, %157, %cst_138 {dimension_numbers = #tpu.dot_dimension_numbers<[1], [1], [0], [0], [0, 0, 1, 0], [], []>} : vector<8x8xbf16>, vector<8x8xbf16>, vector<8x8xf32> -> vector<8x8xf32>
    %cst_139 = arith.constant dense<0xFF800000> : vector<8xf32>
    %159 = vector.multi_reduction <maximumf>, %158, %cst_139 [1] : vector<8x8xf32> to vector<8xf32>
    %160 = vector.shape_cast %159 : vector<8xf32> to vector<8x1xf32>
    %161 = vector.broadcast %160 : vector<8x1xf32> to vector<8x8xf32>
    %162 = arith.subf %158, %161 : vector<8x8xf32>
    %163 = math.exp %162 : vector<8x8xf32>
    %cst_140 = arith.constant dense<0.000000e+00> : vector<8xf32>
    %164 = vector.multi_reduction <add>, %163, %cst_140 [1] : vector<8x8xf32> to vector<8xf32>
    %165 = vector.shape_cast %164 : vector<8xf32> to vector<8x1xf32>
    %166 = vector.broadcast %165 : vector<8x1xf32> to vector<8x8xf32>
    %167 = arith.divf %163, %166 : vector<8x8xf32>
    %168 = arith.truncf %167 : vector<8x8xf32> to vector<8x8xbf16>
    %169 = arith.truncf %153 : vector<8x8xf32> to vector<8x8xbf16>
    %cst_141 = arith.constant dense<0.000000e+00> : vector<8x8xf32>
    %170 = tpu.matmul %168, %169, %cst_141 {dimension_numbers = #tpu.dot_dimension_numbers<[1], [0], [0], [1], [0, 0, 1, 1], [], []>} : vector<8x8xbf16>, vector<8x8xbf16>, vector<8x8xf32> -> vector<8x8xf32>
    %171 = arith.truncf %170 : vector<8x8xf32> to vector<8x8xbf16>
    %c0_142 = arith.constant 0 : index
    %c3_143 = arith.constant 3 : index
    %c0_144 = arith.constant 0 : index
    %c0_145 = arith.constant 0 : index
    %172 = vector.load %arg8[%c0_142, %c3_143, %c0_144, %c0_145] : memref<2x4x8x32xbf16, #tpu.memory_space<vmem>>, vector<1x1x8x32xbf16>
    %173 = vector.shape_cast %172 : vector<1x1x8x32xbf16> to vector<8x32xbf16>
    %cst_146 = arith.constant dense<0.000000e+00> : vector<8x32xf32>
    %174 = tpu.matmul %171, %173, %cst_146 {dimension_numbers = #tpu.dot_dimension_numbers<[1], [0], [0], [1], [0, 0, 1, 1], [], []>} : vector<8x8xbf16>, vector<8x32xbf16>, vector<8x32xf32> -> vector<8x32xf32>
    %175 = arith.addf %132, %174 : vector<8x32xf32>
    %c0_147 = arith.constant 0 : index
    %c0_148 = arith.constant 0 : index
    %c0_149 = arith.constant 0 : index
    %176 = vector.load %arg9[%c0_147, %c0_148, %c0_149] : memref<2x1x32xf32, #tpu.memory_space<vmem>>, vector<1x1x32xf32>
    %177 = vector.shape_cast %176 : vector<1x1x32xf32> to vector<1x32xf32>
    %178 = vector.broadcast %177 : vector<1x32xf32> to vector<8x32xf32>
    %179 = arith.addf %175, %178 : vector<8x32xf32>
    %180 = arith.addf %1, %179 : vector<8x32xf32>
    %c0_150 = arith.constant 0 : index
    %c0_151 = arith.constant 0 : index
    %c0_152 = arith.constant 0 : index
    %181 = vector.load %arg14[%c0_150, %c0_151, %c0_152] : memref<2x1x32xf32, #tpu.memory_space<vmem>>, vector<1x1x32xf32>
    %182 = vector.shape_cast %181 : vector<1x1x32xf32> to vector<1x32xf32>
    %c0_153 = arith.constant 0 : index
    %c0_154 = arith.constant 0 : index
    %c0_155 = arith.constant 0 : index
    %183 = vector.load %arg15[%c0_153, %c0_154, %c0_155] : memref<2x1x32xf32, #tpu.memory_space<vmem>>, vector<1x1x32xf32>
    %184 = vector.shape_cast %183 : vector<1x1x32xf32> to vector<1x32xf32>
    %cst_156 = arith.constant dense<0.000000e+00> : vector<8xf32>
    %185 = vector.multi_reduction <add>, %180, %cst_156 [1] : vector<8x32xf32> to vector<8xf32>
    %186 = vector.shape_cast %185 : vector<8xf32> to vector<8x1xf32>
    %cst_157 = arith.constant 3.200000e+01 : f32
    %187 = vector.broadcast %cst_157 : f32 to vector<8x1xf32>
    %188 = arith.divf %186, %187 : vector<8x1xf32>
    %189 = vector.broadcast %188 : vector<8x1xf32> to vector<8x32xf32>
    %190 = arith.subf %180, %189 : vector<8x32xf32>
    %191 = arith.mulf %190, %190 : vector<8x32xf32>
    %cst_158 = arith.constant dense<0.000000e+00> : vector<8xf32>
    %192 = vector.multi_reduction <add>, %191, %cst_158 [1] : vector<8x32xf32> to vector<8xf32>
    %193 = vector.shape_cast %192 : vector<8xf32> to vector<8x1xf32>
    %cst_159 = arith.constant 3.200000e+01 : f32
    %194 = vector.broadcast %cst_159 : f32 to vector<8x1xf32>
    %195 = arith.divf %193, %194 : vector<8x1xf32>
    %196 = vector.broadcast %188 : vector<8x1xf32> to vector<8x32xf32>
    %197 = arith.subf %180, %196 : vector<8x32xf32>
    %cst_160 = arith.constant 9.99999974E-6 : f32
    %198 = vector.broadcast %cst_160 : f32 to vector<8x1xf32>
    %199 = arith.addf %195, %198 : vector<8x1xf32>
    %200 = math.rsqrt %199 : vector<8x1xf32>
    %201 = vector.broadcast %200 : vector<8x1xf32> to vector<8x32xf32>
    %202 = arith.mulf %197, %201 : vector<8x32xf32>
    %203 = vector.broadcast %182 : vector<1x32xf32> to vector<8x32xf32>
    %204 = arith.mulf %202, %203 : vector<8x32xf32>
    %205 = vector.broadcast %184 : vector<1x32xf32> to vector<8x32xf32>
    %206 = arith.addf %204, %205 : vector<8x32xf32>
    %207 = arith.truncf %206 : vector<8x32xf32> to vector<8x32xbf16>
    %c0_161 = arith.constant 0 : index
    %c0_162 = arith.constant 0 : index
    %c0_163 = arith.constant 0 : index
    %208 = vector.load %arg10[%c0_161, %c0_162, %c0_163] : memref<2x32x64xbf16, #tpu.memory_space<vmem>>, vector<1x32x64xbf16>
    %209 = vector.shape_cast %208 : vector<1x32x64xbf16> to vector<32x64xbf16>
    %cst_164 = arith.constant dense<0.000000e+00> : vector<8x64xf32>
    %210 = tpu.matmul %207, %209, %cst_164 {dimension_numbers = #tpu.dot_dimension_numbers<[1], [0], [0], [1], [0, 0, 1, 1], [], []>} : vector<8x32xbf16>, vector<32x64xbf16>, vector<8x64xf32> -> vector<8x64xf32>
    %c0_165 = arith.constant 0 : index
    %c0_166 = arith.constant 0 : index
    %c0_167 = arith.constant 0 : index
    %211 = vector.load %arg11[%c0_165, %c0_166, %c0_167] : memref<2x1x64xf32, #tpu.memory_space<vmem>>, vector<1x1x64xf32>
    %212 = vector.shape_cast %211 : vector<1x1x64xf32> to vector<1x64xf32>
    %213 = vector.broadcast %212 : vector<1x64xf32> to vector<8x64xf32>
    %214 = arith.addf %210, %213 : vector<8x64xf32>
    %cst_168 = arith.constant 0.000000e+00 : f32
    %215 = vector.broadcast %cst_168 : f32 to vector<8x64xf32>
    %216 = arith.maximumf %214, %215 : vector<8x64xf32>
    %217 = arith.truncf %216 : vector<8x64xf32> to vector<8x64xbf16>
    %c0_169 = arith.constant 0 : index
    %c0_170 = arith.constant 0 : index
    %c0_171 = arith.constant 0 : index
    %218 = vector.load %arg12[%c0_169, %c0_170, %c0_171] : memref<2x64x32xbf16, #tpu.memory_space<vmem>>, vector<1x64x32xbf16>
    %219 = vector.shape_cast %218 : vector<1x64x32xbf16> to vector<64x32xbf16>
    %cst_172 = arith.constant dense<0.000000e+00> : vector<8x32xf32>
    %220 = tpu.matmul %217, %219, %cst_172 {dimension_numbers = #tpu.dot_dimension_numbers<[1], [0], [0], [1], [0, 0, 1, 1], [], []>} : vector<8x64xbf16>, vector<64x32xbf16>, vector<8x32xf32> -> vector<8x32xf32>
    %c0_173 = arith.constant 0 : index
    %c0_174 = arith.constant 0 : index
    %c0_175 = arith.constant 0 : index
    %221 = vector.load %arg13[%c0_173, %c0_174, %c0_175] : memref<2x1x32xf32, #tpu.memory_space<vmem>>, vector<1x1x32xf32>
    %222 = vector.shape_cast %221 : vector<1x1x32xf32> to vector<1x32xf32>
    %223 = vector.broadcast %222 : vector<1x32xf32> to vector<8x32xf32>
    %224 = arith.addf %220, %223 : vector<8x32xf32>
    %225 = arith.addf %206, %224 : vector<8x32xf32>
    %c0_176 = arith.constant 0 : index
    %c0_177 = arith.constant 0 : index
    %c0_178 = arith.constant 0 : index
    %226 = vector.load %arg16[%c0_176, %c0_177, %c0_178] : memref<2x1x32xf32, #tpu.memory_space<vmem>>, vector<1x1x32xf32>
    %227 = vector.shape_cast %226 : vector<1x1x32xf32> to vector<1x32xf32>
    %c0_179 = arith.constant 0 : index
    %c0_180 = arith.constant 0 : index
    %c0_181 = arith.constant 0 : index
    %228 = vector.load %arg17[%c0_179, %c0_180, %c0_181] : memref<2x1x32xf32, #tpu.memory_space<vmem>>, vector<1x1x32xf32>
    %229 = vector.shape_cast %228 : vector<1x1x32xf32> to vector<1x32xf32>
    %cst_182 = arith.constant dense<0.000000e+00> : vector<8xf32>
    %230 = vector.multi_reduction <add>, %225, %cst_182 [1] : vector<8x32xf32> to vector<8xf32>
    %231 = vector.shape_cast %230 : vector<8xf32> to vector<8x1xf32>
    %cst_183 = arith.constant 3.200000e+01 : f32
    %232 = vector.broadcast %cst_183 : f32 to vector<8x1xf32>
    %233 = arith.divf %231, %232 : vector<8x1xf32>
    %234 = vector.broadcast %233 : vector<8x1xf32> to vector<8x32xf32>
    %235 = arith.subf %225, %234 : vector<8x32xf32>
    %236 = arith.mulf %235, %235 : vector<8x32xf32>
    %cst_184 = arith.constant dense<0.000000e+00> : vector<8xf32>
    %237 = vector.multi_reduction <add>, %236, %cst_184 [1] : vector<8x32xf32> to vector<8xf32>
    %238 = vector.shape_cast %237 : vector<8xf32> to vector<8x1xf32>
    %cst_185 = arith.constant 3.200000e+01 : f32
    %239 = vector.broadcast %cst_185 : f32 to vector<8x1xf32>
    %240 = arith.divf %238, %239 : vector<8x1xf32>
    %241 = vector.broadcast %233 : vector<8x1xf32> to vector<8x32xf32>
    %242 = arith.subf %225, %241 : vector<8x32xf32>
    %cst_186 = arith.constant 9.99999974E-6 : f32
    %243 = vector.broadcast %cst_186 : f32 to vector<8x1xf32>
    %244 = arith.addf %240, %243 : vector<8x1xf32>
    %245 = math.rsqrt %244 : vector<8x1xf32>
    %246 = vector.broadcast %245 : vector<8x1xf32> to vector<8x32xf32>
    %247 = arith.mulf %242, %246 : vector<8x32xf32>
    %248 = vector.broadcast %227 : vector<1x32xf32> to vector<8x32xf32>
    %249 = arith.mulf %247, %248 : vector<8x32xf32>
    %250 = vector.broadcast %229 : vector<1x32xf32> to vector<8x32xf32>
    %251 = arith.addf %249, %250 : vector<8x32xf32>
    %252 = arith.truncf %251 : vector<8x32xf32> to vector<8x32xbf16>
    %cst_187 = arith.constant 0.000000e+00 : f32
    %253 = vector.broadcast %cst_187 : f32 to vector<8x32xf32>
    %c1_188 = arith.constant 1 : index
    %c0_189 = arith.constant 0 : index
    %c0_190 = arith.constant 0 : index
    %c0_191 = arith.constant 0 : index
    %254 = vector.load %arg2[%c1_188, %c0_189, %c0_190, %c0_191] : memref<2x4x32x8xbf16, #tpu.memory_space<vmem>>, vector<1x1x32x8xbf16>
    %255 = vector.shape_cast %254 : vector<1x1x32x8xbf16> to vector<32x8xbf16>
    %cst_192 = arith.constant dense<0.000000e+00> : vector<8x8xf32>
    %256 = tpu.matmul %252, %255, %cst_192 {dimension_numbers = #tpu.dot_dimension_numbers<[1], [0], [0], [1], [0, 0, 1, 1], [], []>} : vector<8x32xbf16>, vector<32x8xbf16>, vector<8x8xf32> -> vector<8x8xf32>
    %c1_193 = arith.constant 1 : index
    %c0_194 = arith.constant 0 : index
    %c0_195 = arith.constant 0 : index
    %c0_196 = arith.constant 0 : index
    %257 = vector.load %arg5[%c1_193, %c0_194, %c0_195, %c0_196] : memref<2x4x1x8xf32, #tpu.memory_space<vmem>>, vector<1x1x1x8xf32>
    %258 = vector.shape_cast %257 : vector<1x1x1x8xf32> to vector<1x8xf32>
    %259 = vector.broadcast %258 : vector<1x8xf32> to vector<8x8xf32>
    %260 = arith.addf %256, %259 : vector<8x8xf32>
    %c1_197 = arith.constant 1 : index
    %c0_198 = arith.constant 0 : index
    %c0_199 = arith.constant 0 : index
    %c0_200 = arith.constant 0 : index
    %261 = vector.load %arg3[%c1_197, %c0_198, %c0_199, %c0_200] : memref<2x4x32x8xbf16, #tpu.memory_space<vmem>>, vector<1x1x32x8xbf16>
    %262 = vector.shape_cast %261 : vector<1x1x32x8xbf16> to vector<32x8xbf16>
    %cst_201 = arith.constant dense<0.000000e+00> : vector<8x8xf32>
    %263 = tpu.matmul %252, %262, %cst_201 {dimension_numbers = #tpu.dot_dimension_numbers<[1], [0], [0], [1], [0, 0, 1, 1], [], []>} : vector<8x32xbf16>, vector<32x8xbf16>, vector<8x8xf32> -> vector<8x8xf32>
    %c1_202 = arith.constant 1 : index
    %c0_203 = arith.constant 0 : index
    %c0_204 = arith.constant 0 : index
    %c0_205 = arith.constant 0 : index
    %264 = vector.load %arg6[%c1_202, %c0_203, %c0_204, %c0_205] : memref<2x4x1x8xf32, #tpu.memory_space<vmem>>, vector<1x1x1x8xf32>
    %265 = vector.shape_cast %264 : vector<1x1x1x8xf32> to vector<1x8xf32>
    %266 = vector.broadcast %265 : vector<1x8xf32> to vector<8x8xf32>
    %267 = arith.addf %263, %266 : vector<8x8xf32>
    %c1_206 = arith.constant 1 : index
    %c0_207 = arith.constant 0 : index
    %c0_208 = arith.constant 0 : index
    %c0_209 = arith.constant 0 : index
    %268 = vector.load %arg4[%c1_206, %c0_207, %c0_208, %c0_209] : memref<2x4x32x8xbf16, #tpu.memory_space<vmem>>, vector<1x1x32x8xbf16>
    %269 = vector.shape_cast %268 : vector<1x1x32x8xbf16> to vector<32x8xbf16>
    %cst_210 = arith.constant dense<0.000000e+00> : vector<8x8xf32>
    %270 = tpu.matmul %252, %269, %cst_210 {dimension_numbers = #tpu.dot_dimension_numbers<[1], [0], [0], [1], [0, 0, 1, 1], [], []>} : vector<8x32xbf16>, vector<32x8xbf16>, vector<8x8xf32> -> vector<8x8xf32>
    %c1_211 = arith.constant 1 : index
    %c0_212 = arith.constant 0 : index
    %c0_213 = arith.constant 0 : index
    %c0_214 = arith.constant 0 : index
    %271 = vector.load %arg7[%c1_211, %c0_212, %c0_213, %c0_214] : memref<2x4x1x8xf32, #tpu.memory_space<vmem>>, vector<1x1x1x8xf32>
    %272 = vector.shape_cast %271 : vector<1x1x1x8xf32> to vector<1x8xf32>
    %273 = vector.broadcast %272 : vector<1x8xf32> to vector<8x8xf32>
    %274 = arith.addf %270, %273 : vector<8x8xf32>
    %cst_215 = arith.constant 0.353553385 : f32
    %275 = vector.broadcast %cst_215 : f32 to vector<8x8xf32>
    %276 = arith.mulf %260, %275 : vector<8x8xf32>
    %277 = arith.truncf %276 : vector<8x8xf32> to vector<8x8xbf16>
    %278 = arith.truncf %267 : vector<8x8xf32> to vector<8x8xbf16>
    %cst_216 = arith.constant dense<0.000000e+00> : vector<8x8xf32>
    %279 = tpu.matmul %277, %278, %cst_216 {dimension_numbers = #tpu.dot_dimension_numbers<[1], [1], [0], [0], [0, 0, 1, 0], [], []>} : vector<8x8xbf16>, vector<8x8xbf16>, vector<8x8xf32> -> vector<8x8xf32>
    %cst_217 = arith.constant dense<0xFF800000> : vector<8xf32>
    %280 = vector.multi_reduction <maximumf>, %279, %cst_217 [1] : vector<8x8xf32> to vector<8xf32>
    %281 = vector.shape_cast %280 : vector<8xf32> to vector<8x1xf32>
    %282 = vector.broadcast %281 : vector<8x1xf32> to vector<8x8xf32>
    %283 = arith.subf %279, %282 : vector<8x8xf32>
    %284 = math.exp %283 : vector<8x8xf32>
    %cst_218 = arith.constant dense<0.000000e+00> : vector<8xf32>
    %285 = vector.multi_reduction <add>, %284, %cst_218 [1] : vector<8x8xf32> to vector<8xf32>
    %286 = vector.shape_cast %285 : vector<8xf32> to vector<8x1xf32>
    %287 = vector.broadcast %286 : vector<8x1xf32> to vector<8x8xf32>
    %288 = arith.divf %284, %287 : vector<8x8xf32>
    %289 = arith.truncf %288 : vector<8x8xf32> to vector<8x8xbf16>
    %290 = arith.truncf %274 : vector<8x8xf32> to vector<8x8xbf16>
    %cst_219 = arith.constant dense<0.000000e+00> : vector<8x8xf32>
    %291 = tpu.matmul %289, %290, %cst_219 {dimension_numbers = #tpu.dot_dimension_numbers<[1], [0], [0], [1], [0, 0, 1, 1], [], []>} : vector<8x8xbf16>, vector<8x8xbf16>, vector<8x8xf32> -> vector<8x8xf32>
    %292 = arith.truncf %291 : vector<8x8xf32> to vector<8x8xbf16>
    %c1_220 = arith.constant 1 : index
    %c0_221 = arith.constant 0 : index
    %c0_222 = arith.constant 0 : index
    %c0_223 = arith.constant 0 : index
    %293 = vector.load %arg8[%c1_220, %c0_221, %c0_222, %c0_223] : memref<2x4x8x32xbf16, #tpu.memory_space<vmem>>, vector<1x1x8x32xbf16>
    %294 = vector.shape_cast %293 : vector<1x1x8x32xbf16> to vector<8x32xbf16>
    %cst_224 = arith.constant dense<0.000000e+00> : vector<8x32xf32>
    %295 = tpu.matmul %292, %294, %cst_224 {dimension_numbers = #tpu.dot_dimension_numbers<[1], [0], [0], [1], [0, 0, 1, 1], [], []>} : vector<8x8xbf16>, vector<8x32xbf16>, vector<8x32xf32> -> vector<8x32xf32>
    %296 = arith.addf %253, %295 : vector<8x32xf32>
    %c1_225 = arith.constant 1 : index
    %c1_226 = arith.constant 1 : index
    %c0_227 = arith.constant 0 : index
    %c0_228 = arith.constant 0 : index
    %297 = vector.load %arg2[%c1_225, %c1_226, %c0_227, %c0_228] : memref<2x4x32x8xbf16, #tpu.memory_space<vmem>>, vector<1x1x32x8xbf16>
    %298 = vector.shape_cast %297 : vector<1x1x32x8xbf16> to vector<32x8xbf16>
    %cst_229 = arith.constant dense<0.000000e+00> : vector<8x8xf32>
    %299 = tpu.matmul %252, %298, %cst_229 {dimension_numbers = #tpu.dot_dimension_numbers<[1], [0], [0], [1], [0, 0, 1, 1], [], []>} : vector<8x32xbf16>, vector<32x8xbf16>, vector<8x8xf32> -> vector<8x8xf32>
    %c1_230 = arith.constant 1 : index
    %c1_231 = arith.constant 1 : index
    %c0_232 = arith.constant 0 : index
    %c0_233 = arith.constant 0 : index
    %300 = vector.load %arg5[%c1_230, %c1_231, %c0_232, %c0_233] : memref<2x4x1x8xf32, #tpu.memory_space<vmem>>, vector<1x1x1x8xf32>
    %301 = vector.shape_cast %300 : vector<1x1x1x8xf32> to vector<1x8xf32>
    %302 = vector.broadcast %301 : vector<1x8xf32> to vector<8x8xf32>
    %303 = arith.addf %299, %302 : vector<8x8xf32>
    %c1_234 = arith.constant 1 : index
    %c1_235 = arith.constant 1 : index
    %c0_236 = arith.constant 0 : index
    %c0_237 = arith.constant 0 : index
    %304 = vector.load %arg3[%c1_234, %c1_235, %c0_236, %c0_237] : memref<2x4x32x8xbf16, #tpu.memory_space<vmem>>, vector<1x1x32x8xbf16>
    %305 = vector.shape_cast %304 : vector<1x1x32x8xbf16> to vector<32x8xbf16>
    %cst_238 = arith.constant dense<0.000000e+00> : vector<8x8xf32>
    %306 = tpu.matmul %252, %305, %cst_238 {dimension_numbers = #tpu.dot_dimension_numbers<[1], [0], [0], [1], [0, 0, 1, 1], [], []>} : vector<8x32xbf16>, vector<32x8xbf16>, vector<8x8xf32> -> vector<8x8xf32>
    %c1_239 = arith.constant 1 : index
    %c1_240 = arith.constant 1 : index
    %c0_241 = arith.constant 0 : index
    %c0_242 = arith.constant 0 : index
    %307 = vector.load %arg6[%c1_239, %c1_240, %c0_241, %c0_242] : memref<2x4x1x8xf32, #tpu.memory_space<vmem>>, vector<1x1x1x8xf32>
    %308 = vector.shape_cast %307 : vector<1x1x1x8xf32> to vector<1x8xf32>
    %309 = vector.broadcast %308 : vector<1x8xf32> to vector<8x8xf32>
    %310 = arith.addf %306, %309 : vector<8x8xf32>
    %c1_243 = arith.constant 1 : index
    %c1_244 = arith.constant 1 : index
    %c0_245 = arith.constant 0 : index
    %c0_246 = arith.constant 0 : index
    %311 = vector.load %arg4[%c1_243, %c1_244, %c0_245, %c0_246] : memref<2x4x32x8xbf16, #tpu.memory_space<vmem>>, vector<1x1x32x8xbf16>
    %312 = vector.shape_cast %311 : vector<1x1x32x8xbf16> to vector<32x8xbf16>
    %cst_247 = arith.constant dense<0.000000e+00> : vector<8x8xf32>
    %313 = tpu.matmul %252, %312, %cst_247 {dimension_numbers = #tpu.dot_dimension_numbers<[1], [0], [0], [1], [0, 0, 1, 1], [], []>} : vector<8x32xbf16>, vector<32x8xbf16>, vector<8x8xf32> -> vector<8x8xf32>
    %c1_248 = arith.constant 1 : index
    %c1_249 = arith.constant 1 : index
    %c0_250 = arith.constant 0 : index
    %c0_251 = arith.constant 0 : index
    %314 = vector.load %arg7[%c1_248, %c1_249, %c0_250, %c0_251] : memref<2x4x1x8xf32, #tpu.memory_space<vmem>>, vector<1x1x1x8xf32>
    %315 = vector.shape_cast %314 : vector<1x1x1x8xf32> to vector<1x8xf32>
    %316 = vector.broadcast %315 : vector<1x8xf32> to vector<8x8xf32>
    %317 = arith.addf %313, %316 : vector<8x8xf32>
    %cst_252 = arith.constant 0.353553385 : f32
    %318 = vector.broadcast %cst_252 : f32 to vector<8x8xf32>
    %319 = arith.mulf %303, %318 : vector<8x8xf32>
    %320 = arith.truncf %319 : vector<8x8xf32> to vector<8x8xbf16>
    %321 = arith.truncf %310 : vector<8x8xf32> to vector<8x8xbf16>
    %cst_253 = arith.constant dense<0.000000e+00> : vector<8x8xf32>
    %322 = tpu.matmul %320, %321, %cst_253 {dimension_numbers = #tpu.dot_dimension_numbers<[1], [1], [0], [0], [0, 0, 1, 0], [], []>} : vector<8x8xbf16>, vector<8x8xbf16>, vector<8x8xf32> -> vector<8x8xf32>
    %cst_254 = arith.constant dense<0xFF800000> : vector<8xf32>
    %323 = vector.multi_reduction <maximumf>, %322, %cst_254 [1] : vector<8x8xf32> to vector<8xf32>
    %324 = vector.shape_cast %323 : vector<8xf32> to vector<8x1xf32>
    %325 = vector.broadcast %324 : vector<8x1xf32> to vector<8x8xf32>
    %326 = arith.subf %322, %325 : vector<8x8xf32>
    %327 = math.exp %326 : vector<8x8xf32>
    %cst_255 = arith.constant dense<0.000000e+00> : vector<8xf32>
    %328 = vector.multi_reduction <add>, %327, %cst_255 [1] : vector<8x8xf32> to vector<8xf32>
    %329 = vector.shape_cast %328 : vector<8xf32> to vector<8x1xf32>
    %330 = vector.broadcast %329 : vector<8x1xf32> to vector<8x8xf32>
    %331 = arith.divf %327, %330 : vector<8x8xf32>
    %332 = arith.truncf %331 : vector<8x8xf32> to vector<8x8xbf16>
    %333 = arith.truncf %317 : vector<8x8xf32> to vector<8x8xbf16>
    %cst_256 = arith.constant dense<0.000000e+00> : vector<8x8xf32>
    %334 = tpu.matmul %332, %333, %cst_256 {dimension_numbers = #tpu.dot_dimension_numbers<[1], [0], [0], [1], [0, 0, 1, 1], [], []>} : vector<8x8xbf16>, vector<8x8xbf16>, vector<8x8xf32> -> vector<8x8xf32>
    %335 = arith.truncf %334 : vector<8x8xf32> to vector<8x8xbf16>
    %c1_257 = arith.constant 1 : index
    %c1_258 = arith.constant 1 : index
    %c0_259 = arith.constant 0 : index
    %c0_260 = arith.constant 0 : index
    %336 = vector.load %arg8[%c1_257, %c1_258, %c0_259, %c0_260] : memref<2x4x8x32xbf16, #tpu.memory_space<vmem>>, vector<1x1x8x32xbf16>
    %337 = vector.shape_cast %336 : vector<1x1x8x32xbf16> to vector<8x32xbf16>
    %cst_261 = arith.constant dense<0.000000e+00> : vector<8x32xf32>
    %338 = tpu.matmul %335, %337, %cst_261 {dimension_numbers = #tpu.dot_dimension_numbers<[1], [0], [0], [1], [0, 0, 1, 1], [], []>} : vector<8x8xbf16>, vector<8x32xbf16>, vector<8x32xf32> -> vector<8x32xf32>
    %339 = arith.addf %296, %338 : vector<8x32xf32>
    %c1_262 = arith.constant 1 : index
    %c2_263 = arith.constant 2 : index
    %c0_264 = arith.constant 0 : index
    %c0_265 = arith.constant 0 : index
    %340 = vector.load %arg2[%c1_262, %c2_263, %c0_264, %c0_265] : memref<2x4x32x8xbf16, #tpu.memory_space<vmem>>, vector<1x1x32x8xbf16>
    %341 = vector.shape_cast %340 : vector<1x1x32x8xbf16> to vector<32x8xbf16>
    %cst_266 = arith.constant dense<0.000000e+00> : vector<8x8xf32>
    %342 = tpu.matmul %252, %341, %cst_266 {dimension_numbers = #tpu.dot_dimension_numbers<[1], [0], [0], [1], [0, 0, 1, 1], [], []>} : vector<8x32xbf16>, vector<32x8xbf16>, vector<8x8xf32> -> vector<8x8xf32>
    %c1_267 = arith.constant 1 : index
    %c2_268 = arith.constant 2 : index
    %c0_269 = arith.constant 0 : index
    %c0_270 = arith.constant 0 : index
    %343 = vector.load %arg5[%c1_267, %c2_268, %c0_269, %c0_270] : memref<2x4x1x8xf32, #tpu.memory_space<vmem>>, vector<1x1x1x8xf32>
    %344 = vector.shape_cast %343 : vector<1x1x1x8xf32> to vector<1x8xf32>
    %345 = vector.broadcast %344 : vector<1x8xf32> to vector<8x8xf32>
    %346 = arith.addf %342, %345 : vector<8x8xf32>
    %c1_271 = arith.constant 1 : index
    %c2_272 = arith.constant 2 : index
    %c0_273 = arith.constant 0 : index
    %c0_274 = arith.constant 0 : index
    %347 = vector.load %arg3[%c1_271, %c2_272, %c0_273, %c0_274] : memref<2x4x32x8xbf16, #tpu.memory_space<vmem>>, vector<1x1x32x8xbf16>
    %348 = vector.shape_cast %347 : vector<1x1x32x8xbf16> to vector<32x8xbf16>
    %cst_275 = arith.constant dense<0.000000e+00> : vector<8x8xf32>
    %349 = tpu.matmul %252, %348, %cst_275 {dimension_numbers = #tpu.dot_dimension_numbers<[1], [0], [0], [1], [0, 0, 1, 1], [], []>} : vector<8x32xbf16>, vector<32x8xbf16>, vector<8x8xf32> -> vector<8x8xf32>
    %c1_276 = arith.constant 1 : index
    %c2_277 = arith.constant 2 : index
    %c0_278 = arith.constant 0 : index
    %c0_279 = arith.constant 0 : index
    %350 = vector.load %arg6[%c1_276, %c2_277, %c0_278, %c0_279] : memref<2x4x1x8xf32, #tpu.memory_space<vmem>>, vector<1x1x1x8xf32>
    %351 = vector.shape_cast %350 : vector<1x1x1x8xf32> to vector<1x8xf32>
    %352 = vector.broadcast %351 : vector<1x8xf32> to vector<8x8xf32>
    %353 = arith.addf %349, %352 : vector<8x8xf32>
    %c1_280 = arith.constant 1 : index
    %c2_281 = arith.constant 2 : index
    %c0_282 = arith.constant 0 : index
    %c0_283 = arith.constant 0 : index
    %354 = vector.load %arg4[%c1_280, %c2_281, %c0_282, %c0_283] : memref<2x4x32x8xbf16, #tpu.memory_space<vmem>>, vector<1x1x32x8xbf16>
    %355 = vector.shape_cast %354 : vector<1x1x32x8xbf16> to vector<32x8xbf16>
    %cst_284 = arith.constant dense<0.000000e+00> : vector<8x8xf32>
    %356 = tpu.matmul %252, %355, %cst_284 {dimension_numbers = #tpu.dot_dimension_numbers<[1], [0], [0], [1], [0, 0, 1, 1], [], []>} : vector<8x32xbf16>, vector<32x8xbf16>, vector<8x8xf32> -> vector<8x8xf32>
    %c1_285 = arith.constant 1 : index
    %c2_286 = arith.constant 2 : index
    %c0_287 = arith.constant 0 : index
    %c0_288 = arith.constant 0 : index
    %357 = vector.load %arg7[%c1_285, %c2_286, %c0_287, %c0_288] : memref<2x4x1x8xf32, #tpu.memory_space<vmem>>, vector<1x1x1x8xf32>
    %358 = vector.shape_cast %357 : vector<1x1x1x8xf32> to vector<1x8xf32>
    %359 = vector.broadcast %358 : vector<1x8xf32> to vector<8x8xf32>
    %360 = arith.addf %356, %359 : vector<8x8xf32>
    %cst_289 = arith.constant 0.353553385 : f32
    %361 = vector.broadcast %cst_289 : f32 to vector<8x8xf32>
    %362 = arith.mulf %346, %361 : vector<8x8xf32>
    %363 = arith.truncf %362 : vector<8x8xf32> to vector<8x8xbf16>
    %364 = arith.truncf %353 : vector<8x8xf32> to vector<8x8xbf16>
    %cst_290 = arith.constant dense<0.000000e+00> : vector<8x8xf32>
    %365 = tpu.matmul %363, %364, %cst_290 {dimension_numbers = #tpu.dot_dimension_numbers<[1], [1], [0], [0], [0, 0, 1, 0], [], []>} : vector<8x8xbf16>, vector<8x8xbf16>, vector<8x8xf32> -> vector<8x8xf32>
    %cst_291 = arith.constant dense<0xFF800000> : vector<8xf32>
    %366 = vector.multi_reduction <maximumf>, %365, %cst_291 [1] : vector<8x8xf32> to vector<8xf32>
    %367 = vector.shape_cast %366 : vector<8xf32> to vector<8x1xf32>
    %368 = vector.broadcast %367 : vector<8x1xf32> to vector<8x8xf32>
    %369 = arith.subf %365, %368 : vector<8x8xf32>
    %370 = math.exp %369 : vector<8x8xf32>
    %cst_292 = arith.constant dense<0.000000e+00> : vector<8xf32>
    %371 = vector.multi_reduction <add>, %370, %cst_292 [1] : vector<8x8xf32> to vector<8xf32>
    %372 = vector.shape_cast %371 : vector<8xf32> to vector<8x1xf32>
    %373 = vector.broadcast %372 : vector<8x1xf32> to vector<8x8xf32>
    %374 = arith.divf %370, %373 : vector<8x8xf32>
    %375 = arith.truncf %374 : vector<8x8xf32> to vector<8x8xbf16>
    %376 = arith.truncf %360 : vector<8x8xf32> to vector<8x8xbf16>
    %cst_293 = arith.constant dense<0.000000e+00> : vector<8x8xf32>
    %377 = tpu.matmul %375, %376, %cst_293 {dimension_numbers = #tpu.dot_dimension_numbers<[1], [0], [0], [1], [0, 0, 1, 1], [], []>} : vector<8x8xbf16>, vector<8x8xbf16>, vector<8x8xf32> -> vector<8x8xf32>
    %378 = arith.truncf %377 : vector<8x8xf32> to vector<8x8xbf16>
    %c1_294 = arith.constant 1 : index
    %c2_295 = arith.constant 2 : index
    %c0_296 = arith.constant 0 : index
    %c0_297 = arith.constant 0 : index
    %379 = vector.load %arg8[%c1_294, %c2_295, %c0_296, %c0_297] : memref<2x4x8x32xbf16, #tpu.memory_space<vmem>>, vector<1x1x8x32xbf16>
    %380 = vector.shape_cast %379 : vector<1x1x8x32xbf16> to vector<8x32xbf16>
    %cst_298 = arith.constant dense<0.000000e+00> : vector<8x32xf32>
    %381 = tpu.matmul %378, %380, %cst_298 {dimension_numbers = #tpu.dot_dimension_numbers<[1], [0], [0], [1], [0, 0, 1, 1], [], []>} : vector<8x8xbf16>, vector<8x32xbf16>, vector<8x32xf32> -> vector<8x32xf32>
    %382 = arith.addf %339, %381 : vector<8x32xf32>
    %c1_299 = arith.constant 1 : index
    %c3_300 = arith.constant 3 : index
    %c0_301 = arith.constant 0 : index
    %c0_302 = arith.constant 0 : index
    %383 = vector.load %arg2[%c1_299, %c3_300, %c0_301, %c0_302] : memref<2x4x32x8xbf16, #tpu.memory_space<vmem>>, vector<1x1x32x8xbf16>
    %384 = vector.shape_cast %383 : vector<1x1x32x8xbf16> to vector<32x8xbf16>
    %cst_303 = arith.constant dense<0.000000e+00> : vector<8x8xf32>
    %385 = tpu.matmul %252, %384, %cst_303 {dimension_numbers = #tpu.dot_dimension_numbers<[1], [0], [0], [1], [0, 0, 1, 1], [], []>} : vector<8x32xbf16>, vector<32x8xbf16>, vector<8x8xf32> -> vector<8x8xf32>
    %c1_304 = arith.constant 1 : index
    %c3_305 = arith.constant 3 : index
    %c0_306 = arith.constant 0 : index
    %c0_307 = arith.constant 0 : index
    %386 = vector.load %arg5[%c1_304, %c3_305, %c0_306, %c0_307] : memref<2x4x1x8xf32, #tpu.memory_space<vmem>>, vector<1x1x1x8xf32>
    %387 = vector.shape_cast %386 : vector<1x1x1x8xf32> to vector<1x8xf32>
    %388 = vector.broadcast %387 : vector<1x8xf32> to vector<8x8xf32>
    %389 = arith.addf %385, %388 : vector<8x8xf32>
    %c1_308 = arith.constant 1 : index
    %c3_309 = arith.constant 3 : index
    %c0_310 = arith.constant 0 : index
    %c0_311 = arith.constant 0 : index
    %390 = vector.load %arg3[%c1_308, %c3_309, %c0_310, %c0_311] : memref<2x4x32x8xbf16, #tpu.memory_space<vmem>>, vector<1x1x32x8xbf16>
    %391 = vector.shape_cast %390 : vector<1x1x32x8xbf16> to vector<32x8xbf16>
    %cst_312 = arith.constant dense<0.000000e+00> : vector<8x8xf32>
    %392 = tpu.matmul %252, %391, %cst_312 {dimension_numbers = #tpu.dot_dimension_numbers<[1], [0], [0], [1], [0, 0, 1, 1], [], []>} : vector<8x32xbf16>, vector<32x8xbf16>, vector<8x8xf32> -> vector<8x8xf32>
    %c1_313 = arith.constant 1 : index
    %c3_314 = arith.constant 3 : index
    %c0_315 = arith.constant 0 : index
    %c0_316 = arith.constant 0 : index
    %393 = vector.load %arg6[%c1_313, %c3_314, %c0_315, %c0_316] : memref<2x4x1x8xf32, #tpu.memory_space<vmem>>, vector<1x1x1x8xf32>
    %394 = vector.shape_cast %393 : vector<1x1x1x8xf32> to vector<1x8xf32>
    %395 = vector.broadcast %394 : vector<1x8xf32> to vector<8x8xf32>
    %396 = arith.addf %392, %395 : vector<8x8xf32>
    %c1_317 = arith.constant 1 : index
    %c3_318 = arith.constant 3 : index
    %c0_319 = arith.constant 0 : index
    %c0_320 = arith.constant 0 : index
    %397 = vector.load %arg4[%c1_317, %c3_318, %c0_319, %c0_320] : memref<2x4x32x8xbf16, #tpu.memory_space<vmem>>, vector<1x1x32x8xbf16>
    %398 = vector.shape_cast %397 : vector<1x1x32x8xbf16> to vector<32x8xbf16>
    %cst_321 = arith.constant dense<0.000000e+00> : vector<8x8xf32>
    %399 = tpu.matmul %252, %398, %cst_321 {dimension_numbers = #tpu.dot_dimension_numbers<[1], [0], [0], [1], [0, 0, 1, 1], [], []>} : vector<8x32xbf16>, vector<32x8xbf16>, vector<8x8xf32> -> vector<8x8xf32>
    %c1_322 = arith.constant 1 : index
    %c3_323 = arith.constant 3 : index
    %c0_324 = arith.constant 0 : index
    %c0_325 = arith.constant 0 : index
    %400 = vector.load %arg7[%c1_322, %c3_323, %c0_324, %c0_325] : memref<2x4x1x8xf32, #tpu.memory_space<vmem>>, vector<1x1x1x8xf32>
    %401 = vector.shape_cast %400 : vector<1x1x1x8xf32> to vector<1x8xf32>
    %402 = vector.broadcast %401 : vector<1x8xf32> to vector<8x8xf32>
    %403 = arith.addf %399, %402 : vector<8x8xf32>
    %cst_326 = arith.constant 0.353553385 : f32
    %404 = vector.broadcast %cst_326 : f32 to vector<8x8xf32>
    %405 = arith.mulf %389, %404 : vector<8x8xf32>
    %406 = arith.truncf %405 : vector<8x8xf32> to vector<8x8xbf16>
    %407 = arith.truncf %396 : vector<8x8xf32> to vector<8x8xbf16>
    %cst_327 = arith.constant dense<0.000000e+00> : vector<8x8xf32>
    %408 = tpu.matmul %406, %407, %cst_327 {dimension_numbers = #tpu.dot_dimension_numbers<[1], [1], [0], [0], [0, 0, 1, 0], [], []>} : vector<8x8xbf16>, vector<8x8xbf16>, vector<8x8xf32> -> vector<8x8xf32>
    %cst_328 = arith.constant dense<0xFF800000> : vector<8xf32>
    %409 = vector.multi_reduction <maximumf>, %408, %cst_328 [1] : vector<8x8xf32> to vector<8xf32>
    %410 = vector.shape_cast %409 : vector<8xf32> to vector<8x1xf32>
    %411 = vector.broadcast %410 : vector<8x1xf32> to vector<8x8xf32>
    %412 = arith.subf %408, %411 : vector<8x8xf32>
    %413 = math.exp %412 : vector<8x8xf32>
    %cst_329 = arith.constant dense<0.000000e+00> : vector<8xf32>
    %414 = vector.multi_reduction <add>, %413, %cst_329 [1] : vector<8x8xf32> to vector<8xf32>
    %415 = vector.shape_cast %414 : vector<8xf32> to vector<8x1xf32>
    %416 = vector.broadcast %415 : vector<8x1xf32> to vector<8x8xf32>
    %417 = arith.divf %413, %416 : vector<8x8xf32>
    %418 = arith.truncf %417 : vector<8x8xf32> to vector<8x8xbf16>
    %419 = arith.truncf %403 : vector<8x8xf32> to vector<8x8xbf16>
    %cst_330 = arith.constant dense<0.000000e+00> : vector<8x8xf32>
    %420 = tpu.matmul %418, %419, %cst_330 {dimension_numbers = #tpu.dot_dimension_numbers<[1], [0], [0], [1], [0, 0, 1, 1], [], []>} : vector<8x8xbf16>, vector<8x8xbf16>, vector<8x8xf32> -> vector<8x8xf32>
    %421 = arith.truncf %420 : vector<8x8xf32> to vector<8x8xbf16>
    %c1_331 = arith.constant 1 : index
    %c3_332 = arith.constant 3 : index
    %c0_333 = arith.constant 0 : index
    %c0_334 = arith.constant 0 : index
    %422 = vector.load %arg8[%c1_331, %c3_332, %c0_333, %c0_334] : memref<2x4x8x32xbf16, #tpu.memory_space<vmem>>, vector<1x1x8x32xbf16>
    %423 = vector.shape_cast %422 : vector<1x1x8x32xbf16> to vector<8x32xbf16>
    %cst_335 = arith.constant dense<0.000000e+00> : vector<8x32xf32>
    %424 = tpu.matmul %421, %423, %cst_335 {dimension_numbers = #tpu.dot_dimension_numbers<[1], [0], [0], [1], [0, 0, 1, 1], [], []>} : vector<8x8xbf16>, vector<8x32xbf16>, vector<8x32xf32> -> vector<8x32xf32>
    %425 = arith.addf %382, %424 : vector<8x32xf32>
    %c1_336 = arith.constant 1 : index
    %c0_337 = arith.constant 0 : index
    %c0_338 = arith.constant 0 : index
    %426 = vector.load %arg9[%c1_336, %c0_337, %c0_338] : memref<2x1x32xf32, #tpu.memory_space<vmem>>, vector<1x1x32xf32>
    %427 = vector.shape_cast %426 : vector<1x1x32xf32> to vector<1x32xf32>
    %428 = vector.broadcast %427 : vector<1x32xf32> to vector<8x32xf32>
    %429 = arith.addf %425, %428 : vector<8x32xf32>
    %430 = arith.addf %251, %429 : vector<8x32xf32>
    %c1_339 = arith.constant 1 : index
    %c0_340 = arith.constant 0 : index
    %c0_341 = arith.constant 0 : index
    %431 = vector.load %arg14[%c1_339, %c0_340, %c0_341] : memref<2x1x32xf32, #tpu.memory_space<vmem>>, vector<1x1x32xf32>
    %432 = vector.shape_cast %431 : vector<1x1x32xf32> to vector<1x32xf32>
    %c1_342 = arith.constant 1 : index
    %c0_343 = arith.constant 0 : index
    %c0_344 = arith.constant 0 : index
    %433 = vector.load %arg15[%c1_342, %c0_343, %c0_344] : memref<2x1x32xf32, #tpu.memory_space<vmem>>, vector<1x1x32xf32>
    %434 = vector.shape_cast %433 : vector<1x1x32xf32> to vector<1x32xf32>
    %cst_345 = arith.constant dense<0.000000e+00> : vector<8xf32>
    %435 = vector.multi_reduction <add>, %430, %cst_345 [1] : vector<8x32xf32> to vector<8xf32>
    %436 = vector.shape_cast %435 : vector<8xf32> to vector<8x1xf32>
    %cst_346 = arith.constant 3.200000e+01 : f32
    %437 = vector.broadcast %cst_346 : f32 to vector<8x1xf32>
    %438 = arith.divf %436, %437 : vector<8x1xf32>
    %439 = vector.broadcast %438 : vector<8x1xf32> to vector<8x32xf32>
    %440 = arith.subf %430, %439 : vector<8x32xf32>
    %441 = arith.mulf %440, %440 : vector<8x32xf32>
    %cst_347 = arith.constant dense<0.000000e+00> : vector<8xf32>
    %442 = vector.multi_reduction <add>, %441, %cst_347 [1] : vector<8x32xf32> to vector<8xf32>
    %443 = vector.shape_cast %442 : vector<8xf32> to vector<8x1xf32>
    %cst_348 = arith.constant 3.200000e+01 : f32
    %444 = vector.broadcast %cst_348 : f32 to vector<8x1xf32>
    %445 = arith.divf %443, %444 : vector<8x1xf32>
    %446 = vector.broadcast %438 : vector<8x1xf32> to vector<8x32xf32>
    %447 = arith.subf %430, %446 : vector<8x32xf32>
    %cst_349 = arith.constant 9.99999974E-6 : f32
    %448 = vector.broadcast %cst_349 : f32 to vector<8x1xf32>
    %449 = arith.addf %445, %448 : vector<8x1xf32>
    %450 = math.rsqrt %449 : vector<8x1xf32>
    %451 = vector.broadcast %450 : vector<8x1xf32> to vector<8x32xf32>
    %452 = arith.mulf %447, %451 : vector<8x32xf32>
    %453 = vector.broadcast %432 : vector<1x32xf32> to vector<8x32xf32>
    %454 = arith.mulf %452, %453 : vector<8x32xf32>
    %455 = vector.broadcast %434 : vector<1x32xf32> to vector<8x32xf32>
    %456 = arith.addf %454, %455 : vector<8x32xf32>
    %457 = arith.truncf %456 : vector<8x32xf32> to vector<8x32xbf16>
    %c1_350 = arith.constant 1 : index
    %c0_351 = arith.constant 0 : index
    %c0_352 = arith.constant 0 : index
    %458 = vector.load %arg10[%c1_350, %c0_351, %c0_352] : memref<2x32x64xbf16, #tpu.memory_space<vmem>>, vector<1x32x64xbf16>
    %459 = vector.shape_cast %458 : vector<1x32x64xbf16> to vector<32x64xbf16>
    %cst_353 = arith.constant dense<0.000000e+00> : vector<8x64xf32>
    %460 = tpu.matmul %457, %459, %cst_353 {dimension_numbers = #tpu.dot_dimension_numbers<[1], [0], [0], [1], [0, 0, 1, 1], [], []>} : vector<8x32xbf16>, vector<32x64xbf16>, vector<8x64xf32> -> vector<8x64xf32>
    %c1_354 = arith.constant 1 : index
    %c0_355 = arith.constant 0 : index
    %c0_356 = arith.constant 0 : index
    %461 = vector.load %arg11[%c1_354, %c0_355, %c0_356] : memref<2x1x64xf32, #tpu.memory_space<vmem>>, vector<1x1x64xf32>
    %462 = vector.shape_cast %461 : vector<1x1x64xf32> to vector<1x64xf32>
    %463 = vector.broadcast %462 : vector<1x64xf32> to vector<8x64xf32>
    %464 = arith.addf %460, %463 : vector<8x64xf32>
    %cst_357 = arith.constant 0.000000e+00 : f32
    %465 = vector.broadcast %cst_357 : f32 to vector<8x64xf32>
    %466 = arith.maximumf %464, %465 : vector<8x64xf32>
    %467 = arith.truncf %466 : vector<8x64xf32> to vector<8x64xbf16>
    %c1_358 = arith.constant 1 : index
    %c0_359 = arith.constant 0 : index
    %c0_360 = arith.constant 0 : index
    %468 = vector.load %arg12[%c1_358, %c0_359, %c0_360] : memref<2x64x32xbf16, #tpu.memory_space<vmem>>, vector<1x64x32xbf16>
    %469 = vector.shape_cast %468 : vector<1x64x32xbf16> to vector<64x32xbf16>
    %cst_361 = arith.constant dense<0.000000e+00> : vector<8x32xf32>
    %470 = tpu.matmul %467, %469, %cst_361 {dimension_numbers = #tpu.dot_dimension_numbers<[1], [0], [0], [1], [0, 0, 1, 1], [], []>} : vector<8x64xbf16>, vector<64x32xbf16>, vector<8x32xf32> -> vector<8x32xf32>
    %c1_362 = arith.constant 1 : index
    %c0_363 = arith.constant 0 : index
    %c0_364 = arith.constant 0 : index
    %471 = vector.load %arg13[%c1_362, %c0_363, %c0_364] : memref<2x1x32xf32, #tpu.memory_space<vmem>>, vector<1x1x32xf32>
    %472 = vector.shape_cast %471 : vector<1x1x32xf32> to vector<1x32xf32>
    %473 = vector.broadcast %472 : vector<1x32xf32> to vector<8x32xf32>
    %474 = arith.addf %470, %473 : vector<8x32xf32>
    %475 = arith.addf %456, %474 : vector<8x32xf32>
    %c1_365 = arith.constant 1 : index
    %c0_366 = arith.constant 0 : index
    %c0_367 = arith.constant 0 : index
    %476 = vector.load %arg16[%c1_365, %c0_366, %c0_367] : memref<2x1x32xf32, #tpu.memory_space<vmem>>, vector<1x1x32xf32>
    %477 = vector.shape_cast %476 : vector<1x1x32xf32> to vector<1x32xf32>
    %c1_368 = arith.constant 1 : index
    %c0_369 = arith.constant 0 : index
    %c0_370 = arith.constant 0 : index
    %478 = vector.load %arg17[%c1_368, %c0_369, %c0_370] : memref<2x1x32xf32, #tpu.memory_space<vmem>>, vector<1x1x32xf32>
    %479 = vector.shape_cast %478 : vector<1x1x32xf32> to vector<1x32xf32>
    %cst_371 = arith.constant dense<0.000000e+00> : vector<8xf32>
    %480 = vector.multi_reduction <add>, %475, %cst_371 [1] : vector<8x32xf32> to vector<8xf32>
    %481 = vector.shape_cast %480 : vector<8xf32> to vector<8x1xf32>
    %cst_372 = arith.constant 3.200000e+01 : f32
    %482 = vector.broadcast %cst_372 : f32 to vector<8x1xf32>
    %483 = arith.divf %481, %482 : vector<8x1xf32>
    %484 = vector.broadcast %483 : vector<8x1xf32> to vector<8x32xf32>
    %485 = arith.subf %475, %484 : vector<8x32xf32>
    %486 = arith.mulf %485, %485 : vector<8x32xf32>
    %cst_373 = arith.constant dense<0.000000e+00> : vector<8xf32>
    %487 = vector.multi_reduction <add>, %486, %cst_373 [1] : vector<8x32xf32> to vector<8xf32>
    %488 = vector.shape_cast %487 : vector<8xf32> to vector<8x1xf32>
    %cst_374 = arith.constant 3.200000e+01 : f32
    %489 = vector.broadcast %cst_374 : f32 to vector<8x1xf32>
    %490 = arith.divf %488, %489 : vector<8x1xf32>
    %491 = vector.broadcast %483 : vector<8x1xf32> to vector<8x32xf32>
    %492 = arith.subf %475, %491 : vector<8x32xf32>
    %cst_375 = arith.constant 9.99999974E-6 : f32
    %493 = vector.broadcast %cst_375 : f32 to vector<8x1xf32>
    %494 = arith.addf %490, %493 : vector<8x1xf32>
    %495 = math.rsqrt %494 : vector<8x1xf32>
    %496 = vector.broadcast %495 : vector<8x1xf32> to vector<8x32xf32>
    %497 = arith.mulf %492, %496 : vector<8x32xf32>
    %498 = vector.broadcast %477 : vector<1x32xf32> to vector<8x32xf32>
    %499 = arith.mulf %497, %498 : vector<8x32xf32>
    %500 = vector.broadcast %479 : vector<1x32xf32> to vector<8x32xf32>
    %501 = arith.addf %499, %500 : vector<8x32xf32>
    %502 = tpu.iota {dimensions = array<i32: 0>} : vector<8x32xi32>
    %c0_i32 = arith.constant 0 : i32
    %503 = vector.broadcast %c0_i32 : i32 to vector<8x32xi32>
    %504 = arith.cmpi ne, %502, %503 : vector<8x32xi32>
    %c7_i32 = arith.constant 7 : i32
    %505 = vector.broadcast %c7_i32 : i32 to vector<8x32xi32>
    %506 = arith.cmpi ne, %502, %505 : vector<8x32xi32>
    %c1_i32 = arith.constant 1 : i32
    %507 = tpu.dynamic_rotate %501 by %c1_i32 dim 0 : vector<8x32xf32>, i32 -> vector<8x32xf32>
    %cst_376 = arith.constant 0.000000e+00 : f32
    %508 = vector.broadcast %cst_376 : f32 to vector<8x32xf32>
    %509 = arith.select %504, %507, %508 : vector<8x32xi1>, vector<8x32xf32>
    %c7_i32_377 = arith.constant 7 : i32
    %510 = tpu.dynamic_rotate %501 by %c7_i32_377 dim 0 : vector<8x32xf32>, i32 -> vector<8x32xf32>
    %cst_378 = arith.constant 0.000000e+00 : f32
    %511 = vector.broadcast %cst_378 : f32 to vector<8x32xf32>
    %512 = arith.select %506, %510, %511 : vector<8x32xi1>, vector<8x32xf32>
    %513 = arith.truncf %509 : vector<8x32xf32> to vector<8x32xbf16>
    %c0_379 = arith.constant 0 : index
    %c0_380 = arith.constant 0 : index
    %c0_381 = arith.constant 0 : index
    %c0_382 = arith.constant 0 : index
    %514 = vector.load %arg18[%c0_379, %c0_380, %c0_381, %c0_382] : memref<2x3x32x32xbf16, #tpu.memory_space<vmem>>, vector<1x1x32x32xbf16>
    %515 = vector.shape_cast %514 : vector<1x1x32x32xbf16> to vector<32x32xbf16>
    %cst_383 = arith.constant dense<0.000000e+00> : vector<8x32xf32>
    %516 = tpu.matmul %513, %515, %cst_383 {dimension_numbers = #tpu.dot_dimension_numbers<[1], [0], [0], [1], [0, 0, 1, 1], [], []>} : vector<8x32xbf16>, vector<32x32xbf16>, vector<8x32xf32> -> vector<8x32xf32>
    %517 = arith.truncf %501 : vector<8x32xf32> to vector<8x32xbf16>
    %c0_384 = arith.constant 0 : index
    %c1_385 = arith.constant 1 : index
    %c0_386 = arith.constant 0 : index
    %c0_387 = arith.constant 0 : index
    %518 = vector.load %arg18[%c0_384, %c1_385, %c0_386, %c0_387] : memref<2x3x32x32xbf16, #tpu.memory_space<vmem>>, vector<1x1x32x32xbf16>
    %519 = vector.shape_cast %518 : vector<1x1x32x32xbf16> to vector<32x32xbf16>
    %cst_388 = arith.constant dense<0.000000e+00> : vector<8x32xf32>
    %520 = tpu.matmul %517, %519, %cst_388 {dimension_numbers = #tpu.dot_dimension_numbers<[1], [0], [0], [1], [0, 0, 1, 1], [], []>} : vector<8x32xbf16>, vector<32x32xbf16>, vector<8x32xf32> -> vector<8x32xf32>
    %521 = arith.addf %516, %520 : vector<8x32xf32>
    %522 = arith.truncf %512 : vector<8x32xf32> to vector<8x32xbf16>
    %c0_389 = arith.constant 0 : index
    %c2_390 = arith.constant 2 : index
    %c0_391 = arith.constant 0 : index
    %c0_392 = arith.constant 0 : index
    %523 = vector.load %arg18[%c0_389, %c2_390, %c0_391, %c0_392] : memref<2x3x32x32xbf16, #tpu.memory_space<vmem>>, vector<1x1x32x32xbf16>
    %524 = vector.shape_cast %523 : vector<1x1x32x32xbf16> to vector<32x32xbf16>
    %cst_393 = arith.constant dense<0.000000e+00> : vector<8x32xf32>
    %525 = tpu.matmul %522, %524, %cst_393 {dimension_numbers = #tpu.dot_dimension_numbers<[1], [0], [0], [1], [0, 0, 1, 1], [], []>} : vector<8x32xbf16>, vector<32x32xbf16>, vector<8x32xf32> -> vector<8x32xf32>
    %526 = arith.addf %521, %525 : vector<8x32xf32>
    %c0_394 = arith.constant 0 : index
    %c0_395 = arith.constant 0 : index
    %c0_396 = arith.constant 0 : index
    %527 = vector.load %arg19[%c0_394, %c0_395, %c0_396] : memref<2x1x32xf32, #tpu.memory_space<vmem>>, vector<1x1x32xf32>
    %528 = vector.shape_cast %527 : vector<1x1x32xf32> to vector<1x32xf32>
    %529 = vector.broadcast %528 : vector<1x32xf32> to vector<8x32xf32>
    %530 = arith.addf %526, %529 : vector<8x32xf32>
    %c1_i32_397 = arith.constant 1 : i32
    %531 = tpu.dynamic_rotate %530 by %c1_i32_397 dim 0 : vector<8x32xf32>, i32 -> vector<8x32xf32>
    %cst_398 = arith.constant 0.000000e+00 : f32
    %532 = vector.broadcast %cst_398 : f32 to vector<8x32xf32>
    %533 = arith.select %504, %531, %532 : vector<8x32xi1>, vector<8x32xf32>
    %c7_i32_399 = arith.constant 7 : i32
    %534 = tpu.dynamic_rotate %530 by %c7_i32_399 dim 0 : vector<8x32xf32>, i32 -> vector<8x32xf32>
    %cst_400 = arith.constant 0.000000e+00 : f32
    %535 = vector.broadcast %cst_400 : f32 to vector<8x32xf32>
    %536 = arith.select %506, %534, %535 : vector<8x32xi1>, vector<8x32xf32>
    %537 = arith.truncf %533 : vector<8x32xf32> to vector<8x32xbf16>
    %c1_401 = arith.constant 1 : index
    %c0_402 = arith.constant 0 : index
    %c0_403 = arith.constant 0 : index
    %c0_404 = arith.constant 0 : index
    %538 = vector.load %arg18[%c1_401, %c0_402, %c0_403, %c0_404] : memref<2x3x32x32xbf16, #tpu.memory_space<vmem>>, vector<1x1x32x32xbf16>
    %539 = vector.shape_cast %538 : vector<1x1x32x32xbf16> to vector<32x32xbf16>
    %cst_405 = arith.constant dense<0.000000e+00> : vector<8x32xf32>
    %540 = tpu.matmul %537, %539, %cst_405 {dimension_numbers = #tpu.dot_dimension_numbers<[1], [0], [0], [1], [0, 0, 1, 1], [], []>} : vector<8x32xbf16>, vector<32x32xbf16>, vector<8x32xf32> -> vector<8x32xf32>
    %541 = arith.truncf %530 : vector<8x32xf32> to vector<8x32xbf16>
    %c1_406 = arith.constant 1 : index
    %c1_407 = arith.constant 1 : index
    %c0_408 = arith.constant 0 : index
    %c0_409 = arith.constant 0 : index
    %542 = vector.load %arg18[%c1_406, %c1_407, %c0_408, %c0_409] : memref<2x3x32x32xbf16, #tpu.memory_space<vmem>>, vector<1x1x32x32xbf16>
    %543 = vector.shape_cast %542 : vector<1x1x32x32xbf16> to vector<32x32xbf16>
    %cst_410 = arith.constant dense<0.000000e+00> : vector<8x32xf32>
    %544 = tpu.matmul %541, %543, %cst_410 {dimension_numbers = #tpu.dot_dimension_numbers<[1], [0], [0], [1], [0, 0, 1, 1], [], []>} : vector<8x32xbf16>, vector<32x32xbf16>, vector<8x32xf32> -> vector<8x32xf32>
    %545 = arith.addf %540, %544 : vector<8x32xf32>
    %546 = arith.truncf %536 : vector<8x32xf32> to vector<8x32xbf16>
    %c1_411 = arith.constant 1 : index
    %c2_412 = arith.constant 2 : index
    %c0_413 = arith.constant 0 : index
    %c0_414 = arith.constant 0 : index
    %547 = vector.load %arg18[%c1_411, %c2_412, %c0_413, %c0_414] : memref<2x3x32x32xbf16, #tpu.memory_space<vmem>>, vector<1x1x32x32xbf16>
    %548 = vector.shape_cast %547 : vector<1x1x32x32xbf16> to vector<32x32xbf16>
    %cst_415 = arith.constant dense<0.000000e+00> : vector<8x32xf32>
    %549 = tpu.matmul %546, %548, %cst_415 {dimension_numbers = #tpu.dot_dimension_numbers<[1], [0], [0], [1], [0, 0, 1, 1], [], []>} : vector<8x32xbf16>, vector<32x32xbf16>, vector<8x32xf32> -> vector<8x32xf32>
    %550 = arith.addf %545, %549 : vector<8x32xf32>
    %c1_416 = arith.constant 1 : index
    %c0_417 = arith.constant 0 : index
    %c0_418 = arith.constant 0 : index
    %551 = vector.load %arg19[%c1_416, %c0_417, %c0_418] : memref<2x1x32xf32, #tpu.memory_space<vmem>>, vector<1x1x32xf32>
    %552 = vector.shape_cast %551 : vector<1x1x32xf32> to vector<1x32xf32>
    %553 = vector.broadcast %552 : vector<1x32xf32> to vector<8x32xf32>
    %554 = arith.addf %550, %553 : vector<8x32xf32>
    %cst_419 = arith.constant dense<0.000000e+00> : vector<32xf32>
    %555 = vector.multi_reduction <add>, %554, %cst_419 [0] : vector<8x32xf32> to vector<32xf32>
    %556 = vector.shape_cast %555 : vector<32xf32> to vector<1x32xf32>
    %cst_420 = arith.constant 8.000000e+00 : f32
    %557 = vector.broadcast %cst_420 : f32 to vector<1x32xf32>
    %558 = arith.divf %556, %557 : vector<1x32xf32>
    %559 = arith.truncf %558 : vector<1x32xf32> to vector<1x32xbf16>
    %c0_421 = arith.constant 0 : index
    %c0_422 = arith.constant 0 : index
    %560 = vector.load %arg20[%c0_421, %c0_422] : memref<32x128xbf16, #tpu.memory_space<vmem>>, vector<32x128xbf16>
    %cst_423 = arith.constant dense<0.000000e+00> : vector<1x128xf32>
    %561 = tpu.matmul %559, %560, %cst_423 {dimension_numbers = #tpu.dot_dimension_numbers<[1], [0], [0], [1], [0, 0, 1, 1], [], []>} : vector<1x32xbf16>, vector<32x128xbf16>, vector<1x128xf32> -> vector<1x128xf32>
    %c0_424 = arith.constant 0 : index
    %c0_425 = arith.constant 0 : index
    %562 = vector.load %arg21[%c0_424, %c0_425] : memref<1x128xf32, #tpu.memory_space<vmem>>, vector<1x128xf32>
    %563 = arith.addf %561, %562 : vector<1x128xf32>
    %564 = vector.shape_cast %563 : vector<1x128xf32> to vector<1x1x128xf32>
    %c0_426 = arith.constant 0 : index
    %c0_427 = arith.constant 0 : index
    %c0_428 = arith.constant 0 : index
    %565 = vector.load %arg22[%c0_426, %c0_427, %c0_428] : memref<1x1x128xf32, #tpu.memory_space<vmem>>, vector<1x1x128xf32>
    tpu.vector_store %arg22[%c0_426, %c0_427, %c0_428], %564 {strides = array<i32>} : memref<1x1x128xf32, #tpu.memory_space<vmem>>, vector<1x1x128xf32>,
    return
  }
  func.func @transform_0(%arg0: i32) -> (i32, i32, i32) {
    %c0_i32 = arith.constant 0 : i32
    %c0_i32_0 = arith.constant 0 : i32
    %c0_i32_1 = arith.constant 0 : i32
    return %arg0, %c0_i32, %c0_i32_0 : i32, i32, i32
  }
  func.func @transform_1(%arg0: i32) -> (i32, i32, i32, i32) {
    %c0_i32 = arith.constant 0 : i32
    %c0_i32_0 = arith.constant 0 : i32
    %c0_i32_1 = arith.constant 0 : i32
    %c0_i32_2 = arith.constant 0 : i32
    %c0_i32_3 = arith.constant 0 : i32
    return %c0_i32, %c0_i32_0, %c0_i32_1, %c0_i32_2 : i32, i32, i32, i32
  }
  func.func @transform_2(%arg0: i32) -> (i32, i32, i32, i32) {
    %c0_i32 = arith.constant 0 : i32
    %c0_i32_0 = arith.constant 0 : i32
    %c0_i32_1 = arith.constant 0 : i32
    %c0_i32_2 = arith.constant 0 : i32
    %c0_i32_3 = arith.constant 0 : i32
    return %c0_i32, %c0_i32_0, %c0_i32_1, %c0_i32_2 : i32, i32, i32, i32
  }
  func.func @transform_3(%arg0: i32) -> (i32, i32, i32, i32) {
    %c0_i32 = arith.constant 0 : i32
    %c0_i32_0 = arith.constant 0 : i32
    %c0_i32_1 = arith.constant 0 : i32
    %c0_i32_2 = arith.constant 0 : i32
    %c0_i32_3 = arith.constant 0 : i32
    return %c0_i32, %c0_i32_0, %c0_i32_1, %c0_i32_2 : i32, i32, i32, i32
  }
  func.func @transform_4(%arg0: i32) -> (i32, i32, i32, i32) {
    %c0_i32 = arith.constant 0 : i32
    %c0_i32_0 = arith.constant 0 : i32
    %c0_i32_1 = arith.constant 0 : i32
    %c0_i32_2 = arith.constant 0 : i32
    %c0_i32_3 = arith.constant 0 : i32
    return %c0_i32, %c0_i32_0, %c0_i32_1, %c0_i32_2 : i32, i32, i32, i32
  }
  func.func @transform_5(%arg0: i32) -> (i32, i32, i32, i32) {
    %c0_i32 = arith.constant 0 : i32
    %c0_i32_0 = arith.constant 0 : i32
    %c0_i32_1 = arith.constant 0 : i32
    %c0_i32_2 = arith.constant 0 : i32
    %c0_i32_3 = arith.constant 0 : i32
    return %c0_i32, %c0_i32_0, %c0_i32_1, %c0_i32_2 : i32, i32, i32, i32
  }
  func.func @transform_6(%arg0: i32) -> (i32, i32, i32, i32) {
    %c0_i32 = arith.constant 0 : i32
    %c0_i32_0 = arith.constant 0 : i32
    %c0_i32_1 = arith.constant 0 : i32
    %c0_i32_2 = arith.constant 0 : i32
    %c0_i32_3 = arith.constant 0 : i32
    return %c0_i32, %c0_i32_0, %c0_i32_1, %c0_i32_2 : i32, i32, i32, i32
  }
  func.func @transform_7(%arg0: i32) -> (i32, i32, i32, i32) {
    %c0_i32 = arith.constant 0 : i32
    %c0_i32_0 = arith.constant 0 : i32
    %c0_i32_1 = arith.constant 0 : i32
    %c0_i32_2 = arith.constant 0 : i32
    %c0_i32_3 = arith.constant 0 : i32
    return %c0_i32, %c0_i32_0, %c0_i32_1, %c0_i32_2 : i32, i32, i32, i32
  }
  func.func @transform_8(%arg0: i32) -> (i32, i32, i32) {
    %c0_i32 = arith.constant 0 : i32
    %c0_i32_0 = arith.constant 0 : i32
    %c0_i32_1 = arith.constant 0 : i32
    %c0_i32_2 = arith.constant 0 : i32
    return %c0_i32, %c0_i32_0, %c0_i32_1 : i32, i32, i32
  }
  func.func @transform_9(%arg0: i32) -> (i32, i32, i32) {
    %c0_i32 = arith.constant 0 : i32
    %c0_i32_0 = arith.constant 0 : i32
    %c0_i32_1 = arith.constant 0 : i32
    %c0_i32_2 = arith.constant 0 : i32
    return %c0_i32, %c0_i32_0, %c0_i32_1 : i32, i32, i32
  }
  func.func @transform_10(%arg0: i32) -> (i32, i32, i32) {
    %c0_i32 = arith.constant 0 : i32
    %c0_i32_0 = arith.constant 0 : i32
    %c0_i32_1 = arith.constant 0 : i32
    %c0_i32_2 = arith.constant 0 : i32
    return %c0_i32, %c0_i32_0, %c0_i32_1 : i32, i32, i32
  }
  func.func @transform_11(%arg0: i32) -> (i32, i32, i32) {
    %c0_i32 = arith.constant 0 : i32
    %c0_i32_0 = arith.constant 0 : i32
    %c0_i32_1 = arith.constant 0 : i32
    %c0_i32_2 = arith.constant 0 : i32
    return %c0_i32, %c0_i32_0, %c0_i32_1 : i32, i32, i32
  }
  func.func @transform_12(%arg0: i32) -> (i32, i32, i32) {
    %c0_i32 = arith.constant 0 : i32
    %c0_i32_0 = arith.constant 0 : i32
    %c0_i32_1 = arith.constant 0 : i32
    %c0_i32_2 = arith.constant 0 : i32
    return %c0_i32, %c0_i32_0, %c0_i32_1 : i32, i32, i32
  }
  func.func @transform_13(%arg0: i32) -> (i32, i32, i32) {
    %c0_i32 = arith.constant 0 : i32
    %c0_i32_0 = arith.constant 0 : i32
    %c0_i32_1 = arith.constant 0 : i32
    %c0_i32_2 = arith.constant 0 : i32
    return %c0_i32, %c0_i32_0, %c0_i32_1 : i32, i32, i32
  }
  func.func @transform_14(%arg0: i32) -> (i32, i32, i32) {
    %c0_i32 = arith.constant 0 : i32
    %c0_i32_0 = arith.constant 0 : i32
    %c0_i32_1 = arith.constant 0 : i32
    %c0_i32_2 = arith.constant 0 : i32
    return %c0_i32, %c0_i32_0, %c0_i32_1 : i32, i32, i32
  }
  func.func @transform_15(%arg0: i32) -> (i32, i32, i32) {
    %c0_i32 = arith.constant 0 : i32
    %c0_i32_0 = arith.constant 0 : i32
    %c0_i32_1 = arith.constant 0 : i32
    %c0_i32_2 = arith.constant 0 : i32
    return %c0_i32, %c0_i32_0, %c0_i32_1 : i32, i32, i32
  }
  func.func @transform_16(%arg0: i32) -> (i32, i32, i32) {
    %c0_i32 = arith.constant 0 : i32
    %c0_i32_0 = arith.constant 0 : i32
    %c0_i32_1 = arith.constant 0 : i32
    %c0_i32_2 = arith.constant 0 : i32
    return %c0_i32, %c0_i32_0, %c0_i32_1 : i32, i32, i32
  }
  func.func @transform_17(%arg0: i32) -> (i32, i32, i32, i32) {
    %c0_i32 = arith.constant 0 : i32
    %c0_i32_0 = arith.constant 0 : i32
    %c0_i32_1 = arith.constant 0 : i32
    %c0_i32_2 = arith.constant 0 : i32
    %c0_i32_3 = arith.constant 0 : i32
    return %c0_i32, %c0_i32_0, %c0_i32_1, %c0_i32_2 : i32, i32, i32, i32
  }
  func.func @transform_18(%arg0: i32) -> (i32, i32, i32) {
    %c0_i32 = arith.constant 0 : i32
    %c0_i32_0 = arith.constant 0 : i32
    %c0_i32_1 = arith.constant 0 : i32
    %c0_i32_2 = arith.constant 0 : i32
    return %c0_i32, %c0_i32_0, %c0_i32_1 : i32, i32, i32
  }
  func.func @transform_19(%arg0: i32) -> (i32, i32) {
    %c0_i32 = arith.constant 0 : i32
    %c0_i32_0 = arith.constant 0 : i32
    %c0_i32_1 = arith.constant 0 : i32
    return %c0_i32, %c0_i32_0 : i32, i32
  }
  func.func @transform_20(%arg0: i32) -> (i32, i32) {
    %c0_i32 = arith.constant 0 : i32
    %c0_i32_0 = arith.constant 0 : i32
    %c0_i32_1 = arith.constant 0 : i32
    return %c0_i32, %c0_i32_0 : i32, i32
  }
  func.func @transform_21(%arg0: i32) -> (i32, i32, i32) {
    %c0_i32 = arith.constant 0 : i32
    %c0_i32_0 = arith.constant 0 : i32
    %c0_i32_1 = arith.constant 0 : i32
    return %arg0, %c0_i32, %c0_i32_0 : i32, i32, i32
  }
}

</mosaic_0001>

<bundles_post_ra>
// kernel: transformer_classifier_forward.1
= control target key start
LH: loop header
LB: loop body
LE: loop exit
PB: predicated region body
PF: predicated region fallthrough
CT: control target
= control target key end

     0   :  { %s6571_s0 = inlined_call_operand.vmem [shape: f32[2,8,32], index: 0, kind: input, shape index: {}]   ;;  %s6572_s1 = inlined_call_operand.vmem [shape: bf16[2,4,32,8], index: 1, kind: input, shape index: {}]   ;;  %s6573_s2 = inlined_call_operand.vmem [shape: bf16[2,4,32,8], index: 2, kind: input, shape index: {}]   ;;  %s6574_s3 = inlined_call_operand.vmem [shape: bf16[2,4,32,8], index: 3, kind: input, shape index: {}]   ;;  %s6575_s4 = inlined_call_operand.vmem [shape: f32[2,4,1,8], index: 4, kind: input, shape index: {}]   ;;  %s6576_s5 = inlined_call_operand.vmem [shape: f32[2,4,1,8], index: 5, kind: input, shape index: {}]   ;;  %s6577_s6 = inlined_call_operand.vmem [shape: f32[2,4,1,8], index: 6, kind: input, shape index: {}]   ;;  %s6578_s7 = inlined_call_operand.vmem [shape: bf16[2,4,8,32], index: 7, kind: input, shape index: {}]   ;;  %s6579_s8 = inlined_call_operand.vmem [shape: f32[2,1,32], index: 8, kind: input, shape index: {}]   ;;  %s6580_s9 = inlined_call_operand.vmem [shape: bf16[2,32,64], index: 9, kind: input, shape index: {}]   ;;  %s6581_s10 = inlined_call_operand.vmem [shape: f32[2,1,64], index: 10, kind: input, shape index: {}]   ;;  %s6582_s11 = inlined_call_operand.vmem [shape: bf16[2,64,32], index: 11, kind: input, shape index: {}]   ;;  %s6583_s12 = inlined_call_operand.vmem [shape: f32[2,1,32], index: 12, kind: input, shape index: {}]   ;;  %s6584_s13 = inlined_call_operand.vmem [shape: f32[2,1,32], index: 13, kind: input, shape index: {}]   ;;  %s6585_s14 = inlined_call_operand.vmem [shape: f32[2,1,32], index: 14, kind: input, shape index: {}]   ;;  %s6586_s15 = inlined_call_operand.vmem [shape: f32[2,1,32], index: 15, kind: input, shape index: {}]   ;;  %s6587_s16 = inlined_call_operand.vmem [shape: f32[2,1,32], index: 16, kind: input, shape index: {}]   ;;  %s6588_s17 = inlined_call_operand.vmem [shape: bf16[2,3,32,32], index: 17, kind: input, shape index: {}]   ;;  %s6589_s18 = inlined_call_operand.vmem [shape: f32[2,1,32], index: 18, kind: input, shape index: {}]   ;;  %s6590_s19 = inlined_call_operand.vmem [shape: bf16[32,128], index: 19, kind: input, shape index: {}]   ;;  %s6591_s20 = inlined_call_operand.vmem [shape: f32[1,128], index: 20, kind: input, shape index: {}]   ;;  %s6592_s21 = inlined_call_operand.hbm [shape: f32[2,1,128], index: 21, kind: output, shape index: {}]  }
   0x1   :  { %6606 = sst [smem:[#allocation11_spill]] %s6571_s0 }
   0x2   :  { %6607 = sst [smem:[#allocation12_spill]] %s6572_s1 }
   0x3   :  { %6608 = sst [smem:[#allocation13_spill]] %s6573_s2 }
   0x4   :  { %6609 = sst [smem:[#allocation14_spill]] %s6574_s3 }
   0x5   :  { %6610 = sst [smem:[#allocation15_spill]] %s6575_s4 }
   0x6   :  { %6611 = sst [smem:[#allocation16_spill]] %s6576_s5 }
   0x7   :  { %6612 = sst [smem:[#allocation17_spill]] %s6577_s6 }
   0x8   :  { %6613 = sst [smem:[#allocation18_spill]] %s6578_s7 }
   0x9   :  { %6614 = sst [smem:[#allocation19_spill]] %s6592_s21 }
   0xa   :  { %26 = vsyncpa [#allocation3], 0 }
   0xb   :  { %28 = vsyncpa [#allocation3 + $0x1], 0  ;;  %s5715_s2 = smov 0   ;;  %s5717_s25 = smov 0  }
   0xc   :  { %s5719_s26 = smov 0   ;;  %s5721_s27 = smov 0  }
   0xd LB: > { %6615 = sst [smem:[#allocation5_spill]] %s5588_s2  ;;  %s5736_s3 = sadd.s32 4294967295, %s5600_s27   ;;  %s5600_s27 = sphi %s5721_s27, %s6636_s27   ;;  %s5596_s26 = sphi %s5719_s26, %s6638_s26   ;;  %s5592_s25 = sphi %s5717_s25, %s6640_s25   ;;  %s5588_s2 = sphi %s5715_s2, %s6639_s2  }
   0xe   : > { %6616 = sst [smem:[#allocation6_spill]] %s5596_s26  ;;  %s4461_s28 = sadd.s32 4294967294, %s5600_s27  }
   0xf   : > { %6617 = sst [smem:[#allocation7_spill]] %s5600_s27  ;;  %s5740_s29 = sadd.s32 1, %s5600_s27  }
  0x10   : > { %6618 = sst [smem:[#allocation8_spill]] %s5740_s29  ;;  %s487_s0 = sadd.s32 1, %s5596_s26 }
  0x11   : > { %s484_s4 = ssub.s32 %s5600_s27, %s5740_s29  ;;  %p497_p0 = scmp.ne.s32.totalorder %s5596_s26, %s5592_s25 }
  0x12   : > { %p485_p1 = scmp.eq.s32.totalorder %s484_s4, 0  ;;  %p498_p2 = scmp.eq.s32.totalorder %s5736_s3, 1 }
  0x13   : > { %p503_p3 = scmp.ne.s32.totalorder %s5592_s25, %s5588_s2  ;;  %p504_p4 = scmp.eq.s32.totalorder %s4461_s28, 1 }
  0x14   : > { %s5751_s30 = scalar_select %p485_p1, %s5596_s26, %s487_s0  }
  0x15   : > { %p5753_p5 = por %p498_p2, %p497_p0  ;;  %p5757_p6 = por %p504_p4, %p503_p3 }
  0x16   : > { %6619 = sst [smem:[#allocation9_spill]] %s5751_s30  ;;  %p4464_p7 = scmp.ge.s32.totalorder %s5600_s27, 1 }
  0x17   : > { %s6621_s22 = scalar_select %p5757_p6, 1, 0 }
  0x18   : > { %p589_p8 = scmp.lt.s32.totalorder %s5600_s27, 3 }
  0x19   : > { %6622 = sst [smem:[#allocation10_spill]] %s6621_s22 }
  0x1a   : > { %p590_p9 = pnand %p4464_p7, %p589_p8 }
  0x1b   : > { %s6623_s24 = sld [smem:[#allocation13_spill]] (!%p590_p9)  ;;  %v5602_v1 = vmov (!%p590_p9), 0.0   ;;  %s6624_s4 = sld [smem:[#allocation12_spill]] (!%p590_p9)  ;;  %vm5603_vm0 = vmmov (!%p590_p9), 0   ;;  %vm677_vm1 = vcmask (!%p590_p9), 261120   ;;  %vm850_vm2 = vcmask (!%p590_p9), 64512  }
  0x1c   : > { %593 = sbr.rel (%p590_p9) target bundleno = 10647 (0x2997), region = 104  ;;  %4959 = vmatprep.subr.bf16.mxu1 (!%p590_p9), %v5602_v1  ;;  %4951 = vmatprep.subr.bf16.mxu0 (!%p590_p9), %v5602_v1  ;;  %p647_p10 = scmp.lt.s32.totalorder (!%p590_p9), %s5736_s3, 1  ;;  %vm913_vm3 = vcmask (!%p590_p9), 1043456   ;;  %vm2210_vm4 = vcmask (!%p590_p9), 523264  }
  0x1d   : > { %4963 = vmatprep.mubr.msk.bf16.mxu1 (!%p590_p9), %vm5603_vm0, %v5602_v1  ;;  %4955 = vmatprep.mubr.msk.bf16.mxu0 (!%p590_p9), %vm5603_vm0, %v5602_v1  ;;  %s6625_s29 = sld [smem:[#allocation11_spill]] (!%p590_p9)  ;;  %s6626_s23 = sld [smem:[#allocation16_spill]] (!%p590_p9) }
  0x1e   : > { %s6630_s6 = sld [smem:[#allocation17_spill]] (!%p590_p9)  ;;  %s6631_s7 = sld [smem:[#allocation18_spill]] (!%p590_p9) }
  0x1f   : > { %s645_s2 = sand.u32 (!%p590_p9), 1, %s5592_s25   ;;  %s4791_s27 = sshll.u32 (!%p590_p9), %s5736_s3, 4 }
  0x20   : > { %s646_s1 = scalar_lea.vmem (!%p590_p9), [#allocation2], %s645_s2  ;;  %s5604_s21 = smov (!%p590_p9), [#allocation2]  }
  0x21   : > { %v5424_v0 = vld [vmem:[%s6623_s24] sm:$0xff] (!%p590_p9)   ;;  %v5426_v3 = vld [vmem:[%s6623_s24 + $0x8] sm:$0xff] (!%p590_p9)   ;;  %v5431_v43 = vld [vmem:[%s6624_s4 + $0x10] sm:$0xff] (!%p590_p9)  }
  0x22   : > { %v5425_v2 = vld [vmem:[%s6624_s4] sm:$0xff] (!%p590_p9)   ;;  %4960 = vmatpush3.bf16.msra.mxu1 (!%p590_p9), %v5424_v0  ;;  %v5427_v4 = vld [vmem:[%s6624_s4 + $0x8] sm:$0xff] (!%p590_p9)   ;;  %v5433_v44 = vld [vmem:[%s6624_s4 + $0x18] sm:$0xff] (!%p590_p9)  }
  0x23   : > { %4952 = vmatpush3.bf16.msra.mxu0 %v5425_v2  ;;  %4961 = vmatprep.subr.bf16.mxu1 %v5602_v1  ;;  %s648_s28 = scalar_select %p647_p10, %s5736_s3, 1  ;;  %v4470_v7 = vld [vmem:[%s6626_s23] ss:$0 sm:$0xff]  ;;  %v5430_v48 = vld [vmem:[%s6623_s24 + $0x10] sm:$0xff]   ;;  %v5432_v50 = vld [vmem:[%s6623_s24 + $0x18] sm:$0xff]  }
  0x24   : > { %4953 = vmatprep.subr.bf16.mxu0 %v5602_v1  ;;  %v4474_v38 = vld [vmem:[%s6630_s6] ss:$0 sm:$0xff]  ;;  %v4494_v59 = vld [vmem:[%s6626_s23 + $0x1] ss:$0 sm:$0xff] }
  0x25   : > { %s4465_s26 = sshll.u32 %s648_s28, 3  ;;  %s4406_s28 = sshll.u32 %s646_s1, 4  ;;  %s6531_s28 = int_to_ptr.vmem [resolvable:$true] %s4406_s28 }
  0x26   : > { %4962 = vmatpush3.bf16.msra.mxu1 %v5426_v3  ;;  %s650_s22 = scalar_lea.vmem %s6625_s29, %s4465_s26  ;;  %s6627_s26 = sld [smem:[#allocation15_spill]] }
  0x27   : > { %4954 = vmatpush3.bf16.msra.mxu0 %v5427_v4  ;;  %4975 = vmatprep.subr.bf16.mxu1 %v5602_v1  ;;  %v5789_v5 = vld [vmem:[%s650_s22] sm:$0xff]  ;;  %s6629_s22 = sld [smem:[#allocation14_spill]]  ;;  %s4394_s29 = scalar_lea.sflag [#allocation3], %s645_s2 }
  0x28   : > { %4967 = vmatprep.subr.bf16.mxu0 %v5602_v1  ;;  %v5794_v6 = vpack.c.bf16 %v5789_v5, %v5789_v5  ;;  %s5538_s3 = scalar_lea.vmem %s6531_s28, 16 }
  0x29   : > { %p5539_p11 = scmp.ne.s32.totalorder %s6531_s28, %s5538_s3 }
  0x2a   : > { %4964 = vmatmul.mubr.msk.bf16.vlgmr.msra.gmra.mrb[0].mxu1 %vm677_vm1, %v5794_v6  ;;  %4956 = vmatmul.mubr.msk.bf16.vlgmr.msra.gmra.mrb[0].mxu0 %vm677_vm1, %v5794_v6 }
  0x2b   : > { %4977 = vmatprep.mubr.msk.bf16.mxu1 %vm5603_vm0, %v5602_v1  ;;  %4971 = vmatprep.mubr.msk.bf16.mxu0 %vm5603_vm0, %v5602_v1  ;;  %p5540_p12 = pnand %p5539_p11, %p5753_p5 }
  0x2c   : > { %s6628_s30 = smov %s6627_s26  ;;  %v4466_v8 = vld [vmem:[%s6627_s26] ss:$0 sm:$0xff] }
  0x2d   : > { %v5428_v23 = vld [vmem:[%s6629_s22] sm:$0xff]   ;;  %v5429_v24 = vld [vmem:[%s6629_s22 + $0x8] sm:$0xff]   ;;  %p5541_p13 = pneg %p5540_p12 }
  0x2e   : > { %4968 = vmatpush3.bf16.msra.mxu0 %v5428_v23  ;;  %v4485_v60 = vld [vmem:[%s6628_s30 + $0x1] ss:$0 sm:$0xff] }
  0x2f   : > { %4969 = vmatprep.subr.bf16.mxu0 %v5602_v1 }
  0x32   : > { %4970 = vmatpush3.bf16.msra.mxu0 %v5429_v24 }
  0x33   : > { %4981 = vmatprep.subr.bf16.mxu0 %v5602_v1 }
  0x35   : > { %4972 = vmatmul.mubr.msk.bf16.vlgmr.msra.gmra.mrb[4].mxu0 %vm677_vm1, %v5794_v6 }
  0x36   : > { %4983 = vmatprep.mubr.msk.bf16.mxu0 %vm5603_vm0, %v5602_v1 }
  0xfd   : > { %v778_v9 = vpop.f32.mrb[0].mxu1  ;;  %v715_v10 = vpop.f32.mrb[0].mxu0 }
  0xfe   : > { %v779_v11 = vadd.f32 %v4470_v7, %v778_v9  ;;  %v4965_v12 = vpop.f32.mrb[1].mxu1  ;;  %v716_v13 = vadd.f32 %v4466_v8, %v715_v10  ;;  %v4957_v14 = vpop.f32.mrb[1].mxu0  ;;  %v5434_v10 = vld [vmem:[%s6629_s22 + $0x10] sm:$0xff]  }
  0xff   : > { %v781_v15 = vpop.f32.mrb[2].mxu1  ;;  %v718_v16 = vpop.f32.mrb[2].mxu0 }
 0x100   : > { %v849_v17 = vpack.c.bf16 %v779_v11, %v779_v11  ;;  %v4966_v18 = vpop.f32.mrb[3].mxu1  ;;  %v4958_v19 = vpop.f32.mrb[3].mxu0  ;;  %v847_v21 = vmul.f32 0.35355338, %v716_v13  ;;  %v5435_v11 = vld [vmem:[%s6629_s22 + $0x18] sm:$0xff]  }
 0x102   : > { %v855_v20 = vsel %vm850_vm2, %v849_v17, 0  ;;  %v848_v22 = vpack.c.bf16 %v847_v21, %v847_v21  ;;  %v4503_v17 = vld [vmem:[%s6630_s6 + $0x1] ss:$0 sm:$0xff] }
 0x103   : > { %4976 = vmatpush3.bf16.xpose.msra.mxu1 %v855_v20 }
 0x104   : > { %4987 = vmatprep.subr.bf16.mxu1 %v5602_v1 }
 0x108   : > { %v841_v35 = vpop.f32.mrb[4].mxu0 }
 0x109   : > { %v4973_v36 = vpop.f32.mrb[5].mxu0  ;;  %v842_v40 = vadd.f32 %v4474_v38, %v841_v35  ;;  %v5436_v38 = vld [vmem:[%s6623_s24 + $0x20] sm:$0xff]  }
 0x10a   : > { %4978 = vmatmul.mubr.msk.bf16.vlgmr.msra.gmra.mrb[4].mxu1 %vm850_vm2, %v848_v22  ;;  %v844_v37 = vpop.f32.mrb[6].mxu0 }
 0x10b   : > { %4991 = vmatprep.mubr.msk.bf16.mxu1 %vm5603_vm0, %v5602_v1  ;;  %v4974_v39 = vpop.f32.mrb[7].mxu0  ;;  %v909_v41 = vpack.c.bf16 %v842_v40, %v842_v40  ;;  %4988 = vmatpush3.bf16.msra.mxu1 %v5431_v43  ;;  %v5437_v40 = vld [vmem:[%s6623_s24 + $0x28] sm:$0xff]  }
 0x10c   : > { %4989 = vmatprep.subr.bf16.mxu1 %v5602_v1 }
 0x10d   : > { %v915_v42 = vsel %vm913_vm3, %v909_v41, 0 }
 0x10e   : > { %4982 = vmatpush3.bf16.msra.mxu0 %v915_v42  ;;  %v5438_v42 = vld [vmem:[%s6624_s4 + $0x20] sm:$0xff]  }
 0x10f   : > { %4995 = vmatprep.subr.bf16.mxu0 %v5602_v1  ;;  %4990 = vmatpush3.bf16.msra.mxu1 %v5433_v44 }
 0x110   : > { %5003 = vmatprep.subr.bf16.mxu1 %v5602_v1 }
 0x112   : > { %4992 = vmatmul.mubr.msk.bf16.vlgmr.msra.gmra.mrb[8].mxu1 %vm677_vm1, %v5794_v6 }
 0x113   : > { %5007 = vmatprep.mubr.msk.bf16.mxu1 %vm5603_vm0, %v5602_v1  ;;  %5004 = vmatpush3.bf16.msra.mxu1 %v5434_v10 }
 0x114   : > { %5005 = vmatprep.subr.bf16.mxu1 %v5602_v1 }
 0x117   : > { %5006 = vmatpush3.bf16.msra.mxu1 %v5435_v11 }
 0x118   : > { %5017 = vmatprep.subr.bf16.mxu1 %v5602_v1 }
 0x11a   : > { %5008 = vmatmul.mubr.msk.bf16.vlgmr.msra.gmra.mrb[12].mxu1 %vm677_vm1, %v5794_v6 }
 0x11b   : > { %5019 = vmatprep.mubr.msk.bf16.mxu1 %vm5603_vm0, %v5602_v1 }
 0x1dd   : > { %v891_v25 = vpop.f32.mrb[4].mxu1 }
 0x1de   : > { %v4979_v26 = vpop.f32.mrb[5].mxu1  ;;  %v897_v27 = vsel %vm850_vm2, %v891_v25, -inf }
 0x1df   : > { %898 = vmax.xlane.f32.xlu0 %v897_v27  ;;  %v894_v28 = vpop.f32.mrb[6].mxu1 }
 0x1e0   : > { %v4980_v29 = vpop.f32.mrb[7].mxu1 }
 0x1e5   : > { %v1018_v51 = vpop.f32.mrb[8].mxu1 }
 0x1e6   : > { %v4993_v52 = vpop.f32.mrb[9].mxu1  ;;  %v1019_v0 = vadd.f32 %v4485_v60, %v1018_v51 }
 0x1e7   : > { %v1021_v53 = vpop.f32.mrb[10].mxu1  ;;  %v4526_v52 = vld [vmem:[%s6626_s23 + $0x2] ss:$0 sm:$0xff] }
 0x1e8   : > { %v4994_v54 = vpop.f32.mrb[11].mxu1  ;;  %v1154_v8 = vmul.f32 0.35355338, %v1019_v0 }
 0x1ea   : > { %v1155_v9 = vpack.c.bf16 %v1154_v8, %v1154_v8 }
 0x1ed   : > { %v1148_v18 = vpop.f32.mrb[12].mxu1 }
 0x1ee   : > { %v1149_v19 = vadd.f32 %v4503_v17, %v1148_v18  ;;  %v5009_v20 = vpop.f32.mrb[13].mxu1 }
 0x1ef   : > { %v1151_v21 = vpop.f32.mrb[14].mxu1 }
 0x1f0   : > { %v1215_v22 = vpack.c.bf16 %v1149_v19, %v1149_v19  ;;  %v5010_v23 = vpop.f32.mrb[15].mxu1 }
 0x1f2   : > { %v1220_v24 = vsel %vm913_vm3, %v1215_v22, 0 }
 0x1f3   : > { %5018 = vmatpush3.bf16.msra.mxu1 %v1220_v24 }
 0x1f4   : > { %5029 = vmatprep.subr.bf16.mxu1 %v5602_v1 }
 0x26c   : > { %v899_v30 = vpop.xlane.xlu0 %898 }
 0x26d   : > { %v900_v31 = vsub.f32 %v891_v25, %v899_v30  ;;  %v4509_v30 = vld [vmem:[%s6631_s7 + $0x4] sm:$0xf] }
 0x26f   : > { %v901_v32 = vmul.f32 1.442695, %v900_v31  ;;  %v1269_v31 = vsel %vm913_vm3, %v4509_v30, 0 }
 0x271   : > { %5498 = vpow2.f32 %v901_v32 }
 0x27b   : > { %v5499_v33 = vpop.eup %5498 }
 0x27c   : > { %v903_v34 = vsel %vm850_vm2, %v5499_v33, 0.0 }
 0x27d   : > { %904 = vadd.xlane.f32.xlu0 %v903_v34  ;;  %v958_v34 = vld [vmem:[%s6631_s7] sm:$0xf] }
 0x27e   : > { %v1315_v37 = vsel %vm913_vm3, %v958_v34, 0 }
 0x30a   : > { %v905_v45 = vpop.xlane.xlu0 %904 }
 0x30b   : > { %5500 = vrcp.f32 %v905_v45 }
 0x315   : > { %v5501_v46 = vpop.eup %5500 }
 0x316   : > { %v907_v47 = vmul.f32 %v5501_v46, %v5499_v33 }
 0x318   : > { %v908_v49 = vpack.c.bf16 %v907_v47, %v907_v47  ;;  %v5439_v47 = vld [vmem:[%s6624_s4 + $0x28] sm:$0xff]  }
 0x31a   : > { %4984 = vmatmul.mubr.msk.bf16.vlgmr.msra.gmra.mrb[8].mxu0 %vm850_vm2, %v908_v49 }
 0x31b   : > { %4996 = vmatpush3.bf16.msra.mxu0 %v5430_v48  ;;  %4999 = vmatprep.mubr.msk.bf16.mxu0 %vm5603_vm0, %v5602_v1 }
 0x31c   : > { %4997 = vmatprep.subr.bf16.mxu0 %v5602_v1 }
 0x31f   : > { %4998 = vmatpush3.bf16.msra.mxu0 %v5432_v50 }
 0x320   : > { %5011 = vmatprep.subr.bf16.mxu0 %v5602_v1 }
 0x322   : > { %5000 = vmatmul.mubr.msk.bf16.vlgmr.msra.gmra.mrb[12].mxu0 %vm677_vm1, %v5794_v6 }
 0x323   : > { %5013 = vmatprep.mubr.msk.bf16.mxu0 %vm5603_vm0, %v5602_v1 }
 0x3ed   : > { %v5861_v55 = vpop.f32.mrb[8].mxu0 }
 0x3ee   : > { %v4985_v56 = vpop.f32.mrb[9].mxu0  ;;  %v957_v39 = vpack.c.bf16 %v5861_v55, %v5861_v55 }
 0x3ef   : > { %v954_v57 = vpop.f32.mrb[10].mxu0 }
 0x3f0   : > { %v4986_v58 = vpop.f32.mrb[11].mxu0 }
 0x3f5   : > { %v1083_v61 = vpop.f32.mrb[12].mxu0 }
 0x3f6   : > { %v1084_v62 = vadd.f32 %v4494_v59, %v1083_v61  ;;  %v5001_v63 = vpop.f32.mrb[13].mxu0 }
 0x3f7   : > { %v1086_v2 = vpop.f32.mrb[14].mxu0 }
 0x3f8   : > { %v1156_v3 = vpack.c.bf16 %v1084_v62, %v1084_v62  ;;  %v5002_v4 = vpop.f32.mrb[15].mxu0  ;;  %v4517_v2 = vld [vmem:[%s6628_s30 + $0x2] ss:$0 sm:$0xff] }
 0x3fa   : > { %v1161_v7 = vsel %vm850_vm2, %v1156_v3, 0 }
 0x3fb   : > { %5012 = vmatpush3.bf16.xpose.msra.mxu0 %v1161_v7 }
 0x3fc   : > { %5023 = vmatprep.subr.bf16.mxu0 %v5602_v1 }
 0x402   : > { %5014 = vmatmul.mubr.msk.bf16.vlgmr.msra.gmra.mrb[16].mxu0 %vm850_vm2, %v1155_v9 }
 0x403   : > { %5025 = vmatprep.mubr.msk.bf16.mxu0 %vm5603_vm0, %v5602_v1  ;;  %5024 = vmatpush3.bf16.msra.mxu0 %v1269_v31 }
 0x404   : > { %5035 = vmatprep.subr.bf16.mxu0 %v5602_v1 }
 0x4d5   : > { %v1197_v12 = vpop.f32.mrb[16].mxu0 }
 0x4d6   : > { %v5015_v13 = vpop.f32.mrb[17].mxu0  ;;  %v1203_v14 = vsel %vm850_vm2, %v1197_v12, -inf }
 0x4d7   : > { %1204 = vmax.xlane.f32.xlu1 %v1203_v14  ;;  %v1200_v15 = vpop.f32.mrb[18].mxu0  ;;  %v5441_v13 = vld [vmem:[%s6629_s22 + $0x28] sm:$0xff]  }
 0x4d8   : > { %v5016_v16 = vpop.f32.mrb[19].mxu0 }
 0x564   : > { %v1205_v25 = vpop.xlane.xlu1 %1204 }
 0x565   : > { %v1206_v26 = vsub.f32 %v1197_v12, %v1205_v25  ;;  %v5440_v12 = vld [vmem:[%s6629_s22 + $0x20] sm:$0xff]  }
 0x567   : > { %v1207_v27 = vmul.f32 1.442695, %v1206_v26 }
 0x569   : > { %5502 = vpow2.f32 %v1207_v27  ;;  %v4535_v27 = vld [vmem:[%s6630_s6 + $0x2] ss:$0 sm:$0xff] }
 0x573   : > { %v5503_v28 = vpop.eup %5502 }
 0x574   : > { %v1209_v29 = vsel %vm850_vm2, %v5503_v28, 0.0 }
 0x575   : > { %1210 = vadd.xlane.f32.xlu1 %v1209_v29 }
 0x602   : > { %v1211_v32 = vpop.xlane.xlu1 %1210 }
 0x603   : > { %5504 = vrcp.f32 %v1211_v32  ;;  %v4541_v32 = vld [vmem:[%s6631_s7 + $0x8] sm:$0xf] }
 0x60d   : > { %v5505_v33 = vpop.eup %5504 }
 0x60e   : > { %v1213_v35 = vmul.f32 %v5505_v33, %v5503_v28  ;;  %v1667_v33 = vsel %vm913_vm3, %v4541_v32, 0 }
 0x610   : > { %v1214_v36 = vpack.c.bf16 %v1213_v35, %v1213_v35 }
 0x612   : > { %5020 = vmatmul.mubr.msk.bf16.vlgmr.msra.gmra.mrb[16].mxu1 %vm850_vm2, %v1214_v36 }
 0x613   : > { %5030 = vmatpush3.bf16.msra.mxu1 %v1315_v37  ;;  %5031 = vmatprep.mubr.msk.bf16.mxu1 %vm5603_vm0, %v5602_v1 }
 0x614   : > { %5043 = vmatprep.subr.bf16.mxu1 %v5602_v1 }
 0x61a   : > { %5032 = vmatmul.mubr.msk.bf16.vlgmr.msra.gmra.mrb[20].mxu1 %vm850_vm2, %v957_v39  ;;  %v5445_v39 = vld [vmem:[%s6624_s4 + $0x38] sm:$0xff]  }
 0x61b   : > { %5044 = vmatpush3.bf16.msra.mxu1 %v5436_v38  ;;  %5047 = vmatprep.mubr.msk.bf16.mxu1 %vm5603_vm0, %v5602_v1  ;;  %v5443_v38 = vld [vmem:[%s6624_s4 + $0x30] sm:$0xff]  }
 0x61c   : > { %5045 = vmatprep.subr.bf16.mxu1 %v5602_v1 }
 0x61f   : > { %5046 = vmatpush3.bf16.msra.mxu1 %v5437_v40 }
 0x620   : > { %5059 = vmatprep.subr.bf16.mxu1 %v5602_v1 }
 0x622   : > { %5048 = vmatmul.mubr.msk.bf16.vlgmr.msra.gmra.mrb[24].mxu1 %vm677_vm1, %v5794_v6 }
 0x623   : > { %5061 = vmatprep.mubr.msk.bf16.mxu1 %vm5603_vm0, %v5602_v1 }
 0x6e5   : > { %v1256_v41 = vpop.f32.mrb[16].mxu1 }
 0x6e6   : > { %v1262_v43 = vpack.c.bf16 %v1256_v41, %v1256_v41  ;;  %v5021_v44 = vpop.f32.mrb[17].mxu1  ;;  %v5442_v41 = vld [vmem:[%s6623_s24 + $0x30] sm:$0xff]  }
 0x6e7   : > { %v1259_v45 = vpop.f32.mrb[18].mxu1 }
 0x6e8   : > { %v5022_v46 = vpop.f32.mrb[19].mxu1  ;;  %5026 = vmatmul.mubr.msk.bf16.vlgmr.msra.gmra.mrb[20].mxu0 %vm850_vm2, %v1262_v43 }
 0x6e9   : > { %5036 = vmatpush3.bf16.msra.mxu0 %v5438_v42  ;;  %5039 = vmatprep.mubr.msk.bf16.mxu0 %vm5603_vm0, %v5602_v1  ;;  %v5444_v46 = vld [vmem:[%s6623_s24 + $0x38] sm:$0xff]  }
 0x6ea   : > { %5037 = vmatprep.subr.bf16.mxu0 %v5602_v1 }
 0x6ed   : > { %v1351_v48 = vpop.f32.mrb[20].mxu1  ;;  %5038 = vmatpush3.bf16.msra.mxu0 %v5439_v47 }
 0x6ee   : > { %v5033_v49 = vpop.f32.mrb[21].mxu1  ;;  %5051 = vmatprep.subr.bf16.mxu0 %v5602_v1 }
 0x6ef   : > { %v1354_v50 = vpop.f32.mrb[22].mxu1 }
 0x6f0   : > { %v5034_v51 = vpop.f32.mrb[23].mxu1  ;;  %5040 = vmatmul.mubr.msk.bf16.vlgmr.msra.gmra.mrb[24].mxu0 %vm677_vm1, %v5794_v6 }
 0x6f1   : > { %5055 = vmatprep.mubr.msk.bf16.mxu0 %vm5603_vm0, %v5602_v1  ;;  %5052 = vmatpush3.bf16.msra.mxu0 %v5440_v12 }
 0x6f2   : > { %5053 = vmatprep.subr.bf16.mxu0 %v5602_v1 }
 0x6f5   : > { %v1481_v53 = vpop.f32.mrb[24].mxu1  ;;  %5054 = vmatpush3.bf16.msra.mxu0 %v5441_v13 }
 0x6f6   : > { %v1482_v54 = vadd.f32 %v4526_v52, %v1481_v53  ;;  %v5049_v55 = vpop.f32.mrb[25].mxu1  ;;  %5065 = vmatprep.subr.bf16.mxu0 %v5602_v1 }
 0x6f7   : > { %v1484_v56 = vpop.f32.mrb[26].mxu1 }
 0x6f8   : > { %v1554_v57 = vpack.c.bf16 %v1482_v54, %v1482_v54  ;;  %v5050_v58 = vpop.f32.mrb[27].mxu1  ;;  %5056 = vmatmul.mubr.msk.bf16.vlgmr.msra.gmra.mrb[28].mxu0 %vm677_vm1, %v5794_v6  ;;  %v4557_v56 = vld [vmem:[%s6626_s23 + $0x3] ss:$0 sm:$0xff] }
 0x6f9   : > { %5067 = vmatprep.mubr.msk.bf16.mxu0 %vm5603_vm0, %v5602_v1 }
 0x6fa   : > { %v1559_v59 = vsel %vm850_vm2, %v1554_v57, 0  ;;  %v4548_v57 = vld [vmem:[%s6628_s30 + $0x3] ss:$0 sm:$0xff] }
 0x6fb   : > { %5060 = vmatpush3.bf16.xpose.msra.mxu1 %v1559_v59 }
 0x6fc   : > { %5071 = vmatprep.subr.bf16.mxu1 %v5602_v1 }
 0x7bb   : > { %v1305_v60 = vpop.f32.mrb[20].mxu0 }
 0x7bc   : > { %v5943_v61 = vadd.f32 %v1351_v48, %v1305_v60  ;;  %v5027_v62 = vpop.f32.mrb[21].mxu0 }
 0x7bd   : > { %v1308_v63 = vpop.f32.mrb[22].mxu0 }
 0x7be   : > { %v5028_v0 = vpop.f32.mrb[23].mxu0 }
 0x7c3   : > { %v1416_v3 = vpop.f32.mrb[24].mxu0 }
 0x7c4   : > { %v1417_v4 = vadd.f32 %v4517_v2, %v1416_v3  ;;  %v5041_v7 = vpop.f32.mrb[25].mxu0 }
 0x7c5   : > { %v1419_v8 = vpop.f32.mrb[26].mxu0  ;;  %v5446_v7 = vld [vmem:[%s6629_s22 + $0x30] sm:$0xff]  }
 0x7c6   : > { %v1552_v9 = vmul.f32 0.35355338, %v1417_v4  ;;  %v5042_v10 = vpop.f32.mrb[27].mxu0  ;;  %v5447_v8 = vld [vmem:[%s6629_s22 + $0x38] sm:$0xff]  }
 0x7c8   : > { %v1553_v11 = vpack.c.bf16 %v1552_v9, %v1552_v9 }
 0x7ca   : > { %5062 = vmatmul.mubr.msk.bf16.vlgmr.msra.gmra.mrb[28].mxu1 %vm850_vm2, %v1553_v11 }
 0x7cb   : > { %5073 = vmatprep.mubr.msk.bf16.mxu1 %vm5603_vm0, %v5602_v1  ;;  %v1546_v24 = vpop.f32.mrb[28].mxu0  ;;  %5072 = vmatpush3.bf16.msra.mxu1 %v1667_v33 }
 0x7cc   : > { %v5057_v25 = vpop.f32.mrb[29].mxu0  ;;  %v1547_v29 = vadd.f32 %v4535_v27, %v1546_v24  ;;  %5085 = vmatprep.subr.bf16.mxu1 %v5602_v1 }
 0x7cd   : > { %v1549_v26 = vpop.f32.mrb[30].mxu0 }
 0x7ce   : > { %v5058_v28 = vpop.f32.mrb[31].mxu0  ;;  %v1613_v30 = vpack.c.bf16 %v1547_v29, %v1547_v29  ;;  %v4572_v26 = vld [vmem:[%s6631_s7 + $0xc] sm:$0xf] }
 0x7cf   : > { %v2020_v27 = vsel %vm913_vm3, %v4572_v26, 0  ;;  %v5455_v26 = vld [vmem:[%s6629_s22 + $0x40] sm:$0xff]  }
 0x7d0   : > { %v1618_v31 = vsel %vm913_vm3, %v1613_v30, 0 }
 0x7d1   : > { %5066 = vmatpush3.bf16.msra.mxu0 %v1618_v31 }
 0x7d2   : > { %5077 = vmatprep.subr.bf16.mxu0 %v5602_v1 }
 0x89d   : > { %v1595_v14 = vpop.f32.mrb[28].mxu1 }
 0x89e   : > { %v5063_v15 = vpop.f32.mrb[29].mxu1  ;;  %v1601_v16 = vsel %vm850_vm2, %v1595_v14, -inf }
 0x89f   : > { %1602 = vmax.xlane.f32.xlu0 %v1601_v16  ;;  %v1598_v17 = vpop.f32.mrb[30].mxu1 }
 0x8a0   : > { %v5064_v18 = vpop.f32.mrb[31].mxu1 }
 0x92c   : > { %v1603_v19 = vpop.xlane.xlu0 %1602 }
 0x92d   : > { %v1604_v20 = vsub.f32 %v1595_v14, %v1603_v19 }
 0x92f   : > { %v1605_v21 = vmul.f32 1.442695, %v1604_v20 }
 0x931   : > { %5506 = vpow2.f32 %v1605_v21  ;;  %v4566_v21 = vld [vmem:[%s6630_s6 + $0x3] ss:$0 sm:$0xff] }
 0x93b   : > { %v5507_v22 = vpop.eup %5506 }
 0x93c   : > { %v1607_v23 = vsel %vm850_vm2, %v5507_v22, 0.0 }
 0x93d   : > { %1608 = vadd.xlane.f32.xlu1 %v1607_v23 }
 0x9ca   : > { %v1609_v34 = vpop.xlane.xlu1 %1608 }
 0x9cb   : > { %5508 = vrcp.f32 %v1609_v34 }
 0x9d5   : > { %v5509_v35 = vpop.eup %5508 }
 0x9d6   : > { %v1611_v36 = vmul.f32 %v5509_v35, %v5507_v22 }
 0x9d8   : > { %v1612_v37 = vpack.c.bf16 %v1611_v36, %v1611_v36 }
 0x9da   : > { %5068 = vmatmul.mubr.msk.bf16.vlgmr.msra.gmra.mrb[32].mxu0 %vm850_vm2, %v1612_v37 }
 0x9db   : > { %5081 = vmatprep.mubr.msk.bf16.mxu0 %vm5603_vm0, %v5602_v1  ;;  %5078 = vmatpush3.bf16.msra.mxu0 %v5443_v38  ;;  %v4574_v38 = vld [vmem:[%s6579_s8] ss:$0 sm:$0xff] }
 0x9dc   : > { %5079 = vmatprep.subr.bf16.mxu0 %v5602_v1 }
 0x9df   : > { %5080 = vmatpush3.bf16.msra.mxu0 %v5445_v39 }
 0x9e0   : > { %5093 = vmatprep.subr.bf16.mxu0 %v5602_v1 }
 0x9e2   : > { %5082 = vmatmul.mubr.msk.bf16.vlgmr.msra.gmra.mrb[36].mxu0 %vm677_vm1, %v5794_v6 }
 0x9e3   : > { %5097 = vmatprep.mubr.msk.bf16.mxu0 %vm5603_vm0, %v5602_v1  ;;  %5094 = vmatpush3.bf16.msra.mxu0 %v5446_v7 }
 0x9e4   : > { %5095 = vmatprep.subr.bf16.mxu0 %v5602_v1 }
 0x9e7   : > { %5096 = vmatpush3.bf16.msra.mxu0 %v5447_v8 }
 0x9e8   : > { %5107 = vmatprep.subr.bf16.mxu0 %v5602_v1 }
 0x9ea   : > { %5098 = vmatmul.mubr.msk.bf16.vlgmr.msra.gmra.mrb[40].mxu0 %vm677_vm1, %v5794_v6 }
 0x9eb   : > { %5109 = vmatprep.mubr.msk.bf16.mxu0 %vm5603_vm0, %v5602_v1 }
 0xaad   : > { %v1654_v40 = vpop.f32.mrb[32].mxu0 }
 0xaae   : > { %v1660_v42 = vpack.c.bf16 %v1654_v40, %v1654_v40  ;;  %v5069_v43 = vpop.f32.mrb[33].mxu0 }
 0xaaf   : > { %v1657_v44 = vpop.f32.mrb[34].mxu0 }
 0xab0   : > { %v5070_v45 = vpop.f32.mrb[35].mxu0  ;;  %5074 = vmatmul.mubr.msk.bf16.vlgmr.msra.gmra.mrb[32].mxu1 %vm850_vm2, %v1660_v42 }
 0xab1   : > { %5086 = vmatpush3.bf16.msra.mxu1 %v5442_v41  ;;  %5089 = vmatprep.mubr.msk.bf16.mxu1 %vm5603_vm0, %v5602_v1 }
 0xab2   : > { %5087 = vmatprep.subr.bf16.mxu1 %v5602_v1 }
 0xab5   : > { %5088 = vmatpush3.bf16.msra.mxu1 %v5444_v46  ;;  %v1769_v47 = vpop.f32.mrb[36].mxu0 }
 0xab6   : > { %5101 = vmatprep.subr.bf16.mxu1 %v5602_v1  ;;  %v5083_v48 = vpop.f32.mrb[37].mxu0  ;;  %v1770_v62 = vadd.f32 %v4548_v57, %v1769_v47 }
 0xab7   : > { %v1772_v49 = vpop.f32.mrb[38].mxu0 }
 0xab8   : > { %5090 = vmatmul.mubr.msk.bf16.vlgmr.msra.gmra.mrb[36].mxu1 %vm677_vm1, %v5794_v6  ;;  %v5084_v50 = vpop.f32.mrb[39].mxu0  ;;  %v1905_v3 = vmul.f32 0.35355338, %v1770_v62 }
 0xab9   : > { %5103 = vmatprep.mubr.msk.bf16.mxu1 %vm5603_vm0, %v5602_v1 }
 0xaba   : > { %v1906_v4 = vpack.c.bf16 %v1905_v3, %v1905_v3  ;;  %v4577_v3 = vld [vmem:[%s6581_s10] ss:$0 sm:$0xff] }
 0xabd   : > { %v1899_v19 = vpop.f32.mrb[40].mxu0 }
 0xabe   : > { %v5099_v6 = vpop.f32.mrb[41].mxu0  ;;  %v1900_v23 = vadd.f32 %v4566_v21, %v1899_v19 }
 0xabf   : > { %v1902_v20 = vpop.f32.mrb[42].mxu0 }
 0xac0   : > { %v5100_v22 = vpop.f32.mrb[43].mxu0  ;;  %v1966_v24 = vpack.c.bf16 %v1900_v23, %v1900_v23 }
 0xac2   : > { %v1971_v25 = vsel %vm913_vm3, %v1966_v24, 0 }
 0xac3   : > { %5108 = vmatpush3.bf16.msra.mxu0 %v1971_v25  ;;  %v5454_v25 = vld [vmem:[%s6624_s4 + $0x40] sm:$0xff]  }
 0xac4   : > { %5119 = vmatprep.subr.bf16.mxu0 %v5602_v1 }
 0xb83   : > { %v1703_v51 = vpop.f32.mrb[32].mxu1 }
 0xb84   : > { %v6006_v52 = vadd.f32 %v1703_v51, %v5943_v61  ;;  %v5075_v53 = vpop.f32.mrb[33].mxu1  ;;  %v5448_v51 = vld [vmem:[%s6580_s9] sm:$0xff]  }
 0xb85   : > { %v1706_v54 = vpop.f32.mrb[34].mxu1  ;;  %v5451_v53 = vld [vmem:[%s6582_s11 + $0x8] sm:$0xff]  }
 0xb86   : > { %v5076_v55 = vpop.f32.mrb[35].mxu1 }
 0xb8b   : > { %v1834_v58 = vpop.f32.mrb[36].mxu1 }
 0xb8c   : > { %v1835_v59 = vadd.f32 %v4557_v56, %v1834_v58  ;;  %v5091_v60 = vpop.f32.mrb[37].mxu1  ;;  %v4575_v58 = vld [vmem:[%s6584_s13] ss:$0 sm:$0xff] }
 0xb8d   : > { %v1837_v63 = vpop.f32.mrb[38].mxu1  ;;  %v4576_v60 = vld [vmem:[%s6585_s14] ss:$0 sm:$0xff] }
 0xb8e   : > { %v1907_v0 = vpack.c.bf16 %v1835_v59, %v1835_v59  ;;  %v5092_v2 = vpop.f32.mrb[39].mxu1 }
 0xb8f   : > { %v5452_v2 = vld [vmem:[%s6582_s11 + $0x10] sm:$0xff]  }
 0xb90   : > { %v1912_v61 = vsel %vm850_vm2, %v1907_v0, 0 }
 0xb91   : > { %5102 = vmatpush3.bf16.xpose.msra.mxu1 %v1912_v61  ;;  %v5453_v61 = vld [vmem:[%s6582_s11 + $0x18] sm:$0xff]  }
 0xb92   : > { %5113 = vmatprep.subr.bf16.mxu1 %v5602_v1 }
 0xb98   : > { %5104 = vmatmul.mubr.msk.bf16.vlgmr.msra.gmra.mrb[40].mxu1 %vm850_vm2, %v1906_v4 }
 0xb99   : > { %5115 = vmatprep.mubr.msk.bf16.mxu1 %vm5603_vm0, %v5602_v1  ;;  %5114 = vmatpush3.bf16.msra.mxu1 %v2020_v27  ;;  %v5456_v27 = vld [vmem:[%s6624_s4 + $0x48] sm:$0xff]  }
 0xb9a   : > { %5127 = vmatprep.subr.bf16.mxu1 %v5602_v1 }
 0xc6b   : > { %v1948_v9 = vpop.f32.mrb[40].mxu1 }
 0xc6c   : > { %v5105_v10 = vpop.f32.mrb[41].mxu1  ;;  %v1954_v11 = vsel %vm850_vm2, %v1948_v9, -inf }
 0xc6d   : > { %1955 = vmax.xlane.f32.xlu0 %v1954_v11  ;;  %v1951_v12 = vpop.f32.mrb[42].mxu1 }
 0xc6e   : > { %v5106_v13 = vpop.f32.mrb[43].mxu1 }
 0xc6f   : > { %v4581_v13 = vld [vmem:[%s6583_s12] ss:$0 sm:$0xff] }
 0xcfa   : > { %v1956_v14 = vpop.xlane.xlu0 %1955 }
 0xcfb   : > { %v1957_v15 = vsub.f32 %v1948_v9, %v1956_v14 }
 0xcfd   : > { %v1958_v16 = vmul.f32 1.442695, %v1957_v15 }
 0xcff   : > { %5510 = vpow2.f32 %v1958_v16 }
 0xd09   : > { %v5511_v17 = vpop.eup %5510 }
 0xd0a   : > { %v1960_v18 = vsel %vm850_vm2, %v5511_v17, 0.0 }
 0xd0b   : > { %1961 = vadd.xlane.f32.xlu1 %v1960_v18 }
 0xd98   : > { %v1962_v28 = vpop.xlane.xlu1 %1961 }
 0xd99   : > { %5512 = vrcp.f32 %v1962_v28  ;;  %v5457_v28 = vld [vmem:[%s6629_s22 + $0x48] sm:$0xff]  }
 0xda3   : > { %v5513_v29 = vpop.eup %5512 }
 0xda4   : > { %v1964_v30 = vmul.f32 %v5513_v29, %v5511_v17 }
 0xda6   : > { %v1965_v31 = vpack.c.bf16 %v1964_v30, %v1964_v30 }
 0xda8   : > { %5110 = vmatmul.mubr.msk.bf16.vlgmr.msra.gmra.mrb[44].mxu0 %vm850_vm2, %v1965_v31 }
 0xda9   : > { %5123 = vmatprep.mubr.msk.bf16.mxu0 %vm5603_vm0, %v5602_v1  ;;  %5120 = vmatpush3.bf16.msra.mxu0 %v5448_v51 }
 0xdaa   : > { %5121 = vmatprep.subr.bf16.mxu0 %v5602_v1 }
 0xe7b   : > { %v2007_v32 = vpop.f32.mrb[44].mxu0 }
 0xe7c   : > { %v2013_v33 = vpack.c.bf16 %v2007_v32, %v2007_v32  ;;  %v5111_v34 = vpop.f32.mrb[45].mxu0 }
 0xe7d   : > { %v2010_v35 = vpop.f32.mrb[46].mxu0 }
 0xe7e   : > { %v5112_v36 = vpop.f32.mrb[47].mxu0  ;;  %5116 = vmatmul.mubr.msk.bf16.vlgmr.msra.gmra.mrb[44].mxu1 %vm850_vm2, %v2013_v33  ;;  %v4587_v33 = vld [vmem:[%s6586_s15] ss:$0 sm:$0xff] }
 0xe7f   : > { %5135 = vmatprep.mubr.msk.bf16.mxu1 %vm5603_vm0, %v5602_v1  ;;  %v4588_v35 = vld [vmem:[%s6587_s16] ss:$0 sm:$0xff] }
 0xf51   : > { %v2056_v37 = vpop.f32.mrb[44].mxu1 }
 0xf52   : > { %v2062_v39 = vadd.f32 %v2056_v37, %v6006_v52  ;;  %v5117_v40 = vpop.f32.mrb[45].mxu1  ;;  %v5450_v52 = vld [vmem:[%s6582_s11] sm:$0xff]  }
 0xf53   : > { %v2059_v41 = vpop.f32.mrb[46].mxu1  ;;  %5128 = vmatpush3.bf16.msra.mxu1 %v5450_v52  ;;  %v5459_v40 = vld [vmem:[%s6623_s24 + $0x48] sm:$0xff]   ;;  %v4603_v52 = vld [vmem:[%s6626_s23 + $0x4] ss:$0 sm:$0xff] }
 0xf54   : > { %v2070_v42 = vadd.f32 %v4574_v38, %v2062_v39  ;;  %v5118_v43 = vpop.f32.mrb[47].mxu1  ;;  %5129 = vmatprep.subr.bf16.mxu1 %v5602_v1  ;;  %v5458_v38 = vld [vmem:[%s6623_s24 + $0x40] sm:$0xff]  }
 0xf55   : > { %v4612_v41 = vld [vmem:[%s6630_s6 + $0x4] ss:$0 sm:$0xff] }
 0xf56   : > { %v2071_v44 = vadd.f32 %v2070_v42, %v5789_v5  ;;  %v5449_v5 = vld [vmem:[%s6580_s9 + $0x8] sm:$0xff]  }
 0xf57   : > { %5122 = vmatpush3.bf16.msra.mxu0 %v5449_v5  ;;  %5130 = vmatpush3.bf16.msra.mxu1 %v5451_v53  ;;  %v4594_v53 = vld [vmem:[%s6628_s30 + $0x4] ss:$0 sm:$0xff] }
 0xf58   : > { %v2074_v45 = vsel %vm677_vm1, %v2071_v44, 0.0  ;;  %5139 = vmatprep.subr.bf16.mxu0 %v5602_v1  ;;  %5131 = vmatprep.subr.bf16.mxu1 %v5602_v1 }
 0xf59   : > { %2075 = vadd.xlane.f32.xlu0 %v2074_v45 }
 0xf5b   : > { %5132 = vmatpush3.bf16.msra.mxu1 %v5452_v2 }
 0xf5c   : > { %5133 = vmatprep.subr.bf16.mxu1 %v5602_v1 }
 0xf5f   : > { %5134 = vmatpush3.bf16.msra.mxu1 %v5453_v61  ;;  %v5461_v61 = vld [vmem:[%s6624_s4 + $0x58] sm:$0xff]  }
 0xf60   : > { %5155 = vmatprep.subr.bf16.mxu1 %v5602_v1 }
 0xfe6   : > { %v2076_v46 = vpop.xlane.xlu0 %2075 }
 0xfe7   : > { %v2078_v47 = vmul.f32 0.03125, %v2076_v46 }
 0xfe9   : > { %v2079_v48 = vsub.f32 %v2071_v44, %v2078_v47 }
 0xfeb   : > { %v2080_v49 = vmul.f32 %v2079_v48, %v2079_v48 }
 0xfed   : > { %v2081_v50 = vsel %vm677_vm1, %v2080_v49, 0.0 }
 0xfee   : > { %2082 = vadd.xlane.f32.xlu1 %v2081_v50 }
0x107b   : > { %v2083_v54 = vpop.xlane.xlu1 %2082 }
0x107c   : > { %v2084_v55 = vmul.f32 0.03125, %v2083_v54 }
0x107e   : > { %v2085_v56 = vadd.f32 1e-05, %v2084_v55 }
0x1080   : > { %5514 = vrsqrt.f32 %v2085_v56 }
0x108a   : > { %v5515_v57 = vpop.eup %5514 }
0x108b   : > { %v2087_v59 = vmul.f32 %v5515_v57, %v2079_v48 }
0x108d   : > { %v2094_v62 = vmul.f32 %v4575_v58, %v2087_v59 }
0x108f   : > { %v2101_v63 = vadd.f32 %v4576_v60, %v2094_v62 }
0x1091   : > { %v2102_v0 = vpack.c.bf16 %v2101_v63, %v2101_v63 }
0x1093   : > { %5124 = vmatmul.mubr.msk.bf16.vlgmr.msra.gmra.mrb[48].mxu0 %vm677_vm1, %v2102_v0  ;;  %v5460_v0 = vld [vmem:[%s6624_s4 + $0x50] sm:$0xff]  }
0x1094   : > { %5143 = vmatprep.mubr.msk.bf16.mxu0 %vm5603_vm0, %v5602_v1  ;;  %5140 = vmatpush3.bf16.msra.mxu0 %v5454_v25 }
0x1095   : > { %5141 = vmatprep.subr.bf16.mxu0 %v5602_v1 }
0x1098   : > { %5142 = vmatpush3.bf16.msra.mxu0 %v5456_v27 }
0x1099   : > { %5147 = vmatprep.subr.bf16.mxu0 %v5602_v1 }
0x1166   : > { %v2163_v4 = vpop.f32.mrb[48].mxu0 }
0x1167   : > { %v2164_v7 = vadd.f32 %v4577_v3, %v2163_v4  ;;  %v5125_v8 = vpop.f32.mrb[49].mxu0  ;;  %v5462_v3 = vld [vmem:[%s6629_s22 + $0x50] sm:$0xff]   ;;  %v5463_v4 = vld [vmem:[%s6629_s22 + $0x58] sm:$0xff]  }
0x1168   : > { %v2166_v9 = vpop.f32.mrb[50].mxu0 }
0x1169   : > { %v2169_v10 = vmax.f32 %v2164_v7, 0.0  ;;  %v5126_v11 = vpop.f32.mrb[51].mxu0 }
0x116b   : > { %v2170_v12 = vpack.c.bf16 %v2169_v10, %v2169_v10 }
0x116d   : > { %5136 = vmatmul.mubr.msk.bf16.vlgmr.msra.gmra.mrb[48].mxu1 %vm2210_vm4, %v2170_v12 }
0x116e   : > { %5159 = vmatprep.mubr.msk.bf16.mxu1 %vm5603_vm0, %v5602_v1  ;;  %5156 = vmatpush3.bf16.msra.mxu1 %v5455_v26 }
0x116f   : > { %5157 = vmatprep.subr.bf16.mxu1 %v5602_v1 }
0x1172   : > { %5158 = vmatpush3.bf16.msra.mxu1 %v5457_v28 }
0x1173   : > { %5169 = vmatprep.subr.bf16.mxu1 %v5602_v1 }
0x1240   : > { %v2248_v14 = vpop.f32.mrb[48].mxu1 }
0x1241   : > { %v2249_v15 = vadd.f32 %v4581_v13, %v2248_v14  ;;  %v5137_v16 = vpop.f32.mrb[49].mxu1 }
0x1242   : > { %v2251_v17 = vpop.f32.mrb[50].mxu1  ;;  %v4642_v16 = vld [vmem:[%s6630_s6 + $0x5] ss:$0 sm:$0xff] }
0x1243   : > { %v5138_v18 = vpop.f32.mrb[51].mxu1  ;;  %v2254_v19 = vadd.f32 %v2249_v15, %v2101_v63 }
0x1245   : > { %v2257_v6 = vsel %vm677_vm1, %v2254_v19, 0.0 }
0x1246   : > { %2258 = vadd.xlane.f32.xlu0 %v2257_v6 }
0x12d3   : > { %v2259_v20 = vpop.xlane.xlu0 %2258 }
0x12d4   : > { %v2260_v21 = vmul.f32 0.03125, %v2259_v20 }
0x12d6   : > { %v2261_v22 = vsub.f32 %v2254_v19, %v2260_v21 }
0x12d8   : > { %v2262_v23 = vmul.f32 %v2261_v22, %v2261_v22 }
0x12da   : > { %v2263_v24 = vsel %vm677_vm1, %v2262_v23, 0.0 }
0x12db   : > { %2264 = vadd.xlane.f32.xlu1 %v2263_v24 }
0x1368   : > { %v2265_v29 = vpop.xlane.xlu1 %2264 }
0x1369   : > { %v2266_v30 = vmul.f32 0.03125, %v2265_v29 }
0x136b   : > { %v2267_v31 = vadd.f32 1e-05, %v2266_v30 }
0x136d   : > { %5516 = vrsqrt.f32 %v2267_v31  ;;  %v5464_v31 = vld [vmem:[%s6623_s24 + $0x50] sm:$0xff]  }
0x1377   : > { %v5517_v32 = vpop.eup %5516 }
0x1378   : > { %v2269_v34 = vmul.f32 %v5517_v32, %v2261_v22 }
0x137a   : > { %v2276_v36 = vmul.f32 %v4587_v33, %v2269_v34  ;;  %v5465_v33 = vld [vmem:[%s6623_s24 + $0x58] sm:$0xff]  }
0x137c   : > { %v6122_v37 = vadd.f32 %v4588_v35, %v2276_v36 }
0x137e   : > { %v6129_v39 = vpack.c.bf16 %v6122_v37, %v6122_v37 }
0x1380   : > { %5144 = vmatmul.mubr.msk.bf16.vlgmr.msra.gmra.mrb[52].mxu0 %vm677_vm1, %v6129_v39  ;;  %5160 = vmatmul.mubr.msk.bf16.vlgmr.msra.gmra.mrb[52].mxu1 %vm677_vm1, %v6129_v39 }
0x1381   : > { %5148 = vmatpush3.bf16.msra.mxu0 %v5458_v38  ;;  %5151 = vmatprep.mubr.msk.bf16.mxu0 %vm5603_vm0, %v5602_v1 }
0x1382   : > { %5149 = vmatprep.subr.bf16.mxu0 %v5602_v1  ;;  %5171 = vmatprep.mubr.msk.bf16.mxu1 %vm5603_vm0, %v5602_v1 }
0x1385   : > { %5150 = vmatpush3.bf16.msra.mxu0 %v5459_v40  ;;  %v4633_v40 = vld [vmem:[%s6626_s23 + $0x5] ss:$0 sm:$0xff] }
0x1386   : > { %5163 = vmatprep.subr.bf16.mxu0 %v5602_v1 }
0x1388   : > { %5152 = vmatmul.mubr.msk.bf16.vlgmr.msra.gmra.mrb[56].mxu0 %vm677_vm1, %v6129_v39 }
0x1389   : > { %5165 = vmatprep.mubr.msk.bf16.mxu0 %vm5603_vm0, %v5602_v1 }
0x1453   : > { %v2347_v42 = vpop.f32.mrb[52].mxu0  ;;  %v2477_v43 = vpop.f32.mrb[52].mxu1 }
0x1454   : > { %v2478_v44 = vadd.f32 %v4612_v41, %v2477_v43  ;;  %v5145_v45 = vpop.f32.mrb[53].mxu0  ;;  %v5161_v46 = vpop.f32.mrb[53].mxu1  ;;  %v2348_v58 = vadd.f32 %v4594_v53, %v2347_v42  ;;  %v4624_v41 = vld [vmem:[%s6628_s30 + $0x5] ss:$0 sm:$0xff] }
0x1455   : > { %v2350_v47 = vpop.f32.mrb[54].mxu0  ;;  %v2480_v48 = vpop.f32.mrb[54].mxu1 }
0x1456   : > { %v2544_v49 = vpack.c.bf16 %v2478_v44, %v2478_v44  ;;  %v5146_v50 = vpop.f32.mrb[55].mxu0  ;;  %v5162_v51 = vpop.f32.mrb[55].mxu1  ;;  %v2483_v63 = vmul.f32 0.35355338, %v2348_v58 }
0x1458   : > { %v2549_v5 = vsel %vm913_vm3, %v2544_v49, 0  ;;  %v2484_v2 = vpack.c.bf16 %v2483_v63, %v2483_v63 }
0x1459   : > { %5170 = vmatpush3.bf16.msra.mxu1 %v2549_v5 }
0x145a   : > { %5183 = vmatprep.subr.bf16.mxu1 %v5602_v1 }
0x145b   : > { %v2412_v54 = vpop.f32.mrb[56].mxu0 }
0x145c   : > { %v2413_v55 = vadd.f32 %v4603_v52, %v2412_v54  ;;  %v5153_v56 = vpop.f32.mrb[57].mxu0 }
0x145d   : > { %v2415_v57 = vpop.f32.mrb[58].mxu0 }
0x145e   : > { %v2485_v59 = vpack.c.bf16 %v2413_v55, %v2413_v55  ;;  %v5154_v60 = vpop.f32.mrb[59].mxu0 }
0x1460   : > { %v2490_v62 = vsel %vm850_vm2, %v2485_v59, 0 }
0x1461   : > { %5164 = vmatpush3.bf16.xpose.msra.mxu0 %v2490_v62  ;;  %v4648_v62 = vld [vmem:[%s6631_s7 + $0x14] sm:$0xf] }
0x1462   : > { %5175 = vmatprep.subr.bf16.mxu0 %v5602_v1  ;;  %v2904_v63 = vsel %vm913_vm3, %v4648_v62, 0 }
0x1468   : > { %5166 = vmatmul.mubr.msk.bf16.vlgmr.msra.gmra.mrb[60].mxu0 %vm850_vm2, %v2484_v2 }
0x1469   : > { %5176 = vmatpush3.bf16.msra.mxu0 %v5460_v0  ;;  %5179 = vmatprep.mubr.msk.bf16.mxu0 %vm5603_vm0, %v5602_v1 }
0x146a   : > { %5177 = vmatprep.subr.bf16.mxu0 %v5602_v1 }
0x146d   : > { %5178 = vmatpush3.bf16.msra.mxu0 %v5461_v61  ;;  %v4618_v61 = vld [vmem:[%s6631_s7 + $0x10] sm:$0xf] }
0x146e   : > { %5191 = vmatprep.subr.bf16.mxu0 %v5602_v1 }
0x1470   : > { %5180 = vmatmul.mubr.msk.bf16.vlgmr.msra.gmra.mrb[64].mxu0 %vm677_vm1, %v6129_v39 }
0x1471   : > { %5192 = vmatpush3.bf16.msra.mxu0 %v5462_v3  ;;  %5195 = vmatprep.mubr.msk.bf16.mxu0 %vm5603_vm0, %v5602_v1 }
0x1472   : > { %5193 = vmatprep.subr.bf16.mxu0 %v5602_v1 }
0x1475   : > { %5194 = vmatpush3.bf16.msra.mxu0 %v5463_v4 }
0x1476   : > { %5205 = vmatprep.subr.bf16.mxu0 %v5602_v1 }
0x1478   : > { %5196 = vmatmul.mubr.msk.bf16.vlgmr.msra.gmra.mrb[68].mxu0 %vm677_vm1, %v6129_v39 }
0x1479   : > { %5207 = vmatprep.mubr.msk.bf16.mxu0 %vm5603_vm0, %v5602_v1 }
0x153b   : > { %v2526_v7 = vpop.f32.mrb[60].mxu0 }
0x153c   : > { %v5167_v8 = vpop.f32.mrb[61].mxu0  ;;  %v2532_v9 = vsel %vm850_vm2, %v2526_v7, -inf }
0x153d   : > { %2533 = vmax.xlane.f32.xlu0 %v2532_v9  ;;  %v2529_v10 = vpop.f32.mrb[62].mxu0  ;;  %v5466_v8 = vld [vmem:[%s6623_s24 + $0x60] sm:$0xff]  }
0x153e   : > { %v5168_v11 = vpop.f32.mrb[63].mxu0  ;;  %v5467_v10 = vld [vmem:[%s6623_s24 + $0x68] sm:$0xff]  }
0x1543   : > { %v2653_v12 = vpop.f32.mrb[64].mxu0 }
0x1544   : > { %v5181_v13 = vpop.f32.mrb[65].mxu0  ;;  %v2654_v46 = vadd.f32 %v4624_v41, %v2653_v12  ;;  %v5468_v12 = vld [vmem:[%s6624_s4 + $0x60] sm:$0xff]  }
0x1545   : > { %v2656_v14 = vpop.f32.mrb[66].mxu0 }
0x1546   : > { %v5182_v15 = vpop.f32.mrb[67].mxu0  ;;  %v2789_v50 = vmul.f32 0.35355338, %v2654_v46  ;;  %v4674_v46 = vld [vmem:[%s6630_s6 + $0x6] ss:$0 sm:$0xff] }
0x1548   : > { %v2790_v51 = vpack.c.bf16 %v2789_v50, %v2789_v50 }
0x154b   : > { %v2783_v17 = vpop.f32.mrb[68].mxu0 }
0x154c   : > { %v2784_v18 = vadd.f32 %v4642_v16, %v2783_v17  ;;  %v5197_v19 = vpop.f32.mrb[69].mxu0  ;;  %v5469_v17 = vld [vmem:[%s6624_s4 + $0x68] sm:$0xff]  }
0x154d   : > { %v2786_v6 = vpop.f32.mrb[70].mxu0  ;;  %v5470_v19 = vld [vmem:[%s6629_s22 + $0x60] sm:$0xff]  }
0x154e   : > { %v2850_v20 = vpack.c.bf16 %v2784_v18, %v2784_v18  ;;  %v5198_v21 = vpop.f32.mrb[71].mxu0 }
0x1550   : > { %v2855_v22 = vsel %vm913_vm3, %v2850_v20, 0 }
0x1551   : > { %5206 = vmatpush3.bf16.msra.mxu0 %v2855_v22  ;;  %v5471_v22 = vld [vmem:[%s6629_s22 + $0x68] sm:$0xff]  }
0x1552   : > { %5217 = vmatprep.subr.bf16.mxu0 %v5602_v1 }
0x15ca   : > { %v2534_v23 = vpop.xlane.xlu0 %2533 }
0x15cb   : > { %v2535_v24 = vsub.f32 %v2526_v7, %v2534_v23  ;;  %v2950_v7 = vsel %vm913_vm3, %v4618_v61, 0  ;;  %v4665_v23 = vld [vmem:[%s6626_s23 + $0x6] ss:$0 sm:$0xff] }
0x15cd   : > { %v2536_v25 = vmul.f32 1.442695, %v2535_v24 }
0x15cf   : > { %5518 = vpow2.f32 %v2536_v25 }
0x15d9   : > { %v5519_v26 = vpop.eup %5518 }
0x15da   : > { %v2538_v27 = vsel %vm850_vm2, %v5519_v26, 0.0 }
0x15db   : > { %2539 = vadd.xlane.f32.xlu1 %v2538_v27 }
0x1668   : > { %v2540_v28 = vpop.xlane.xlu1 %2539 }
0x1669   : > { %5520 = vrcp.f32 %v2540_v28 }
0x1673   : > { %v5521_v29 = vpop.eup %5520 }
0x1674   : > { %v2542_v30 = vmul.f32 %v5521_v29, %v5519_v26 }
0x1676   : > { %v2543_v32 = vpack.c.bf16 %v2542_v30, %v2542_v30 }
0x1678   : > { %5172 = vmatmul.mubr.msk.bf16.vlgmr.msra.gmra.mrb[56].mxu1 %vm850_vm2, %v2543_v32 }
0x1679   : > { %5184 = vmatpush3.bf16.msra.mxu1 %v5464_v31  ;;  %5187 = vmatprep.mubr.msk.bf16.mxu1 %vm5603_vm0, %v5602_v1 }
0x167a   : > { %5185 = vmatprep.subr.bf16.mxu1 %v5602_v1 }
0x167d   : > { %5186 = vmatpush3.bf16.msra.mxu1 %v5465_v33 }
0x167e   : > { %5199 = vmatprep.subr.bf16.mxu1 %v5602_v1 }
0x1680   : > { %5188 = vmatmul.mubr.msk.bf16.vlgmr.msra.gmra.mrb[60].mxu1 %vm677_vm1, %v6129_v39 }
0x1681   : > { %5201 = vmatprep.mubr.msk.bf16.mxu1 %vm5603_vm0, %v5602_v1 }
0x174b   : > { %v2585_v34 = vpop.f32.mrb[56].mxu1 }
0x174c   : > { %v5173_v35 = vpop.f32.mrb[57].mxu1  ;;  %v2591_v9 = vpack.c.bf16 %v2585_v34, %v2585_v34 }
0x174d   : > { %v2588_v36 = vpop.f32.mrb[58].mxu1 }
0x174e   : > { %v5174_v38 = vpop.f32.mrb[59].mxu1  ;;  %v4656_v36 = vld [vmem:[%s6628_s30 + $0x6] ss:$0 sm:$0xff] }
0x1753   : > { %v2718_v42 = vpop.f32.mrb[60].mxu1 }
0x1754   : > { %v2719_v43 = vadd.f32 %v4633_v40, %v2718_v42  ;;  %v5189_v44 = vpop.f32.mrb[61].mxu1 }
0x1755   : > { %v2721_v45 = vpop.f32.mrb[62].mxu1 }
0x1756   : > { %v2791_v47 = vpack.c.bf16 %v2719_v43, %v2719_v43  ;;  %v5190_v48 = vpop.f32.mrb[63].mxu1 }
0x1758   : > { %v2796_v49 = vsel %vm850_vm2, %v2791_v47, 0 }
0x1759   : > { %5200 = vmatpush3.bf16.xpose.msra.mxu1 %v2796_v49 }
0x175a   : > { %5211 = vmatprep.subr.bf16.mxu1 %v5602_v1 }
0x1760   : > { %5202 = vmatmul.mubr.msk.bf16.vlgmr.msra.gmra.mrb[64].mxu1 %vm850_vm2, %v2790_v51 }
0x1761   : > { %5213 = vmatprep.mubr.msk.bf16.mxu1 %vm5603_vm0, %v5602_v1  ;;  %5212 = vmatpush3.bf16.msra.mxu1 %v2904_v63 }
0x1762   : > { %5223 = vmatprep.subr.bf16.mxu1 %v5602_v1 }
0x1833   : > { %v2832_v5 = vpop.f32.mrb[64].mxu1 }
0x1834   : > { %v5203_v52 = vpop.f32.mrb[65].mxu1  ;;  %v2838_v53 = vsel %vm850_vm2, %v2832_v5, -inf }
0x1835   : > { %2839 = vmax.xlane.f32.xlu0 %v2838_v53  ;;  %v2835_v54 = vpop.f32.mrb[66].mxu1 }
0x1836   : > { %v5204_v55 = vpop.f32.mrb[67].mxu1 }
0x18c2   : > { %v2840_v56 = vpop.xlane.xlu0 %2839 }
0x18c3   : > { %v2841_v57 = vsub.f32 %v2832_v5, %v2840_v56 }
0x18c5   : > { %v2842_v58 = vmul.f32 1.442695, %v2841_v57 }
0x18c7   : > { %5522 = vpow2.f32 %v2842_v58 }
0x18d1   : > { %v5523_v59 = vpop.eup %5522 }
0x18d2   : > { %v2844_v60 = vsel %vm850_vm2, %v5523_v59, 0.0 }
0x18d3   : > { %2845 = vadd.xlane.f32.xlu1 %v2844_v60 }
0x1960   : > { %v2846_v0 = vpop.xlane.xlu1 %2845 }
0x1961   : > { %5524 = vrcp.f32 %v2846_v0  ;;  %v4680_v0 = vld [vmem:[%s6631_s7 + $0x18] sm:$0xf] }
0x196b   : > { %v5525_v2 = vpop.eup %5524 }
0x196c   : > { %v2848_v3 = vmul.f32 %v5525_v2, %v5523_v59  ;;  %v3302_v2 = vsel %vm913_vm3, %v4680_v0, 0 }
0x196e   : > { %v2849_v4 = vpack.c.bf16 %v2848_v3, %v2848_v3 }
0x1970   : > { %5208 = vmatmul.mubr.msk.bf16.vlgmr.msra.gmra.mrb[72].mxu0 %vm850_vm2, %v2849_v4 }
0x1971   : > { %5218 = vmatpush3.bf16.msra.mxu0 %v2950_v7  ;;  %5219 = vmatprep.mubr.msk.bf16.mxu0 %vm5603_vm0, %v5602_v1  ;;  %v5472_v7 = vld [vmem:[%s6624_s4 + $0x70] sm:$0xff]  }
0x1972   : > { %5231 = vmatprep.subr.bf16.mxu0 %v5602_v1 }
0x1978   : > { %5220 = vmatmul.mubr.msk.bf16.vlgmr.msra.gmra.mrb[76].mxu0 %vm850_vm2, %v2591_v9  ;;  %v5473_v9 = vld [vmem:[%s6624_s4 + $0x78] sm:$0xff]   ;;  %s6632_s4 = sld [smem:[#allocation19_spill]] }
0x1979   : > { %5232 = vmatpush3.bf16.msra.mxu0 %v5466_v8  ;;  %5235 = vmatprep.mubr.msk.bf16.mxu0 %vm5603_vm0, %v5602_v1 }
0x197a   : > { %5233 = vmatprep.subr.bf16.mxu0 %v5602_v1 }
0x197d   : > { %5234 = vmatpush3.bf16.msra.mxu0 %v5467_v10  ;;  %v5474_v10 = vld [vmem:[%s6629_s22 + $0x70] sm:$0xff]  }
0x197e   : > { %5247 = vmatprep.subr.bf16.mxu0 %v5602_v1 }
0x1980   : > { %5236 = vmatmul.mubr.msk.bf16.vlgmr.msra.gmra.mrb[80].mxu0 %vm677_vm1, %v6129_v39 }
0x1981   : > { %5249 = vmatprep.mubr.msk.bf16.mxu0 %vm5603_vm0, %v5602_v1 }
0x1a43   : > { %v2891_v11 = vpop.f32.mrb[72].mxu0 }
0x1a44   : > { %v2897_v13 = vpack.c.bf16 %v2891_v11, %v2891_v11  ;;  %v5209_v14 = vpop.f32.mrb[73].mxu0  ;;  %v5475_v11 = vld [vmem:[%s6629_s22 + $0x78] sm:$0xff]  }
0x1a45   : > { %v2894_v15 = vpop.f32.mrb[74].mxu0 }
0x1a46   : > { %v5210_v16 = vpop.f32.mrb[75].mxu0  ;;  %5214 = vmatmul.mubr.msk.bf16.vlgmr.msra.gmra.mrb[68].mxu1 %vm850_vm2, %v2897_v13  ;;  %v5476_v13 = vld [vmem:[%s6623_s24 + $0x70] sm:$0xff]  }
0x1a47   : > { %5224 = vmatpush3.bf16.msra.mxu1 %v5468_v12  ;;  %5227 = vmatprep.mubr.msk.bf16.mxu1 %vm5603_vm0, %v5602_v1 }
0x1a48   : > { %5225 = vmatprep.subr.bf16.mxu1 %v5602_v1 }
0x1a4b   : > { %v2986_v18 = vpop.f32.mrb[76].mxu0  ;;  %5226 = vmatpush3.bf16.msra.mxu1 %v5469_v17 }
0x1a4c   : > { %v5221_v6 = vpop.f32.mrb[77].mxu0  ;;  %5239 = vmatprep.subr.bf16.mxu1 %v5602_v1 }
0x1a4d   : > { %v2989_v20 = vpop.f32.mrb[78].mxu0 }
0x1a4e   : > { %v5222_v21 = vpop.f32.mrb[79].mxu0  ;;  %5228 = vmatmul.mubr.msk.bf16.vlgmr.msra.gmra.mrb[72].mxu1 %vm677_vm1, %v6129_v39 }
0x1a4f   : > { %5240 = vmatpush3.bf16.msra.mxu1 %v5470_v19  ;;  %5243 = vmatprep.mubr.msk.bf16.mxu1 %vm5603_vm0, %v5602_v1 }
0x1a50   : > { %5241 = vmatprep.subr.bf16.mxu1 %v5602_v1 }
0x1a53   : > { %v3116_v24 = vpop.f32.mrb[80].mxu0  ;;  %5242 = vmatpush3.bf16.msra.mxu1 %v5471_v22  ;;  %v4705_v22 = vld [vmem:[%s6630_s6 + $0x7] ss:$0 sm:$0xff]  ;;  %s6529_s6 = scalar_lea.hbm %s6632_s4, %s4791_s27 }
0x1a54   : > { %v3117_v25 = vadd.f32 %v4665_v23, %v3116_v24  ;;  %v5237_v26 = vpop.f32.mrb[81].mxu0  ;;  %5253 = vmatprep.subr.bf16.mxu1 %v5602_v1 }
0x1a55   : > { %v3119_v27 = vpop.f32.mrb[82].mxu0 }
0x1a56   : > { %v3189_v28 = vpack.c.bf16 %v3117_v25, %v3117_v25  ;;  %v5238_v29 = vpop.f32.mrb[83].mxu0  ;;  %5244 = vmatmul.mubr.msk.bf16.vlgmr.msra.gmra.mrb[76].mxu1 %vm677_vm1, %v6129_v39 }
0x1a57   : > { %5255 = vmatprep.mubr.msk.bf16.mxu1 %vm5603_vm0, %v5602_v1 }
0x1a58   : > { %v3194_v30 = vsel %vm850_vm2, %v3189_v28, 0 }
0x1a59   : > { %5248 = vmatpush3.bf16.xpose.msra.mxu0 %v3194_v30 }
0x1a5a   : > { %5259 = vmatprep.subr.bf16.mxu0 %v5602_v1 }
0x1b19   : > { %v2940_v31 = vpop.f32.mrb[68].mxu1 }
0x1b1a   : > { %v6283_v32 = vadd.f32 %v2986_v18, %v2940_v31  ;;  %v5215_v33 = vpop.f32.mrb[69].mxu1  ;;  %v5477_v18 = vld [vmem:[%s6623_s24 + $0x78] sm:$0xff]  }
0x1b1b   : > { %v2943_v34 = vpop.f32.mrb[70].mxu1 }
0x1b1c   : > { %v5216_v35 = vpop.f32.mrb[71].mxu1 }
0x1b1d   : > { %v4696_v35 = vld [vmem:[%s6626_s23 + $0x7] ss:$0 sm:$0xff] }
0x1b21   : > { %v3051_v38 = vpop.f32.mrb[72].mxu1 }
0x1b22   : > { %v3052_v40 = vadd.f32 %v4656_v36, %v3051_v38  ;;  %v5229_v41 = vpop.f32.mrb[73].mxu1  ;;  %v4687_v36 = vld [vmem:[%s6628_s30 + $0x7] ss:$0 sm:$0xff] }
0x1b23   : > { %v3054_v42 = vpop.f32.mrb[74].mxu1 }
0x1b24   : > { %v3187_v43 = vmul.f32 0.35355338, %v3052_v40  ;;  %v5230_v44 = vpop.f32.mrb[75].mxu1 }
0x1b26   : > { %v3188_v45 = vpack.c.bf16 %v3187_v43, %v3187_v43 }
0x1b28   : > { %5250 = vmatmul.mubr.msk.bf16.vlgmr.msra.gmra.mrb[84].mxu0 %vm850_vm2, %v3188_v45 }
0x1b29   : > { %v3181_v47 = vpop.f32.mrb[76].mxu1  ;;  %5261 = vmatprep.mubr.msk.bf16.mxu0 %vm5603_vm0, %v5602_v1  ;;  %5260 = vmatpush3.bf16.msra.mxu0 %v3302_v2 }
0x1b2a   : > { %v3182_v48 = vadd.f32 %v4674_v46, %v3181_v47  ;;  %v5245_v49 = vpop.f32.mrb[77].mxu1  ;;  %5273 = vmatprep.subr.bf16.mxu0 %v5602_v1 }
0x1b2b   : > { %v3184_v50 = vpop.f32.mrb[78].mxu1 }
0x1b2c   : > { %v3248_v51 = vpack.c.bf16 %v3182_v48, %v3182_v48  ;;  %v5246_v5 = vpop.f32.mrb[79].mxu1 }
0x1b2e   : > { %v3253_v52 = vsel %vm913_vm3, %v3248_v51, 0 }
0x1b2f   : > { %5254 = vmatpush3.bf16.msra.mxu1 %v3253_v52 }
0x1b30   : > { %5265 = vmatprep.subr.bf16.mxu1 %v5602_v1 }
0x1bfb   : > { %v3230_v53 = vpop.f32.mrb[84].mxu0 }
0x1bfc   : > { %v5251_v54 = vpop.f32.mrb[85].mxu0  ;;  %v3236_v55 = vsel %vm850_vm2, %v3230_v53, -inf }
0x1bfd   : > { %3237 = vmax.xlane.f32.xlu0 %v3236_v55  ;;  %v3233_v56 = vpop.f32.mrb[86].mxu0 }
0x1bfe   : > { %v5252_v57 = vpop.f32.mrb[87].mxu0 }
0x1bff   : > { %v4711_v57 = vld [vmem:[%s6631_s7 + $0x1c] sm:$0xf]  ;;  %s5542_s7 = sshll.u32 %s5604_s21, 4  ;;  %s5543_s7 = int_to_ptr.vmem [resolvable:$false] %s5542_s7 }
0x1c00   : > { %s5544_s26 = scalar_lea.vmem %s5543_s7, 32  ;;  %p5545_p0 = scmp.lt.s32.totalorder %s6531_s28, %s5543_s7 }
0x1c01   : > { %p5546_p1 = scmp.lt.s32.totalorder %s5544_s26, %s5538_s3 }
0x1c03   : > { %p5547_p2 = por %p5546_p1, %p5545_p0 }
0x1c05   : > { %p5548_p3 = pnand %p5547_p2, %p5541_p13 }
0x1c8a   : > { %v3238_v58 = vpop.xlane.xlu0 %3237 }
0x1c8b   : > { %v3239_v59 = vsub.f32 %v3230_v53, %v3238_v58  ;;  %v3655_v58 = vsel %vm913_vm3, %v4711_v57, 0  ;;  %v5485_v57 = vld [vmem:[%s6588_s17 + $0x20] sm:$0xff]  }
0x1c8d   : > { %v3240_v60 = vmul.f32 1.442695, %v3239_v59 }
0x1c8f   : > { %5526 = vpow2.f32 %v3240_v60 }
0x1c99   : > { %v5527_v62 = vpop.eup %5526 }
0x1c9a   : > { %v3242_v63 = vsel %vm850_vm2, %v5527_v62, 0.0 }
0x1c9b   : > { %3243 = vadd.xlane.f32.xlu1 %v3242_v63 }
0x1d28   : > { %v3244_v61 = vpop.xlane.xlu1 %3243 }
0x1d29   : > { %5528 = vrcp.f32 %v3244_v61 }
0x1d33   : > { %v5529_v3 = vpop.eup %5528 }
0x1d34   : > { %v3246_v4 = vmul.f32 %v5529_v3, %v5527_v62 }
0x1d36   : > { %v3247_v8 = vpack.c.bf16 %v3246_v4, %v3246_v4 }
0x1d38   : > { %5256 = vmatmul.mubr.msk.bf16.vlgmr.msra.gmra.mrb[80].mxu1 %vm850_vm2, %v3247_v8  ;;  %v4714_v8 = vld [vmem:[%s6579_s8 + $0x1] ss:$0 sm:$0xff] }
0x1d39   : > { %5266 = vmatpush3.bf16.msra.mxu1 %v5472_v7  ;;  %5269 = vmatprep.mubr.msk.bf16.mxu1 %vm5603_vm0, %v5602_v1 }
0x1d3a   : > { %5267 = vmatprep.subr.bf16.mxu1 %v5602_v1 }
0x1d3d   : > { %5268 = vmatpush3.bf16.msra.mxu1 %v5473_v9 }
0x1d3e   : > { %5281 = vmatprep.subr.bf16.mxu1 %v5602_v1 }
0x1d40   : > { %5270 = vmatmul.mubr.msk.bf16.vlgmr.msra.gmra.mrb[84].mxu1 %vm677_vm1, %v6129_v39 }
0x1d41   : > { %5282 = vmatpush3.bf16.msra.mxu1 %v5474_v10  ;;  %5285 = vmatprep.mubr.msk.bf16.mxu1 %vm5603_vm0, %v5602_v1 }
0x1d42   : > { %5283 = vmatprep.subr.bf16.mxu1 %v5602_v1 }
0x1d45   : > { %5284 = vmatpush3.bf16.msra.mxu1 %v5475_v11 }
0x1d46   : > { %5295 = vmatprep.subr.bf16.mxu1 %v5602_v1 }
0x1d48   : > { %5286 = vmatmul.mubr.msk.bf16.vlgmr.msra.gmra.mrb[88].mxu1 %vm677_vm1, %v6129_v39 }
0x1d49   : > { %5297 = vmatprep.mubr.msk.bf16.mxu1 %vm5603_vm0, %v5602_v1 }
0x1e0b   : > { %v3289_v12 = vpop.f32.mrb[80].mxu1 }
0x1e0c   : > { %v3295_v14 = vpack.c.bf16 %v3289_v12, %v3289_v12  ;;  %v5257_v15 = vpop.f32.mrb[81].mxu1 }
0x1e0d   : > { %v3292_v16 = vpop.f32.mrb[82].mxu1 }
0x1e0e   : > { %v5258_v17 = vpop.f32.mrb[83].mxu1  ;;  %5262 = vmatmul.mubr.msk.bf16.vlgmr.msra.gmra.mrb[88].mxu0 %vm850_vm2, %v3295_v14 }
0x1e0f   : > { %5274 = vmatpush3.bf16.msra.mxu0 %v5476_v13  ;;  %5277 = vmatprep.mubr.msk.bf16.mxu0 %vm5603_vm0, %v5602_v1 }
0x1e10   : > { %5275 = vmatprep.subr.bf16.mxu0 %v5602_v1 }
0x1e13   : > { %v3404_v19 = vpop.f32.mrb[84].mxu1  ;;  %5276 = vmatpush3.bf16.msra.mxu0 %v5477_v18 }
0x1e14   : > { %v5271_v6 = vpop.f32.mrb[85].mxu1  ;;  %5289 = vmatprep.subr.bf16.mxu0 %v5602_v1  ;;  %v3405_v43 = vadd.f32 %v4687_v36, %v3404_v19 }
0x1e15   : > { %v3407_v20 = vpop.f32.mrb[86].mxu1 }
0x1e16   : > { %v5272_v21 = vpop.f32.mrb[87].mxu1  ;;  %5278 = vmatmul.mubr.msk.bf16.vlgmr.msra.gmra.mrb[92].mxu0 %vm677_vm1, %v6129_v39  ;;  %v3540_v46 = vmul.f32 0.35355338, %v3405_v43  ;;  %v5478_v20 = vld [vmem:[%s6580_s9 + $0x10] sm:$0xff]  }
0x1e17   : > { %5291 = vmatprep.mubr.msk.bf16.mxu0 %vm5603_vm0, %v5602_v1  ;;  %v5480_v21 = vld [vmem:[%s6582_s11 + $0x20] sm:$0xff]  }
0x1e18   : > { %v3541_v47 = vpack.c.bf16 %v3540_v46, %v3540_v46 }
0x1e1b   : > { %v3534_v23 = vpop.f32.mrb[88].mxu1 }
0x1e1c   : > { %v3535_v24 = vadd.f32 %v4705_v22, %v3534_v23  ;;  %v5287_v25 = vpop.f32.mrb[89].mxu1  ;;  %v5481_v22 = vld [vmem:[%s6582_s11 + $0x28] sm:$0xff]  }
0x1e1d   : > { %v3537_v26 = vpop.f32.mrb[90].mxu1 }
0x1e1e   : > { %v3601_v27 = vpack.c.bf16 %v3535_v24, %v3535_v24  ;;  %v5288_v28 = vpop.f32.mrb[91].mxu1 }
0x1e20   : > { %v3606_v29 = vsel %vm913_vm3, %v3601_v27, 0  ;;  %v4717_v27 = vld [vmem:[%s6584_s13 + $0x1] ss:$0 sm:$0xff] }
0x1e21   : > { %5296 = vmatpush3.bf16.msra.mxu1 %v3606_v29  ;;  %v4718_v29 = vld [vmem:[%s6585_s14 + $0x1] ss:$0 sm:$0xff] }
0x1e22   : > { %5307 = vmatprep.subr.bf16.mxu1 %v5602_v1 }
0x1ee1   : > { %v3338_v30 = vpop.f32.mrb[88].mxu0 }
0x1ee2   : > { %v3344_v39 = vadd.f32 %v3338_v30, %v6283_v32  ;;  %v5263_v31 = vpop.f32.mrb[89].mxu0 }
0x1ee3   : > { %v3341_v33 = vpop.f32.mrb[90].mxu0 }
0x1ee4   : > { %v5264_v34 = vpop.f32.mrb[91].mxu0  ;;  %v5482_v33 = vld [vmem:[%s6582_s11 + $0x30] sm:$0xff]  }
0x1ee5   : > { %v5483_v34 = vld [vmem:[%s6582_s11 + $0x38] sm:$0xff]  }
0x1ee9   : > { %v3469_v38 = vpop.f32.mrb[92].mxu0 }
0x1eea   : > { %v3470_v40 = vadd.f32 %v4696_v35, %v3469_v38  ;;  %v5279_v41 = vpop.f32.mrb[93].mxu0  ;;  %v4724_v35 = vld [vmem:[%s6581_s10 + $0x1] ss:$0 sm:$0xff] }
0x1eeb   : > { %v3472_v42 = vpop.f32.mrb[94].mxu0 }
0x1eec   : > { %v3542_v44 = vpack.c.bf16 %v3470_v40, %v3470_v40  ;;  %v5280_v45 = vpop.f32.mrb[95].mxu0 }
0x1eed   : > { %v4737_v45 = vld [vmem:[%s6583_s12 + $0x1] ss:$0 sm:$0xff] }
0x1eee   : > { %v3547_v32 = vsel %vm850_vm2, %v3542_v44, 0 }
0x1eef   : > { %5290 = vmatpush3.bf16.xpose.msra.mxu0 %v3547_v32 }
0x1ef0   : > { %5301 = vmatprep.subr.bf16.mxu0 %v5602_v1 }
0x1ef6   : > { %5292 = vmatmul.mubr.msk.bf16.vlgmr.msra.gmra.mrb[96].mxu0 %vm850_vm2, %v3541_v47 }
0x1ef7   : > { %5303 = vmatprep.mubr.msk.bf16.mxu0 %vm5603_vm0, %v5602_v1  ;;  %5302 = vmatpush3.bf16.msra.mxu0 %v3655_v58  ;;  %v5486_v58 = vld [vmem:[%s6588_s17 + $0x18] sm:$0xff]  }
0x1ef8   : > { %5315 = vmatprep.subr.bf16.mxu0 %v5602_v1 }
0x1fc9   : > { %v3583_v48 = vpop.f32.mrb[96].mxu0 }
0x1fca   : > { %v5293_v49 = vpop.f32.mrb[97].mxu0  ;;  %v3589_v50 = vsel %vm850_vm2, %v3583_v48, -inf }
0x1fcb   : > { %3590 = vmax.xlane.f32.xlu0 %v3589_v50  ;;  %v3586_v51 = vpop.f32.mrb[98].mxu0 }
0x1fcc   : > { %v5294_v5 = vpop.f32.mrb[99].mxu0 }
0x2058   : > { %v3591_v52 = vpop.xlane.xlu0 %3590 }
0x2059   : > { %v3592_v53 = vsub.f32 %v3583_v48, %v3591_v52 }
0x205b   : > { %v3593_v54 = vmul.f32 1.442695, %v3592_v53 }
0x205d   : > { %5530 = vpow2.f32 %v3593_v54 }
0x2067   : > { %v5531_v55 = vpop.eup %5530 }
0x2068   : > { %v3595_v56 = vsel %vm850_vm2, %v5531_v55, 0.0 }
0x2069   : > { %3596 = vadd.xlane.f32.xlu1 %v3595_v56  ;;  %v5484_v56 = vld [vmem:[%s6588_s17 + $0x10] sm:$0xff]  }
0x20f6   : > { %v3597_v59 = vpop.xlane.xlu1 %3596 }
0x20f7   : > { %5532 = vrcp.f32 %v3597_v59  ;;  %v5487_v59 = vld [vmem:[%s6588_s17 + $0x28] sm:$0xff]  }
0x2101   : > { %v5533_v60 = vpop.eup %5532 }
0x2102   : > { %v3599_v62 = vmul.f32 %v5533_v60, %v5531_v55 }
0x2104   : > { %v3600_v63 = vpack.c.bf16 %v3599_v62, %v3599_v62 }
0x2106   : > { %5298 = vmatmul.mubr.msk.bf16.vlgmr.msra.gmra.mrb[92].mxu1 %vm850_vm2, %v3600_v63 }
0x2107   : > { %5311 = vmatprep.mubr.msk.bf16.mxu1 %vm5603_vm0, %v5602_v1  ;;  %5308 = vmatpush3.bf16.msra.mxu1 %v5478_v20  ;;  %v5492_v20 = vld [vmem:[%s6588_s17 + $0x48] sm:$0xff]  }
0x2108   : > { %5309 = vmatprep.subr.bf16.mxu1 %v5602_v1 }
0x21d9   : > { %v3642_v0 = vpop.f32.mrb[92].mxu1 }
0x21da   : > { %v3648_v2 = vpack.c.bf16 %v3642_v0, %v3642_v0  ;;  %v5299_v61 = vpop.f32.mrb[93].mxu1  ;;  %v3926_v0 = vlaneseq }
0x21db   : > { %v3645_v3 = vpop.f32.mrb[94].mxu1  ;;  %v4745_v61 = vld [vmem:[%s6586_s15 + $0x1] ss:$0 sm:$0xff] }
0x21dc   : > { %v5300_v4 = vpop.f32.mrb[95].mxu1  ;;  %5304 = vmatmul.mubr.msk.bf16.vlgmr.msra.gmra.mrb[100].mxu0 %vm850_vm2, %v3648_v2 }
0x21dd   : > { %5323 = vmatprep.mubr.msk.bf16.mxu0 %vm5603_vm0, %v5602_v1  ;;  %5316 = vmatpush3.bf16.msra.mxu0 %v5480_v21  ;;  %v4746_v4 = vld [vmem:[%s6587_s16 + $0x1] ss:$0 sm:$0xff] }
0x21de   : > { %5317 = vmatprep.subr.bf16.mxu0 %v5602_v1 }
0x21e1   : > { %5318 = vmatpush3.bf16.msra.mxu0 %v5481_v22 }
0x21e2   : > { %5319 = vmatprep.subr.bf16.mxu0 %v5602_v1 }
0x21e5   : > { %5320 = vmatpush3.bf16.msra.mxu0 %v5482_v33 }
0x21e6   : > { %5321 = vmatprep.subr.bf16.mxu0 %v5602_v1 }
0x21e9   : > { %5322 = vmatpush3.bf16.msra.mxu0 %v5483_v34 }
0x21ea   : > { %5343 = vmatprep.subr.bf16.mxu0 %v5602_v1 }
0x22af   : > { %v3691_v7 = vpop.f32.mrb[100].mxu0 }
0x22b0   : > { %v3697_v9 = vadd.f32 %v3691_v7, %v3344_v39  ;;  %v5305_v10 = vpop.f32.mrb[101].mxu0  ;;  %v6447_v7 = vshrl.u32 %v3926_v0, 7 }
0x22b1   : > { %v3694_v11 = vpop.f32.mrb[102].mxu0  ;;  %v5488_v10 = vld [vmem:[%s6588_s17] sm:$0xff]  }
0x22b2   : > { %v3706_v12 = vadd.f32 %v4714_v8, %v3697_v9  ;;  %v5306_v13 = vpop.f32.mrb[103].mxu0  ;;  %vm3929_vm5 = vcmp.ne.s32.totalorder %v6447_v7, 7  ;;  %vm3928_vm6 = vcmp.ne.s32.totalorder %v6447_v7, 0 }
0x22b4   : > { %v3707_v14 = vadd.f32 %v3706_v12, %v6122_v37  ;;  %v5479_v37 = vld [vmem:[%s6580_s9 + $0x18] sm:$0xff]  }
0x22b5   : > { %5310 = vmatpush3.bf16.msra.mxu1 %v5479_v37  ;;  %v5493_v37 = vld [vmem:[%s6588_s17 + $0x38] sm:$0xff]  }
0x22b6   : > { %v3712_v15 = vsel %vm677_vm1, %v3707_v14, 0.0  ;;  %5327 = vmatprep.subr.bf16.mxu1 %v5602_v1 }
0x22b7   : > { %3713 = vadd.xlane.f32.xlu0 %v3712_v15 }
0x2344   : > { %v3714_v16 = vpop.xlane.xlu0 %3713 }
0x2345   : > { %v3715_v17 = vmul.f32 0.03125, %v3714_v16  ;;  %v5489_v16 = vld [vmem:[%s6588_s17 + $0x8] sm:$0xff]  }
0x2347   : > { %v3716_v18 = vsub.f32 %v3707_v14, %v3715_v17 }
0x2349   : > { %v3717_v19 = vmul.f32 %v3716_v18, %v3716_v18 }
0x234b   : > { %v3718_v6 = vsel %vm677_vm1, %v3717_v19, 0.0  ;;  %v5490_v19 = vld [vmem:[%s6588_s17 + $0x40] sm:$0xff]  }
0x234c   : > { %3719 = vadd.xlane.f32.xlu1 %v3718_v6  ;;  %v5491_v6 = vld [vmem:[%s6588_s17 + $0x30] sm:$0xff]  }
0x23d9   : > { %v3720_v23 = vpop.xlane.xlu1 %3719 }
0x23da   : > { %v3721_v24 = vmul.f32 0.03125, %v3720_v23 }
0x23dc   : > { %v3722_v25 = vadd.f32 1e-05, %v3721_v24 }
0x23de   : > { %5534 = vrsqrt.f32 %v3722_v25 }
0x23e8   : > { %v5535_v26 = vpop.eup %5534 }
0x23e9   : > { %v3724_v28 = vmul.f32 %v5535_v26, %v3716_v18 }
0x23eb   : > { %v3731_v30 = vmul.f32 %v4717_v27, %v3724_v28 }
0x23ed   : > { %v3738_v39 = vadd.f32 %v4718_v29, %v3731_v30 }
0x23ef   : > { %v3739_v31 = vpack.c.bf16 %v3738_v39, %v3738_v39 }
0x23f1   : > { %5312 = vmatmul.mubr.msk.bf16.vlgmr.msra.gmra.mrb[96].mxu1 %vm677_vm1, %v3739_v31  ;;  %v4764_v31 = vld [vmem:[%s6589_s18] ss:$0 sm:$0xff] }
0x23f2   : > { %5331 = vmatprep.mubr.msk.bf16.mxu1 %vm5603_vm0, %v5602_v1  ;;  %5328 = vmatpush3.bf16.msra.mxu1 %v5484_v56 }
0x23f3   : > { %5329 = vmatprep.subr.bf16.mxu1 %v5602_v1 }
0x23f6   : > { %5330 = vmatpush3.bf16.msra.mxu1 %v5486_v58  ;;  %v4787_v58 = vld [vmem:[%s6589_s18 + $0x1] ss:$0 sm:$0xff] }
0x23f7   : > { %5335 = vmatprep.subr.bf16.mxu1 %v5602_v1 }
0x24c4   : > { %v3802_v36 = vpop.f32.mrb[96].mxu1 }
0x24c5   : > { %v3803_v38 = vadd.f32 %v4724_v35, %v3802_v36  ;;  %v5313_v40 = vpop.f32.mrb[97].mxu1 }
0x24c6   : > { %v3805_v41 = vpop.f32.mrb[98].mxu1 }
0x24c7   : > { %v3808_v42 = vmax.f32 %v3803_v38, 0.0  ;;  %v5314_v43 = vpop.f32.mrb[99].mxu1  ;;  %v5494_v38 = vld [vmem:[%s6588_s17 + $0x50] sm:$0xff]  }
0x24c9   : > { %v3809_v44 = vpack.c.bf16 %v3808_v42, %v3808_v42 }
0x24cb   : > { %5324 = vmatmul.mubr.msk.bf16.vlgmr.msra.gmra.mrb[104].mxu0 %vm2210_vm4, %v3809_v44 }
0x24cc   : > { %5347 = vmatprep.mubr.msk.bf16.mxu0 %vm5603_vm0, %v5602_v1  ;;  %5344 = vmatpush3.bf16.msra.mxu0 %v5485_v57 }
0x24cd   : > { %5345 = vmatprep.subr.bf16.mxu0 %v5602_v1 }
0x24d0   : > { %5346 = vmatpush3.bf16.msra.mxu0 %v5487_v59 }
0x24d1   : > { %5359 = vmatprep.subr.bf16.mxu0 %v5602_v1 }
0x259e   : > { %v3888_v32 = vpop.f32.mrb[104].mxu0 }
0x259f   : > { %v3889_v46 = vadd.f32 %v4737_v45, %v3888_v32  ;;  %v5325_v47 = vpop.f32.mrb[105].mxu0  ;;  %v5495_v45 = vld [vmem:[%s6588_s17 + $0x58] sm:$0xff]  }
0x25a0   : > { %v3891_v48 = vpop.f32.mrb[106].mxu0  ;;  %v5496_v47 = vld [vmem:[%s6590_s19] sm:$0xff]  }
0x25a1   : > { %v5326_v49 = vpop.f32.mrb[107].mxu0  ;;  %v3894_v50 = vadd.f32 %v3889_v46, %v3738_v39  ;;  %v5497_v48 = vld [vmem:[%s6590_s19 + $0x8] sm:$0xff]  }
0x25a3   : > { %v3899_v51 = vsel %vm677_vm1, %v3894_v50, 0.0 }
0x25a4   : > { %3900 = vadd.xlane.f32.xlu0 %v3899_v51 }
0x2631   : > { %v3901_v5 = vpop.xlane.xlu0 %3900 }
0x2632   : > { %v3902_v52 = vmul.f32 0.03125, %v3901_v5 }
0x2634   : > { %v3903_v53 = vsub.f32 %v3894_v50, %v3902_v52 }
0x2636   : > { %v3904_v54 = vmul.f32 %v3903_v53, %v3903_v53 }
0x2638   : > { %v3905_v55 = vsel %vm677_vm1, %v3904_v54, 0.0 }
0x2639   : > { %3906 = vadd.xlane.f32.xlu1 %v3905_v55 }
0x26c6   : > { %v3907_v60 = vpop.xlane.xlu1 %3906 }
0x26c7   : > { %v3908_v62 = vmul.f32 0.03125, %v3907_v60 }
0x26c9   : > { %v3909_v63 = vadd.f32 1e-05, %v3908_v62 }
0x26cb   : > { %5536 = vrsqrt.f32 %v3909_v63 }
0x26d5   : > { %v5537_v2 = vpop.eup %5536 }
0x26d6   : > { %v3911_v3 = vmul.f32 %v5537_v2, %v3903_v53 }
0x26d8   : > { %v3918_v8 = vmul.f32 %v4745_v61, %v3911_v3 }
0x26da   : > { %v3925_v9 = vadd.f32 %v4746_v4, %v3918_v8 }
0x26dc   : > { %v3939_v11 = vpack.c.bf16 %v3925_v9, %v3925_v9  ;;  %v3932_v12 = vrot.slane %v3925_v9, 1  ;;  %v3930_v13 = vrot.slane %v3925_v9, 7 }
0x26de   : > { %5332 = vmatmul.mubr.msk.bf16.vlgmr.msra.gmra.mrb[100].mxu1 %vm677_vm1, %v3939_v11  ;;  %v3933_v14 = vsel %vm3929_vm5, %v3932_v12, 0.0  ;;  %v3931_v17 = vsel %vm3928_vm6, %v3930_v13, 0.0  ;;  %v4336_v11 = vld [vmem:[%s6591_s20] sm:$0x1] }
0x26df   : > { %5336 = vmatpush3.bf16.msra.mxu1 %v5488_v10  ;;  %v4055_v15 = vpack.c.bf16 %v3933_v14, %v3933_v14  ;;  %5339 = vmatprep.mubr.msk.bf16.mxu1 %vm5603_vm0, %v5602_v1  ;;  %v3934_v18 = vpack.c.bf16 %v3931_v17, %v3931_v17 }
0x26e0   : > { %5337 = vmatprep.subr.bf16.mxu1 %v5602_v1 }
0x26e1   : > { %5348 = vmatmul.mubr.msk.bf16.vlgmr.msra.gmra.mrb[108].mxu0 %vm677_vm1, %v4055_v15 }
0x26e2   : > { %5363 = vmatprep.mubr.msk.bf16.mxu0 %vm5603_vm0, %v5602_v1  ;;  %5360 = vmatpush3.bf16.msra.mxu0 %v5491_v6 }
0x26e3   : > { %5338 = vmatpush3.bf16.msra.mxu1 %v5489_v16  ;;  %5361 = vmatprep.subr.bf16.mxu0 %v5602_v1 }
0x26e4   : > { %5351 = vmatprep.subr.bf16.mxu1 %v5602_v1 }
0x26e6   : > { %5340 = vmatmul.mubr.msk.bf16.vlgmr.msra.gmra.mrb[104].mxu1 %vm677_vm1, %v3934_v18  ;;  %5362 = vmatpush3.bf16.msra.mxu0 %v5493_v37 }
0x26e7   : > { %5355 = vmatprep.mubr.msk.bf16.mxu1 %vm5603_vm0, %v5602_v1  ;;  %5352 = vmatpush3.bf16.msra.mxu1 %v5490_v19 }
0x26e8   : > { %5353 = vmatprep.subr.bf16.mxu1 %v5602_v1  ;;  %5375 = vmatprep.subr.bf16.mxu0 %v5602_v1 }
0x26eb   : > { %5354 = vmatpush3.bf16.msra.mxu1 %v5492_v20 }
0x26ec   : > { %5367 = vmatprep.subr.bf16.mxu1 %v5602_v1 }
0x27b1   : > { %v3994_v21 = vpop.f32.mrb[100].mxu1 }
0x27b2   : > { %v5333_v22 = vpop.f32.mrb[101].mxu1 }
0x27b3   : > { %v3997_v23 = vpop.f32.mrb[102].mxu1 }
0x27b4   : > { %v5334_v24 = vpop.f32.mrb[103].mxu1  ;;  %v4110_v25 = vpop.f32.mrb[108].mxu0 }
0x27b5   : > { %v5349_v26 = vpop.f32.mrb[109].mxu0 }
0x27b6   : > { %v4113_v27 = vpop.f32.mrb[110].mxu0 }
0x27b7   : > { %v5350_v28 = vpop.f32.mrb[111].mxu0 }
0x27b9   : > { %v4049_v29 = vpop.f32.mrb[104].mxu1 }
0x27ba   : > { %v4050_v30 = vadd.f32 %v4049_v29, %v3994_v21  ;;  %v5341_v39 = vpop.f32.mrb[105].mxu1 }
0x27bb   : > { %v4052_v33 = vpop.f32.mrb[106].mxu1 }
0x27bc   : > { %v4116_v34 = vadd.f32 %v4110_v25, %v4050_v30  ;;  %v5342_v35 = vpop.f32.mrb[107].mxu1 }
0x27be   : > { %v4124_v36 = vadd.f32 %v4764_v31, %v4116_v34 }
0x27c0   : > { %v4125_v40 = vrot.slane %v4124_v36, 7  ;;  %v4135_v41 = vpack.c.bf16 %v4124_v36, %v4124_v36  ;;  %v4127_v42 = vrot.slane %v4124_v36, 1 }
0x27c2   : > { %v4126_v43 = vsel %vm3928_vm6, %v4125_v40, 0.0  ;;  %5356 = vmatmul.mubr.msk.bf16.vlgmr.msra.gmra.mrb[108].mxu1 %vm677_vm1, %v4135_v41  ;;  %v4128_v32 = vsel %vm3929_vm5, %v4127_v42, 0.0 }
0x27c3   : > { %v4129_v44 = vpack.c.bf16 %v4126_v43, %v4126_v43  ;;  %5368 = vmatpush3.bf16.msra.mxu1 %v5494_v38  ;;  %5371 = vmatprep.mubr.msk.bf16.mxu1 %vm5603_vm0, %v5602_v1  ;;  %v4251_v46 = vpack.c.bf16 %v4128_v32, %v4128_v32 }
0x27c4   : > { %5369 = vmatprep.subr.bf16.mxu1 %v5602_v1 }
0x27c5   : > { %5364 = vmatmul.mubr.msk.bf16.vlgmr.msra.gmra.mrb[112].mxu0 %vm677_vm1, %v4129_v44 }
0x27c6   : > { %5379 = vmatprep.mubr.msk.bf16.mxu0 %vm5603_vm0, %v5602_v1  ;;  %5376 = vmatpush3.bf16.msra.mxu0 %v5496_v47 }
0x27c7   : > { %5370 = vmatpush3.bf16.msra.mxu1 %v5495_v45  ;;  %5377 = vmatprep.subr.bf16.mxu0 %v5602_v1 }
0x27ca   : > { %5372 = vmatmul.mubr.msk.bf16.vlgmr.msra.gmra.mrb[112].mxu1 %vm677_vm1, %v4251_v46  ;;  %5378 = vmatpush3.bf16.msra.mxu0 %v5497_v48 }
0x2895   : > { %v4190_v49 = vpop.f32.mrb[108].mxu1 }
0x2896   : > { %v5357_v50 = vpop.f32.mrb[109].mxu1 }
0x2897   : > { %v4193_v51 = vpop.f32.mrb[110].mxu1 }
0x2898   : > { %v5358_v5 = vpop.f32.mrb[111].mxu1  ;;  %v4245_v52 = vpop.f32.mrb[112].mxu0 }
0x2899   : > { %v4246_v53 = vadd.f32 %v4245_v52, %v4190_v49  ;;  %v5365_v54 = vpop.f32.mrb[113].mxu0 }
0x289a   : > { %v4248_v55 = vpop.f32.mrb[114].mxu0 }
0x289b   : > { %v5366_v56 = vpop.f32.mrb[115].mxu0 }
0x289d   : > { %v4306_v57 = vpop.f32.mrb[112].mxu1 }
0x289e   : > { %v4312_v1 = vadd.f32 %v4306_v57, %v4246_v53  ;;  %v5373_v59 = vpop.f32.mrb[113].mxu1 }
0x289f   : > { %v4309_v60 = vpop.f32.mrb[114].mxu1 }
0x28a0   : > { %v4321_v62 = vadd.f32 %v4787_v58, %v4312_v1  ;;  %v5374_v63 = vpop.f32.mrb[115].mxu1 }
0x28a2   : > { %v4322_v0 = vsel %vm677_vm1, %v4321_v62, 0.0 }
0x28a3   : > { %v4323_v2 = vrot.slane %v4322_v0, 4 }
0x28a5   : > { %v4324_v61 = vadd.f32 %v4323_v2, %v4322_v0 }
0x28a7   : > { %v4325_v3 = vrot.slane %v4324_v61, 2 }
0x28a9   : > { %v4326_v4 = vadd.f32 %v4325_v3, %v4324_v61 }
0x28ab   : > { %v4327_v7 = vrot.slane %v4326_v4, 1 }
0x28ad   : > { %v4328_v8 = vadd.f32 %v4327_v7, %v4326_v4 }
0x28af   : > { %v4330_v9 = vmul.f32 0.125, %v4328_v8 }
0x28b1   : > { %v4331_v10 = vpack.c.bf16 %v4330_v9, %v4330_v9 }
0x28b3   : > { %5380 = vmatmul.mubr.msk.bf16.vlgmr.msra.gmra.mrb[116].mxu0 %vm677_vm1, %v4331_v10 }
0x2986   : > { %v4386_v12 = vpop.f32.mrb[116].mxu0 }
0x2987   : > { %v4387_v13 = vadd.f32 %v4386_v12, %v4336_v11  ;;  %v5381_v14 = vpop.f32.mrb[117].mxu0 }
0x2988   : > { %v4389_v15 = vpop.f32.mrb[118].mxu0 }
0x2989   : > { %4392 = vst [vmem:[%s646_s1] sm:$0x1] %v4387_v13  ;;  %v5382_v16 = vpop.f32.mrb[119].mxu0 }
0x298a   : > { %5551 = shalt.err (!%p5548_p3)
}
0x298b   : > { %s5552_s2 = scalar_lea.hbm %s6529_s6, 16  ;;  %s5556_s0 = scalar_lea.hbm %s6632_s4, 32 }
0x298c   : > { %p5553_p4 = scmp.ne.s32.totalorder %s6529_s6, %s5552_s2  ;;  %p5557_p9 = scmp.lt.u32.totalorder %s6529_s6, %s6632_s4 }
0x298d   : > { %p5558_p10 = scmp.lt.u32.totalorder %s5556_s0, %s5552_s2  ;;  %p5560_p12 = scmp.lt.u32.totalorder %s5552_s2, %s6529_s6 }
0x298e   : > { %p5554_p7 = pnand %p5553_p4, %p5753_p5 }
0x298f   : > { %p5559_p11 = por %p5558_p10, %p5557_p9 }
0x2990   : > { %p5555_p8 = pneg %p5554_p7 }
0x2991   : > { %p5561_p13 = por %p5560_p12, %p5559_p11 }
0x2993   : > { %p5562_p0 = pnand %p5561_p13, %p5555_p8 }
0x2995   : > { %5565 = shalt.err (!%p5562_p0)
}
0x2996   : > { %5383 = dma.vmem_to_hbm [thread:$0]  (%p5753_p5), %s6531_s28, 16, %s6529_s6, %s4394_s29  }
0x2997 PF: > { %s6633_s3 = sld [smem:[#allocation7_spill]]  ;;  %s6634_s26 = sld [smem:[#allocation5_spill]] }
0x299d   : > { %p5389_p1 = scmp.ge.s32.totalorder %s6633_s3, 2  ;;  %s4418_s1 = sand.u32 1, %s6634_s26  }
0x299e   : > { %s4419_s21 = scalar_lea.sflag [#allocation3], %s4418_s1 }
0x299f   : > { %p5386_p2 = pnand %p5389_p1, %p5757_p6 }
0x29a1   : > { %5583 = dma.done.wait (!%p5386_p2), %s4419_s21, 16  }
0x29a2   : > { %5585 = vsyncadd (!%p5386_p2), %s4419_s21, 4294967280  ;;  %s6636_s27 = sld [smem:[#allocation8_spill]]  ;;  %s6637_s0 = sld [smem:[#allocation6_spill]] }
0x29a3   : > { %s6638_s26 = sld [smem:[#allocation9_spill]]  ;;  %s6639_s2 = smov %s5592_s25 }
0x29a8   : > { %p31_p3 = scmp.ge.s32.totalorder %s6636_s27, 4   ;;  %s6640_s25 = smov %s6637_s0 }
0x29aa   :  { %33 = sbr.rel (!%p31_p3) target bundleno = 13 (0xd), region = 203 }
0x29b1   :  { %4423 = vsyncpa [#allocation3], 1 }
0x29b2   :  { %4425 = vsyncpa [#allocation3 + $0x1], 1 }

</bundles_post_ra>
